<compile_context>
chip_gen: v7x
topology: tpu7x:2x2x1
jax: 0.10.0
libtpu: 0.0.40
codegen_flags: <defaults>
</compile_context>

<pallas_src>
from functools import partial

import jax
import jax.numpy as jnp
from jax.experimental import pallas as pl
from jax.experimental.pallas import tpu as pltpu


# -----------------------------------------------------------------------------
# helpers
# -----------------------------------------------------------------------------
def _round_up(x, m):
    return (x + m - 1) // m * m


def _pick_tile(dim, prefs):
    """Largest preferred tile that divides `dim`, else the full extent."""
    for t in prefs:
        if dim % t == 0:
            return t
    return dim  # full-extent block is always legal


def _pick_tile_m(M, prefs=(512, 256, 128, 64, 32, 16, 8)):
    """M tile; prefer >=2 grid steps so both v7x TensorCores get work."""
    t = _pick_tile(M, prefs)
    if M // t < 2 and M % 2 == 0 and (M // 2) % 8 == 0 and M // 2 >= 16:
        t = M // 2
    return t


# -----------------------------------------------------------------------------
# Pallas kernels
# -----------------------------------------------------------------------------
def _mm_k1_kernel(*refs, act, in_act, has_res):
    """out = act(in_act(A) @ B + bias [+ res]); single K step, no scratch."""
    if has_res:
        a_ref, b_ref, bias_ref, res_ref, o_ref = refs
    else:
        a_ref, b_ref, bias_ref, o_ref = refs
        res_ref = None
    a = a_ref[...]
    if in_act == "relu":
        a = jnp.maximum(a, 0)
    y = jnp.dot(a, b_ref[...], preferred_element_type=jnp.float32)
    y = y + bias_ref[...]
    if has_res:
        y = y + res_ref[...].astype(jnp.float32)
    if act == "relu":
        y = jnp.maximum(y, 0.0)
    elif act == "sigmoid":
        y = 1.0 / (1.0 + jnp.exp(-y))
    o_ref[...] = y.astype(o_ref.dtype)


def _mm_kacc_kernel(*refs, act, in_act, has_res):
    """Multi-K-step fallback with an f32 VMEM accumulator (unused at this size)."""
    if has_res:
        a_ref, b_ref, bias_ref, res_ref, o_ref, acc_ref = refs
    else:
        a_ref, b_ref, bias_ref, o_ref, acc_ref = refs
        res_ref = None

    @pl.when(pl.program_id(2) == 0)
    def _():
        acc_ref[...] = jnp.zeros_like(acc_ref)

    a = a_ref[...]
    if in_act == "relu":
        a = jnp.maximum(a, 0)
    acc_ref[...] += jnp.dot(a, b_ref[...], preferred_element_type=jnp.float32)

    @pl.when(pl.program_id(2) == pl.num_programs(2) - 1)
    def _():
        y = acc_ref[...] + bias_ref[...]
        if has_res:
            y = y + res_ref[...].astype(jnp.float32)
        if act == "relu":
            y = jnp.maximum(y, 0.0)
        elif act == "sigmoid":
            y = 1.0 / (1.0 + jnp.exp(-y))
        o_ref[...] = y.astype(o_ref.dtype)


def _maxpool_kernel(x_ref, o_ref, *, ntaps):
    m = x_ref[0]
    for t in range(1, ntaps):
        m = jnp.maximum(m, x_ref[t])
    o_ref[...] = m


def _gap_kernel(x_ref, o_ref):
    o_ref[...] = jnp.mean(x_ref[...].astype(jnp.float32), axis=1,
                          keepdims=True).astype(o_ref.dtype)


def _interp_kernel(m_ref, x_ref, o_ref, *, act):
    y = jnp.dot(m_ref[...], x_ref[0], preferred_element_type=jnp.float32)
    if act == "sigmoid":
        y = 1.0 / (1.0 + jnp.exp(-y))
    o_ref[...] = y[None].astype(o_ref.dtype)


# -----------------------------------------------------------------------------
# Pallas wrappers
# -----------------------------------------------------------------------------
def fused_matmul(a, b, bias, residual=None, act="none", in_act="none",
                 out_dtype=jnp.bfloat16):
    """act(in_act(a) @ b + bias [+ residual]) via a tiled Pallas MXU kernel."""
    M, K = a.shape
    Kb, N = b.shape
    assert K == Kb

    tm = _pick_tile_m(M)
    tn = _pick_tile(N, (256, 128))
    bias2 = bias.reshape(1, N).astype(jnp.float32)
    a = a.astype(jnp.bfloat16)
    b = b.astype(jnp.bfloat16)
    has_res = residual is not None

    if K <= 2048:
        # K==1 fast path: no accumulator scratch, direct epilogue store.
        inputs = [a, b, bias2]
        in_specs = [
            pl.BlockSpec((tm, K), lambda i, j: (i, 0)),
            pl.BlockSpec((K, tn), lambda i, j: (0, j)),
            pl.BlockSpec((1, tn), lambda i, j: (0, j)),
        ]
        if has_res:
            inputs.append(residual.astype(jnp.bfloat16))
            in_specs.append(pl.BlockSpec((tm, tn), lambda i, j: (i, j)))
        return pl.pallas_call(
            partial(_mm_k1_kernel, act=act, in_act=in_act, has_res=has_res),
            out_shape=jax.ShapeDtypeStruct((M, N), out_dtype),
            grid=(M // tm, N // tn),
            in_specs=in_specs,
            out_specs=pl.BlockSpec((tm, tn), lambda i, j: (i, j)),
            compiler_params=pltpu.CompilerParams(
                dimension_semantics=("parallel", "parallel"),
                vmem_limit_bytes=48 * 1024 * 1024,
            ),
        )(*inputs)

    # multi-K fallback (never taken at this problem size)
    tk = next((t for t in (1024, 512, 256, 128) if K % t == 0), None)
    if tk is None:
        Kp = _round_up(K, 256)
        tk = 256
        a = jnp.pad(a, ((0, 0), (0, Kp - K)))
        b = jnp.pad(b, ((0, Kp - K), (0, 0)))
    else:
        Kp = K
    inputs = [a, b, bias2]
    in_specs = [
        pl.BlockSpec((tm, tk), lambda i, j, k: (i, k)),
        pl.BlockSpec((tk, tn), lambda i, j, k: (k, j)),
        pl.BlockSpec((1, tn), lambda i, j, k: (0, j)),
    ]
    if has_res:
        inputs.append(residual.astype(jnp.bfloat16))
        in_specs.append(pl.BlockSpec((tm, tn), lambda i, j, k: (i, j)))
    return pl.pallas_call(
        partial(_mm_kacc_kernel, act=act, in_act=in_act, has_res=has_res),
        out_shape=jax.ShapeDtypeStruct((M, N), out_dtype),
        grid_spec=pltpu.PrefetchScalarGridSpec(
            num_scalar_prefetch=0,
            grid=(M // tm, N // tn, Kp // tk),
            in_specs=in_specs,
            out_specs=pl.BlockSpec((tm, tn), lambda i, j, k: (i, j)),
            scratch_shapes=[pltpu.VMEM((tm, tn), jnp.float32)],
        ),
        compiler_params=pltpu.CompilerParams(
            dimension_semantics=("parallel", "parallel", "arbitrary"),
            vmem_limit_bytes=48 * 1024 * 1024,
        ),
    )(*inputs)


# ---- BN folding / padding helpers -------------------------------------------
def _scale_shift(bn, bias, cout):
    if bn is not None:
        gamma, beta, mean, var, eps = bn
        scale = gamma * jax.lax.rsqrt(var + eps)
        shift = beta - mean * scale
        if bias is not None:
            shift = shift + bias * scale
    else:
        scale = jnp.ones((cout,), jnp.float32)
        shift = bias if bias is not None else jnp.zeros((cout,), jnp.float32)
    return scale, shift


def _fold_1x1(w2d, bn, bias, cin_phys):
    """(cin, cout) 1x1 weight -> BN-folded (cin_phys, cout) matrix + f32 shift."""
    cin, cout = w2d.shape
    assert cin_phys >= cin
    scale, shift = _scale_shift(bn, bias, cout)
    m = w2d * scale[None, :]
    if cin_phys > cin:
        m = jnp.pad(m, ((0, cin_phys - cin), (0, 0)))
    return m, shift


def _pad_cout(m, shift, mult=128):
    """Pad output channels to a multiple of 128 (zero cols / zero bias)."""
    cout = m.shape[-1]
    coutp = _round_up(cout, mult)
    if coutp != cout:
        m = jnp.pad(m, ((0, 0), (0, coutp - cout)))
        shift = jnp.pad(shift, ((0, coutp - cout),))
    return m, shift


# ---- conv --------------------------------------------------------------------
def _conv_tap_slices(x, kh, kw, stride, dilation, padding):
    """Per-tap shifted views of x (NHWC), dropping taps that only see padding."""
    n, h, w, c = x.shape
    oh = (h + 2 * padding - dilation * (kh - 1) - 1) // stride + 1
    ow = (w + 2 * padding - dilation * (kw - 1) - 1) // stride + 1
    xp = None
    taps, slices = [], []
    for i in range(kh):
        for j in range(kw):
            r0 = i * dilation - padding
            r1 = r0 + stride * (oh - 1)
            c0 = j * dilation - padding
            c1 = c0 + stride * (ow - 1)
            if r1 < 0 or r0 >= h or c1 < 0 or c0 >= w:
                continue  # tap reads only zero padding -> contributes nothing
            if r0 >= 0 and r1 < h and c0 >= 0 and c1 < w:
                s = x[:, r0:r1 + 1:stride, c0:c1 + 1:stride, :]
            else:
                if xp is None:
                    xp = jnp.pad(x, ((0, 0), (padding, padding),
                                     (padding, padding), (0, 0)))
                s = xp[:, r0 + padding:r1 + padding + 1:stride,
                          c0 + padding:c1 + padding + 1:stride, :]
            taps.append((i, j))
            slices.append(s.reshape(n * oh * ow, c))
    assert slices, "conv has no contributing taps"
    return taps, slices, oh, ow


def conv2d_bn_act(x, w, *, stride=1, padding=0, dilation=1, bn=None, bias=None,
                  act="none", in_act="none", residual=None, pad_out=True):
    """Conv2d (+ folded inference BN) (+ fused residual) (+ activation).

    Output channels are padded to a multiple of 128 (lane-dense stores); the
    padded channels carry exact zeros through the network.  `x` may itself be
    channel-padded (weight cin is zero-padded at the tail to match).
    """
    kh, kw, cin, cout = w.shape
    n = x.shape[0]
    c_phys = x.shape[-1]
    assert c_phys >= cin
    taps, slices, oh, ow = _conv_tap_slices(x, kh, kw, stride, dilation,
                                            padding)
    M = n * oh * ow

    if len(slices) == 1:
        a = slices[0].astype(jnp.bfloat16)           # 1x1 / degenerate: no copy
    else:
        a = jnp.concatenate([s.astype(jnp.bfloat16) for s in slices], axis=-1)

    scale, shift = _scale_shift(bn, bias, cout)
    mats = []
    for (i, j) in taps:
        m = w[i, j] * scale[None, :]
        if c_phys > cin:
            m = jnp.pad(m, ((0, c_phys - cin), (0, 0)))
        mats.append(m)
    b_mat = jnp.concatenate(mats, axis=0) if len(mats) > 1 else mats[0]
    if pad_out:
        b_mat, shift = _pad_cout(b_mat, shift)
    coutp = b_mat.shape[-1]

    res2 = None
    if residual is not None:
        assert residual.shape[-1] == coutp
        res2 = residual.reshape(M, coutp)

    y = fused_matmul(a, b_mat.astype(jnp.bfloat16), shift,
                     residual=res2, act=act, in_act=in_act)
    return y.reshape(n, oh, ow, coutp)


# ---- pooling ------------------------------------------------------------------
def maxpool2d(x, k=3, stride=2, padding=1):
    n, h, w, c = x.shape
    xp = jnp.pad(x, ((0, 0), (padding, padding), (padding, padding), (0, 0)),
                 constant_values=-jnp.inf)
    oh = (h + 2 * padding - k) // stride + 1
    ow = (w + 2 * padding - k) // stride + 1
    M = n * oh * ow
    wins = [xp[:, i:i + stride * (oh - 1) + 1:stride,
                  j:j + stride * (ow - 1) + 1:stride, :].reshape(M, c)
            for i in range(k) for j in range(k)]
    stacked = jnp.stack(wins, axis=0)  # (k*k, M, c)
    tm = _pick_tile_m(M)
    out = pl.pallas_call(
        partial(_maxpool_kernel, ntaps=k * k),
        out_shape=jax.ShapeDtypeStruct((M, c), x.dtype),
        grid=(M // tm,),
        in_specs=[pl.BlockSpec((k * k, tm, c), lambda i: (0, i, 0))],
        out_specs=pl.BlockSpec((tm, c), lambda i: (i, 0)),
        compiler_params=pltpu.CompilerParams(
            dimension_semantics=("parallel",)),
    )(stacked)
    return out.reshape(n, oh, ow, c)


def global_avg_pool(x):
    n, h, w, c = x.shape
    x2 = x.reshape(n, h * w, c)
    out = pl.pallas_call(
        _gap_kernel,
        out_shape=jax.ShapeDtypeStruct((n, 1, c), x.dtype),
        grid=(n,),
        in_specs=[pl.BlockSpec((1, h * w, c), lambda i: (i, 0, 0))],
        out_specs=pl.BlockSpec((1, 1, c), lambda i: (i, 0, 0)),
        compiler_params=pltpu.CompilerParams(
            dimension_semantics=("parallel",)),
    )(x2)
    return out.reshape(n, 1, 1, c)


# ---- bilinear upsample ---------------------------------------------------------
def _interp_matrix(out_size, in_size):
    """Bilinear interpolation matrix, align_corners=True (matches the spec)."""
    if in_size == 1:
        return jnp.ones((out_size, 1), jnp.float32)
    out_idx = jnp.arange(out_size, dtype=jnp.float32)
    if out_size == 1:
        src = jnp.zeros((1,), jnp.float32)
    else:
        src = out_idx * (in_size - 1) / (out_size - 1)
    i0 = jnp.clip(jnp.floor(src).astype(jnp.int32), 0, in_size - 2)
    frac = src - i0.astype(jnp.float32)
    m = jnp.zeros((out_size, in_size), jnp.float32)
    m = m.at[jnp.arange(out_size), i0].add(1.0 - frac)
    m = m.at[jnp.arange(out_size), i0 + 1].add(frac)
    return m


def _interp_along_axis1(x3, m, act, out_dtype):
    """out[b] = m @ x3[b]  (batched interpolation-matrix matmul, bf16 MXU)."""
    B, L, C = x3.shape
    Lout = m.shape[0]
    return pl.pallas_call(
        partial(_interp_kernel, act=act),
        out_shape=jax.ShapeDtypeStruct((B, Lout, C), out_dtype),
        grid=(B,),
        in_specs=[
            pl.BlockSpec((Lout, L), lambda b: (0, 0)),
            pl.BlockSpec((1, L, C), lambda b: (b, 0, 0)),
        ],
        out_specs=pl.BlockSpec((1, Lout, C), lambda b: (b, 0, 0)),
        compiler_params=pltpu.CompilerParams(
            dimension_semantics=("parallel",)),
    )(m.astype(jnp.bfloat16), x3.astype(jnp.bfloat16))


def upsample_pair_bilinear_sigmoid(d1, aux, out_h, out_w, ncls):
    """Batched bilinear (align_corners=True) upsample of both heads + sigmoid.

    The padded classifier channels are dropped BEFORE the full-resolution
    H-pass; the cheap low-res W-pass stays lane-dense (2*128 lanes).
    """
    assert d1.shape == aux.shape
    n, fh, fw, cp = d1.shape
    x = jnp.concatenate([d1, aux], axis=-1)                    # (n, fh, fw, 2cp)
    mw = _interp_matrix(out_w, fw)
    mh = _interp_matrix(out_h, fh)
    t = _interp_along_axis1(x.reshape(n * fh, fw, 2 * cp), mw, "none",
                            jnp.bfloat16)                      # (n*fh, Wout, 2cp)
    t = t.reshape(n, fh, out_w, 2 * cp)
    # keep only the real class channels of each head before the H pass
    t = jnp.concatenate([t[..., :ncls], t[..., cp:cp + ncls]], axis=-1)
    t = t.reshape(n, fh, out_w * 2 * ncls)
    o = _interp_along_axis1(t, mh, "sigmoid", jnp.float32)     # (n, Hout, Wout*2c)
    o = o.reshape(n, out_h, out_w, 2 * ncls)
    return o[..., :ncls], o[..., ncls:]


# -----------------------------------------------------------------------------
# Parameters (deterministic synthetic init)
# -----------------------------------------------------------------------------
def _conv_w(key, kh, kw, cin, cout):
    fan_in = kh * kw * cin
    return jax.random.normal(key, (kh, kw, cin, cout), jnp.float32) * (
        2.0 / fan_in) ** 0.5


def _bn_params(key, c):
    k1, k2, k3 = jax.random.split(key, 3)
    gamma = 1.0 + 0.1 * jax.random.normal(k1, (c,), jnp.float32)
    beta = 0.1 * jax.random.normal(k2, (c,), jnp.float32)
    mean = 0.05 * jax.random.normal(k3, (c,), jnp.float32)
    var = jnp.ones((c,), jnp.float32)
    return (gamma, beta, mean, var, 1e-5)


def init_params(key, num_classes=1, stem=8, filters=(32, 64, 128, 256)):
    keys = iter(jax.random.split(key, 128))
    nk = lambda: next(keys)
    p = {}
    p["stem_w"] = _conv_w(nk(), 7, 7, 3, stem)
    p["stem_bn"] = _bn_params(nk(), stem)

    def bottleneck_p(cin, width, cout):
        return {
            "w1": _conv_w(nk(), 1, 1, cin, width), "bn1": _bn_params(nk(), width),
            "w2": _conv_w(nk(), 3, 3, width, width), "bn2": _bn_params(nk(), width),
            "w3": _conv_w(nk(), 1, 1, width, cout), "bn3": _bn_params(nk(), cout),
            "wd": _conv_w(nk(), 1, 1, cin, cout), "bnd": _bn_params(nk(), cout),
        }

    p["layer1"] = bottleneck_p(stem, filters[0] // 4, filters[0])
    p["layer2"] = bottleneck_p(filters[0], filters[1] // 4, filters[1])
    p["layer3"] = bottleneck_p(filters[1], filters[2] // 4, filters[2])
    p["layer4"] = bottleneck_p(filters[2], filters[3] // 4, filters[3])

    # DeepLabV3 head (ASPP, rates 12/24/36) on filters[3]
    c_in = filters[3]
    inter = c_in // 8
    head = {}
    head["b0_w"] = _conv_w(nk(), 1, 1, c_in, inter); head["b0_bn"] = _bn_params(nk(), inter)
    for name in ("b1", "b2", "b3"):
        head[name + "_w"] = _conv_w(nk(), 3, 3, c_in, inter)
        head[name + "_bn"] = _bn_params(nk(), inter)
    head["b4_w"] = _conv_w(nk(), 1, 1, c_in, inter); head["b4_bn"] = _bn_params(nk(), inter)
    head["proj_w"] = _conv_w(nk(), 1, 1, 5 * inter, inter); head["proj_bn"] = _bn_params(nk(), inter)
    head["blk_w"] = _conv_w(nk(), 3, 3, inter, inter); head["blk_bn"] = _bn_params(nk(), inter)
    head["cls_w"] = _conv_w(nk(), 1, 1, inter, num_classes)
    head["cls_b"] = jnp.zeros((num_classes,), jnp.float32)
    p["head"] = head

    # FCN aux head on filters[2]
    c3 = filters[2]
    aux = {}
    aux["w1"] = _conv_w(nk(), 3, 3, c3, c3 // 4); aux["bn1"] = _bn_params(nk(), c3 // 4)
    aux["cls_w"] = _conv_w(nk(), 1, 1, c3 // 4, num_classes)
    aux["cls_b"] = jnp.zeros((num_classes,), jnp.float32)
    p["aux"] = aux
    return p


# -----------------------------------------------------------------------------
# Model forward
# -----------------------------------------------------------------------------
def bottleneck(x, p, stride, dilation):
    n, h, w, c_phys = x.shape
    if stride == 1:
        # Merge the downsample 1x1 (wd) and the first 1x1 (w1): same input,
        # one lane-dense matmul; split at a 128-aligned channel boundary.
        md, sd = _fold_1x1(p["wd"][0, 0], p["bnd"], None, c_phys)
        md, sd = _pad_cout(md, sd)
        m1, s1 = _fold_1x1(p["w1"][0, 0], p["bn1"], None, c_phys)
        m1, s1 = _pad_cout(m1, s1)
        coutp = md.shape[-1]
        bmat = jnp.concatenate([md, m1], axis=1).astype(jnp.bfloat16)
        shift = jnp.concatenate([sd, s1])
        y = fused_matmul(x.reshape(n * h * w, c_phys), bmat, shift, act="none")
        y = y.reshape(n, h, w, bmat.shape[-1])
        sc = y[..., :coutp]                       # shortcut: BN only, no ReLU
        out1 = y[..., coutp:]                     # stored pre-ReLU
        # the first conv's ReLU is applied to the 3x3 conv's input (in_act)
        out = conv2d_bn_act(out1, p["w2"], stride=1, padding=dilation,
                            dilation=dilation, bn=p["bn2"], act="relu",
                            in_act="relu")
    else:
        sc = conv2d_bn_act(x, p["wd"], stride=stride, bn=p["bnd"], act="none")
        out = conv2d_bn_act(x, p["w1"], bn=p["bn1"], act="relu")
        out = conv2d_bn_act(out, p["w2"], stride=stride, padding=dilation,
                            dilation=dilation, bn=p["bn2"], act="relu")
    # residual add + ReLU fused into the final 1x1 conv epilogue
    out = conv2d_bn_act(out, p["w3"], bn=p["bn3"], act="relu", residual=sc)
    return out


def deeplab_head(x, p):
    n, fh, fw, c_phys = x.shape
    inter = p["b0_w"].shape[-1]
    rates = (12, 24, 36)

    if all(r >= fh and r >= fw for r in rates):
        # Each dilated 3x3 branch sees only its center tap at this feature-map
        # size -> fold all four ASPP conv branches into ONE lane-dense matmul
        # (4*inter = 128 output lanes); the concat of f0..f3 becomes free.
        mats, shifts = [], []
        for name in ("b0", "b1", "b2", "b3"):
            w4d = p[name + "_w"]
            kh = w4d.shape[0]
            m, s = _fold_1x1(w4d[kh // 2, kh // 2], p[name + "_bn"], None,
                             c_phys)
            mats.append(m)
            shifts.append(s)
        bmat = jnp.concatenate(mats, axis=1)
        shift = jnp.concatenate(shifts)
        main_real = bmat.shape[-1]                  # 4*inter real channels
        bmat, shift = _pad_cout(bmat, shift)
        f_main = fused_matmul(x.reshape(n * fh * fw, c_phys),
                              bmat.astype(jnp.bfloat16), shift, act="relu")
        f_main = f_main.reshape(n, fh, fw, bmat.shape[-1])
    else:
        # fallback: generic dilated convs (taps in pure padding are dropped)
        f0 = conv2d_bn_act(x, p["b0_w"], bn=p["b0_bn"], act="relu",
                           pad_out=False)
        f1 = conv2d_bn_act(x, p["b1_w"], padding=rates[0], dilation=rates[0],
                           bn=p["b1_bn"], act="relu", pad_out=False)
        f2 = conv2d_bn_act(x, p["b2_w"], padding=rates[1], dilation=rates[1],
                           bn=p["b2_bn"], act="relu", pad_out=False)
        f3 = conv2d_bn_act(x, p["b3_w"], padding=rates[2], dilation=rates[2],
                           bn=p["b3_bn"], act="relu", pad_out=False)
        f_main = jnp.concatenate([f0, f1, f2, f3], axis=-1)
        main_real = 4 * inter

    # ASPP image pooling branch: AdaptiveAvgPool2d(1) -> 1x1 conv/bn/relu -> up
    pooled = global_avg_pool(x)
    pooled = conv2d_bn_act(pooled, p["b4_w"], bn=p["b4_bn"], act="relu")
    f4 = jnp.broadcast_to(pooled, (n, fh, fw, pooled.shape[-1]))  # 1x1 up = bcast

    # real channels first, all zero padding at the tail -> the proj weight's
    # cin can simply be zero-padded at the end.
    y = jnp.concatenate([f_main[..., :main_real], f4], axis=-1)
    y = conv2d_bn_act(y, p["proj_w"], bn=p["proj_bn"], act="relu")
    # Dropout(0.5)/Dropout(0.1) are identity in eval mode.
    y = conv2d_bn_act(y, p["blk_w"], padding=1, bn=p["blk_bn"], act="relu")
    y = conv2d_bn_act(y, p["cls_w"], bias=p["cls_b"], act="none")
    return y  # classes in channels [:num_classes]; rest are zero padding


def fcn_head(x, p):
    y = conv2d_bn_act(x, p["w1"], padding=1, bn=p["bn1"], act="relu")
    # Dropout(0.1) is identity in eval mode.
    y = conv2d_bn_act(y, p["cls_w"], bias=p["cls_b"], act="none")
    return y


def deeplabv3_fcn_forward(params, x_nchw):
    _, _, h, w = x_nchw.shape
    ncls = params["head"]["cls_w"].shape[-1]

    x = jnp.transpose(x_nchw, (0, 2, 3, 1)).astype(jnp.bfloat16)  # NCHW -> NHWC
    x = conv2d_bn_act(x, params["stem_w"], stride=2, padding=3,
                      bn=params["stem_bn"], act="relu")
    x = maxpool2d(x, 3, 2, 1)
    e1 = bottleneck(x, params["layer1"], stride=1, dilation=1)
    e2 = bottleneck(e1, params["layer2"], stride=2, dilation=1)
    e3 = bottleneck(e2, params["layer3"], stride=1, dilation=2)   # OS = 8
    e4 = bottleneck(e3, params["layer4"], stride=1, dilation=4)

    d1 = deeplab_head(e4, params["head"])   # (n, fh, fw, 128), classes [:ncls]
    aux = fcn_head(e3, params["aux"])       # same stride-8 grid

    # batched bilinear upsample (align_corners=True) + fused sigmoid
    d1_full, aux_full = upsample_pair_bilinear_sigmoid(d1, aux, h, w, ncls)

    # back to NCHW, matching PyTorch output convention
    return (jnp.transpose(d1_full, (0, 3, 1, 2)),
            jnp.transpose(aux_full, (0, 3, 1, 2)))


if __name__ == "__main__":
    key = jax.random.PRNGKey(0)
    x = jax.random.normal(key, (2, 3, 32, 32), jnp.float32)  # NCHW, RGB input
    params = init_params(jax.random.PRNGKey(1), num_classes=1)

    fwd = jax.jit(deeplabv3_fcn_forward)
    d1, aux = fwd(params, x)
    jax.block_until_ready((d1, aux))

    assert d1.shape == (2, 1, 32, 32) and aux.shape == (2, 1, 32, 32)
    assert bool(jnp.isfinite(d1).all()) and bool(jnp.isfinite(aux).all())
    assert bool((d1 >= 0.0).all() and (d1 <= 1.0).all())  # sigmoid outputs
    assert bool((aux >= 0.0).all() and (aux <= 1.0).all())
    print("KERNEL_OK")
</pallas_src>

<mosaic_0001>
module attributes {stable_mosaic.version = 11 : i64} {
  func.func private @main(%arg0: i32) attributes {dimension_semantics = [#tpu.dimension_semantics<core_parallel>], iteration_bounds = array<i64: 2>, tpu.core_type = #tpu.core_type<sc_scalar_subcore>, window_params = []} {
    return
  }
}

module attributes {stable_mosaic.version = 11 : i64} {
  func.func private @main(%arg0: i32) attributes {dimension_semantics = [#tpu.dimension_semantics<core_parallel>], iteration_bounds = array<i64: 2>, tpu.core_type = #tpu.core_type<sc_scalar_subcore>, window_params = []} {
    return
  }
}

module attributes {stable_mosaic.version = 11 : i64} {
  func.func @_mm_k1_kernel(%arg0: i32, %arg1: i32, %arg2: memref<256x147xbf16, #tpu.memory_space<vmem>>, %arg3: memref<147x128xbf16, #tpu.memory_space<vmem>>, %arg4: memref<1x128xf32, #tpu.memory_space<vmem>>, %arg5: memref<256x128xbf16, #tpu.memory_space<vmem>>) attributes {dimension_semantics = [#tpu.dimension_semantics<parallel>, #tpu.dimension_semantics<parallel>], iteration_bounds = array<i64: 2, 1>, scalar_prefetch = 0 : i64, scratch_operands = 0 : i64, tpu.core_type = #tpu.core_type<tc>, window_params = [{transform_indices = @transform_0, window_bounds = array<i64: 256, 147>}, {transform_indices = @transform_1, window_bounds = array<i64: 147, 128>}, {transform_indices = @transform_2, window_bounds = array<i64: 1, 128>}, {transform_indices = @transform_3, window_bounds = array<i64: 256, 128>}]} {
    %c0 = arith.constant 0 : index
    %c0_0 = arith.constant 0 : index
    %0 = vector.load %arg2[%c0, %c0_0] : memref<256x147xbf16, #tpu.memory_space<vmem>>, vector<256x147xbf16>
    %c0_1 = arith.constant 0 : index
    %c0_2 = arith.constant 0 : index
    %1 = vector.load %arg3[%c0_1, %c0_2] : memref<147x128xbf16, #tpu.memory_space<vmem>>, vector<147x128xbf16>
    %cst = arith.constant dense<0.000000e+00> : vector<256x128xf32>
    %2 = tpu.matmul %0, %1, %cst {dimension_numbers = #tpu.dot_dimension_numbers<[1], [0], [0], [1], [0, 0, 1, 1], [], []>} : vector<256x147xbf16>, vector<147x128xbf16>, vector<256x128xf32> -> vector<256x128xf32>
    %c0_3 = arith.constant 0 : index
    %c0_4 = arith.constant 0 : index
    %3 = vector.load %arg4[%c0_3, %c0_4] : memref<1x128xf32, #tpu.memory_space<vmem>>, vector<1x128xf32>
    %4 = vector.broadcast %3 : vector<1x128xf32> to vector<256x128xf32>
    %5 = arith.addf %2, %4 : vector<256x128xf32>
    %cst_5 = arith.constant 0.000000e+00 : f32
    %6 = vector.broadcast %cst_5 : f32 to vector<256x128xf32>
    %7 = arith.maximumf %5, %6 : vector<256x128xf32>
    %8 = arith.truncf %7 : vector<256x128xf32> to vector<256x128xbf16>
    %c0_6 = arith.constant 0 : index
    %c0_7 = arith.constant 0 : index
    %9 = vector.load %arg5[%c0_6, %c0_7] : memref<256x128xbf16, #tpu.memory_space<vmem>>, vector<256x128xbf16>
    tpu.vector_store %arg5[%c0_6, %c0_7], %8 {strides = array<i32>} : memref<256x128xbf16, #tpu.memory_space<vmem>>, vector<256x128xbf16>,
    return
  }
  func.func @transform_0(%arg0: i32, %arg1: i32) -> (i32, i32) {
    %c0_i32 = arith.constant 0 : i32
    %c0_i32_0 = arith.constant 0 : i32
    return %arg0, %c0_i32 : i32, i32
  }
  func.func @transform_1(%arg0: i32, %arg1: i32) -> (i32, i32) {
    %c0_i32 = arith.constant 0 : i32
    %c0_i32_0 = arith.constant 0 : i32
    return %c0_i32, %arg1 : i32, i32
  }
  func.func @transform_2(%arg0: i32, %arg1: i32) -> (i32, i32) {
    %c0_i32 = arith.constant 0 : i32
    %c0_i32_0 = arith.constant 0 : i32
    return %c0_i32, %arg1 : i32, i32
  }
  func.func @transform_3(%arg0: i32, %arg1: i32) -> (i32, i32) {
    %c0_i32 = arith.constant 0 : i32
    return %arg0, %arg1 : i32, i32
  }
}

module attributes {stable_mosaic.version = 11 : i64} {
  func.func @_maxpool_kernel(%arg0: i32, %arg1: memref<9x64x128xbf16, #tpu.memory_space<vmem>>, %arg2: memref<64x128xbf16, #tpu.memory_space<vmem>>) attributes {dimension_semantics = [#tpu.dimension_semantics<parallel>], iteration_bounds = array<i64: 2>, scalar_prefetch = 0 : i64, scratch_operands = 0 : i64, tpu.core_type = #tpu.core_type<tc>, window_params = [{transform_indices = @transform_0, window_bounds = array<i64: 9, 64, 128>}, {transform_indices = @transform_1, window_bounds = array<i64: 64, 128>}]} {
    %c0 = arith.constant 0 : index
    %c0_0 = arith.constant 0 : index
    %c0_1 = arith.constant 0 : index
    %0 = vector.load %arg1[%c0, %c0_0, %c0_1] : memref<9x64x128xbf16, #tpu.memory_space<vmem>>, vector<1x64x128xbf16>
    %1 = vector.shape_cast %0 : vector<1x64x128xbf16> to vector<64x128xbf16>
    %c1 = arith.constant 1 : index
    %c0_2 = arith.constant 0 : index
    %c0_3 = arith.constant 0 : index
    %2 = vector.load %arg1[%c1, %c0_2, %c0_3] : memref<9x64x128xbf16, #tpu.memory_space<vmem>>, vector<1x64x128xbf16>
    %3 = vector.shape_cast %2 : vector<1x64x128xbf16> to vector<64x128xbf16>
    %4 = arith.maximumf %1, %3 : vector<64x128xbf16>
    %c2 = arith.constant 2 : index
    %c0_4 = arith.constant 0 : index
    %c0_5 = arith.constant 0 : index
    %5 = vector.load %arg1[%c2, %c0_4, %c0_5] : memref<9x64x128xbf16, #tpu.memory_space<vmem>>, vector<1x64x128xbf16>
    %6 = vector.shape_cast %5 : vector<1x64x128xbf16> to vector<64x128xbf16>
    %7 = arith.maximumf %4, %6 : vector<64x128xbf16>
    %c3 = arith.constant 3 : index
    %c0_6 = arith.constant 0 : index
    %c0_7 = arith.constant 0 : index
    %8 = vector.load %arg1[%c3, %c0_6, %c0_7] : memref<9x64x128xbf16, #tpu.memory_space<vmem>>, vector<1x64x128xbf16>
    %9 = vector.shape_cast %8 : vector<1x64x128xbf16> to vector<64x128xbf16>
    %10 = arith.maximumf %7, %9 : vector<64x128xbf16>
    %c4 = arith.constant 4 : index
    %c0_8 = arith.constant 0 : index
    %c0_9 = arith.constant 0 : index
    %11 = vector.load %arg1[%c4, %c0_8, %c0_9] : memref<9x64x128xbf16, #tpu.memory_space<vmem>>, vector<1x64x128xbf16>
    %12 = vector.shape_cast %11 : vector<1x64x128xbf16> to vector<64x128xbf16>
    %13 = arith.maximumf %10, %12 : vector<64x128xbf16>
    %c5 = arith.constant 5 : index
    %c0_10 = arith.constant 0 : index
    %c0_11 = arith.constant 0 : index
    %14 = vector.load %arg1[%c5, %c0_10, %c0_11] : memref<9x64x128xbf16, #tpu.memory_space<vmem>>, vector<1x64x128xbf16>
    %15 = vector.shape_cast %14 : vector<1x64x128xbf16> to vector<64x128xbf16>
    %16 = arith.maximumf %13, %15 : vector<64x128xbf16>
    %c6 = arith.constant 6 : index
    %c0_12 = arith.constant 0 : index
    %c0_13 = arith.constant 0 : index
    %17 = vector.load %arg1[%c6, %c0_12, %c0_13] : memref<9x64x128xbf16, #tpu.memory_space<vmem>>, vector<1x64x128xbf16>
    %18 = vector.shape_cast %17 : vector<1x64x128xbf16> to vector<64x128xbf16>
    %19 = arith.maximumf %16, %18 : vector<64x128xbf16>
    %c7 = arith.constant 7 : index
    %c0_14 = arith.constant 0 : index
    %c0_15 = arith.constant 0 : index
    %20 = vector.load %arg1[%c7, %c0_14, %c0_15] : memref<9x64x128xbf16, #tpu.memory_space<vmem>>, vector<1x64x128xbf16>
    %21 = vector.shape_cast %20 : vector<1x64x128xbf16> to vector<64x128xbf16>
    %22 = arith.maximumf %19, %21 : vector<64x128xbf16>
    %c8 = arith.constant 8 : index
    %c0_16 = arith.constant 0 : index
    %c0_17 = arith.constant 0 : index
    %23 = vector.load %arg1[%c8, %c0_16, %c0_17] : memref<9x64x128xbf16, #tpu.memory_space<vmem>>, vector<1x64x128xbf16>
    %24 = vector.shape_cast %23 : vector<1x64x128xbf16> to vector<64x128xbf16>
    %25 = arith.maximumf %22, %24 : vector<64x128xbf16>
    %c0_18 = arith.constant 0 : index
    %c0_19 = arith.constant 0 : index
    %26 = vector.load %arg2[%c0_18, %c0_19] : memref<64x128xbf16, #tpu.memory_space<vmem>>, vector<64x128xbf16>
    tpu.vector_store %arg2[%c0_18, %c0_19], %25 {strides = array<i32>} : memref<64x128xbf16, #tpu.memory_space<vmem>>, vector<64x128xbf16>,
    return
  }
  func.func @transform_0(%arg0: i32) -> (i32, i32, i32) {
    %c0_i32 = arith.constant 0 : i32
    %c0_i32_0 = arith.constant 0 : i32
    %c0_i32_1 = arith.constant 0 : i32
    return %c0_i32, %arg0, %c0_i32_0 : i32, i32, i32
  }
  func.func @transform_1(%arg0: i32) -> (i32, i32) {
    %c0_i32 = arith.constant 0 : i32
    %c0_i32_0 = arith.constant 0 : i32
    return %arg0, %c0_i32 : i32, i32
  }
}

module attributes {stable_mosaic.version = 11 : i64} {
  func.func @_mm_k1_kernel(%arg0: i32, %arg1: i32, %arg2: memref<64x128xbf16, #tpu.memory_space<vmem>>, %arg3: memref<128x256xbf16, #tpu.memory_space<vmem>>, %arg4: memref<1x256xf32, #tpu.memory_space<vmem>>, %arg5: memref<64x256xbf16, #tpu.memory_space<vmem>>) attributes {dimension_semantics = [#tpu.dimension_semantics<parallel>, #tpu.dimension_semantics<parallel>], iteration_bounds = array<i64: 2, 1>, scalar_prefetch = 0 : i64, scratch_operands = 0 : i64, tpu.core_type = #tpu.core_type<tc>, window_params = [{transform_indices = @transform_0, window_bounds = array<i64: 64, 128>}, {transform_indices = @transform_1, window_bounds = array<i64: 128, 256>}, {transform_indices = @transform_2, window_bounds = array<i64: 1, 256>}, {transform_indices = @transform_3, window_bounds = array<i64: 64, 256>}]} {
    %c0 = arith.constant 0 : index
    %c0_0 = arith.constant 0 : index
    %0 = vector.load %arg2[%c0, %c0_0] : memref<64x128xbf16, #tpu.memory_space<vmem>>, vector<64x128xbf16>
    %c0_1 = arith.constant 0 : index
    %c0_2 = arith.constant 0 : index
    %1 = vector.load %arg3[%c0_1, %c0_2] : memref<128x256xbf16, #tpu.memory_space<vmem>>, vector<128x256xbf16>
    %cst = arith.constant dense<0.000000e+00> : vector<64x256xf32>
    %2 = tpu.matmul %0, %1, %cst {dimension_numbers = #tpu.dot_dimension_numbers<[1], [0], [0], [1], [0, 0, 1, 1], [], []>} : vector<64x128xbf16>, vector<128x256xbf16>, vector<64x256xf32> -> vector<64x256xf32>
    %c0_3 = arith.constant 0 : index
    %c0_4 = arith.constant 0 : index
    %3 = vector.load %arg4[%c0_3, %c0_4] : memref<1x256xf32, #tpu.memory_space<vmem>>, vector<1x256xf32>
    %4 = vector.broadcast %3 : vector<1x256xf32> to vector<64x256xf32>
    %5 = arith.addf %2, %4 : vector<64x256xf32>
    %6 = arith.truncf %5 : vector<64x256xf32> to vector<64x256xbf16>
    %c0_5 = arith.constant 0 : index
    %c0_6 = arith.constant 0 : index
    %7 = vector.load %arg5[%c0_5, %c0_6] : memref<64x256xbf16, #tpu.memory_space<vmem>>, vector<64x256xbf16>
    tpu.vector_store %arg5[%c0_5, %c0_6], %6 {strides = array<i32>} : memref<64x256xbf16, #tpu.memory_space<vmem>>, vector<64x256xbf16>,
    return
  }
  func.func @transform_0(%arg0: i32, %arg1: i32) -> (i32, i32) {
    %c0_i32 = arith.constant 0 : i32
    %c0_i32_0 = arith.constant 0 : i32
    return %arg0, %c0_i32 : i32, i32
  }
  func.func @transform_1(%arg0: i32, %arg1: i32) -> (i32, i32) {
    %c0_i32 = arith.constant 0 : i32
    %c0_i32_0 = arith.constant 0 : i32
    return %c0_i32, %arg1 : i32, i32
  }
  func.func @transform_2(%arg0: i32, %arg1: i32) -> (i32, i32) {
    %c0_i32 = arith.constant 0 : i32
    %c0_i32_0 = arith.constant 0 : i32
    return %c0_i32, %arg1 : i32, i32
  }
  func.func @transform_3(%arg0: i32, %arg1: i32) -> (i32, i32) {
    %c0_i32 = arith.constant 0 : i32
    return %arg0, %arg1 : i32, i32
  }
}

module attributes {stable_mosaic.version = 11 : i64} {
  func.func @_mm_k1_kernel(%arg0: i32, %arg1: i32, %arg2: memref<64x1152xbf16, #tpu.memory_space<vmem>>, %arg3: memref<1152x128xbf16, #tpu.memory_space<vmem>>, %arg4: memref<1x128xf32, #tpu.memory_space<vmem>>, %arg5: memref<64x128xbf16, #tpu.memory_space<vmem>>) attributes {dimension_semantics = [#tpu.dimension_semantics<parallel>, #tpu.dimension_semantics<parallel>], iteration_bounds = array<i64: 2, 1>, scalar_prefetch = 0 : i64, scratch_operands = 0 : i64, tpu.core_type = #tpu.core_type<tc>, window_params = [{transform_indices = @transform_0, window_bounds = array<i64: 64, 1152>}, {transform_indices = @transform_1, window_bounds = array<i64: 1152, 128>}, {transform_indices = @transform_2, window_bounds = array<i64: 1, 128>}, {transform_indices = @transform_3, window_bounds = array<i64: 64, 128>}]} {
    %c0 = arith.constant 0 : index
    %c0_0 = arith.constant 0 : index
    %0 = vector.load %arg2[%c0, %c0_0] : memref<64x1152xbf16, #tpu.memory_space<vmem>>, vector<64x1152xbf16>
    %cst = arith.constant 0.000000e+00 : bf16
    %1 = vector.broadcast %cst : bf16 to vector<64x1152xbf16>
    %2 = arith.maximumf %0, %1 : vector<64x1152xbf16>
    %c0_1 = arith.constant 0 : index
    %c0_2 = arith.constant 0 : index
    %3 = vector.load %arg3[%c0_1, %c0_2] : memref<1152x128xbf16, #tpu.memory_space<vmem>>, vector<1152x128xbf16>
    %cst_3 = arith.constant dense<0.000000e+00> : vector<64x128xf32>
    %4 = tpu.matmul %2, %3, %cst_3 {dimension_numbers = #tpu.dot_dimension_numbers<[1], [0], [0], [1], [0, 0, 1, 1], [], []>} : vector<64x1152xbf16>, vector<1152x128xbf16>, vector<64x128xf32> -> vector<64x128xf32>
    %c0_4 = arith.constant 0 : index
    %c0_5 = arith.constant 0 : index
    %5 = vector.load %arg4[%c0_4, %c0_5] : memref<1x128xf32, #tpu.memory_space<vmem>>, vector<1x128xf32>
    %6 = vector.broadcast %5 : vector<1x128xf32> to vector<64x128xf32>
    %7 = arith.addf %4, %6 : vector<64x128xf32>
    %cst_6 = arith.constant 0.000000e+00 : f32
    %8 = vector.broadcast %cst_6 : f32 to vector<64x128xf32>
    %9 = arith.maximumf %7, %8 : vector<64x128xf32>
    %10 = arith.truncf %9 : vector<64x128xf32> to vector<64x128xbf16>
    %c0_7 = arith.constant 0 : index
    %c0_8 = arith.constant 0 : index
    %11 = vector.load %arg5[%c0_7, %c0_8] : memref<64x128xbf16, #tpu.memory_space<vmem>>, vector<64x128xbf16>
    tpu.vector_store %arg5[%c0_7, %c0_8], %10 {strides = array<i32>} : memref<64x128xbf16, #tpu.memory_space<vmem>>, vector<64x128xbf16>,
    return
  }
  func.func @transform_0(%arg0: i32, %arg1: i32) -> (i32, i32) {
    %c0_i32 = arith.constant 0 : i32
    %c0_i32_0 = arith.constant 0 : i32
    return %arg0, %c0_i32 : i32, i32
  }
  func.func @transform_1(%arg0: i32, %arg1: i32) -> (i32, i32) {
    %c0_i32 = arith.constant 0 : i32
    %c0_i32_0 = arith.constant 0 : i32
    return %c0_i32, %arg1 : i32, i32
  }
  func.func @transform_2(%arg0: i32, %arg1: i32) -> (i32, i32) {
    %c0_i32 = arith.constant 0 : i32
    %c0_i32_0 = arith.constant 0 : i32
    return %c0_i32, %arg1 : i32, i32
  }
  func.func @transform_3(%arg0: i32, %arg1: i32) -> (i32, i32) {
    %c0_i32 = arith.constant 0 : i32
    return %arg0, %arg1 : i32, i32
  }
}

module attributes {stable_mosaic.version = 11 : i64} {
  func.func @_mm_k1_kernel(%arg0: i32, %arg1: i32, %arg2: memref<64x128xbf16, #tpu.memory_space<vmem>>, %arg3: memref<128x128xbf16, #tpu.memory_space<vmem>>, %arg4: memref<1x128xf32, #tpu.memory_space<vmem>>, %arg5: memref<64x128xbf16, #tpu.memory_space<vmem>>) attributes {dimension_semantics = [#tpu.dimension_semantics<parallel>, #tpu.dimension_semantics<parallel>], iteration_bounds = array<i64: 2, 1>, scalar_prefetch = 0 : i64, scratch_operands = 0 : i64, tpu.core_type = #tpu.core_type<tc>, window_params = [{transform_indices = @transform_0, window_bounds = array<i64: 64, 128>}, {transform_indices = @transform_1, window_bounds = array<i64: 128, 128>}, {transform_indices = @transform_2, window_bounds = array<i64: 1, 128>}, {transform_indices = @transform_3, window_bounds = array<i64: 64, 128>}]} {
    %c0 = arith.constant 0 : index
    %c0_0 = arith.constant 0 : index
    %0 = vector.load %arg2[%c0, %c0_0] : memref<64x128xbf16, #tpu.memory_space<vmem>>, vector<64x128xbf16>
    %c0_1 = arith.constant 0 : index
    %c0_2 = arith.constant 0 : index
    %1 = vector.load %arg3[%c0_1, %c0_2] : memref<128x128xbf16, #tpu.memory_space<vmem>>, vector<128x128xbf16>
    %cst = arith.constant dense<0.000000e+00> : vector<64x128xf32>
    %2 = tpu.matmul %0, %1, %cst {dimension_numbers = #tpu.dot_dimension_numbers<[1], [0], [0], [1], [0, 0, 1, 1], [], []>} : vector<64x128xbf16>, vector<128x128xbf16>, vector<64x128xf32> -> vector<64x128xf32>
    %c0_3 = arith.constant 0 : index
    %c0_4 = arith.constant 0 : index
    %3 = vector.load %arg4[%c0_3, %c0_4] : memref<1x128xf32, #tpu.memory_space<vmem>>, vector<1x128xf32>
    %4 = vector.broadcast %3 : vector<1x128xf32> to vector<64x128xf32>
    %5 = arith.addf %2, %4 : vector<64x128xf32>
    %cst_5 = arith.constant 0.000000e+00 : f32
    %6 = vector.broadcast %cst_5 : f32 to vector<64x128xf32>
    %7 = arith.maximumf %5, %6 : vector<64x128xf32>
    %8 = arith.truncf %7 : vector<64x128xf32> to vector<64x128xbf16>
    %c0_6 = arith.constant 0 : index
    %c0_7 = arith.constant 0 : index
    %9 = vector.load %arg5[%c0_6, %c0_7] : memref<64x128xbf16, #tpu.memory_space<vmem>>, vector<64x128xbf16>
    tpu.vector_store %arg5[%c0_6, %c0_7], %8 {strides = array<i32>} : memref<64x128xbf16, #tpu.memory_space<vmem>>, vector<64x128xbf16>,
    return
  }
  func.func @transform_0(%arg0: i32, %arg1: i32) -> (i32, i32) {
    %c0_i32 = arith.constant 0 : i32
    %c0_i32_0 = arith.constant 0 : i32
    return %arg0, %c0_i32 : i32, i32
  }
  func.func @transform_1(%arg0: i32, %arg1: i32) -> (i32, i32) {
    %c0_i32 = arith.constant 0 : i32
    %c0_i32_0 = arith.constant 0 : i32
    return %c0_i32, %arg1 : i32, i32
  }
  func.func @transform_2(%arg0: i32, %arg1: i32) -> (i32, i32) {
    %c0_i32 = arith.constant 0 : i32
    %c0_i32_0 = arith.constant 0 : i32
    return %c0_i32, %arg1 : i32, i32
  }
  func.func @transform_3(%arg0: i32, %arg1: i32) -> (i32, i32) {
    %c0_i32 = arith.constant 0 : i32
    return %arg0, %arg1 : i32, i32
  }
}

module attributes {stable_mosaic.version = 11 : i64} {
  func.func @_mm_k1_kernel(%arg0: i32, %arg1: i32, %arg2: memref<64x128xbf16, #tpu.memory_space<vmem>>, %arg3: memref<128x128xbf16, #tpu.memory_space<vmem>>, %arg4: memref<1x128xf32, #tpu.memory_space<vmem>>, %arg5: memref<64x128xbf16, #tpu.memory_space<vmem>>, %arg6: memref<64x128xbf16, #tpu.memory_space<vmem>>) attributes {dimension_semantics = [#tpu.dimension_semantics<parallel>, #tpu.dimension_semantics<parallel>], iteration_bounds = array<i64: 2, 1>, scalar_prefetch = 0 : i64, scratch_operands = 0 : i64, tpu.core_type = #tpu.core_type<tc>, window_params = [{transform_indices = @transform_0, window_bounds = array<i64: 64, 128>}, {transform_indices = @transform_1, window_bounds = array<i64: 128, 128>}, {transform_indices = @transform_2, window_bounds = array<i64: 1, 128>}, {transform_indices = @transform_3, window_bounds = array<i64: 64, 128>}, {transform_indices = @transform_4, window_bounds = array<i64: 64, 128>}]} {
    %c0 = arith.constant 0 : index
    %c0_0 = arith.constant 0 : index
    %0 = vector.load %arg2[%c0, %c0_0] : memref<64x128xbf16, #tpu.memory_space<vmem>>, vector<64x128xbf16>
    %c0_1 = arith.constant 0 : index
    %c0_2 = arith.constant 0 : index
    %1 = vector.load %arg3[%c0_1, %c0_2] : memref<128x128xbf16, #tpu.memory_space<vmem>>, vector<128x128xbf16>
    %cst = arith.constant dense<0.000000e+00> : vector<64x128xf32>
    %2 = tpu.matmul %0, %1, %cst {dimension_numbers = #tpu.dot_dimension_numbers<[1], [0], [0], [1], [0, 0, 1, 1], [], []>} : vector<64x128xbf16>, vector<128x128xbf16>, vector<64x128xf32> -> vector<64x128xf32>
    %c0_3 = arith.constant 0 : index
    %c0_4 = arith.constant 0 : index
    %3 = vector.load %arg4[%c0_3, %c0_4] : memref<1x128xf32, #tpu.memory_space<vmem>>, vector<1x128xf32>
    %4 = vector.broadcast %3 : vector<1x128xf32> to vector<64x128xf32>
    %5 = arith.addf %2, %4 : vector<64x128xf32>
    %c0_5 = arith.constant 0 : index
    %c0_6 = arith.constant 0 : index
    %6 = vector.load %arg5[%c0_5, %c0_6] : memref<64x128xbf16, #tpu.memory_space<vmem>>, vector<64x128xbf16>
    %7 = arith.extf %6 : vector<64x128xbf16> to vector<64x128xf32>
    %8 = arith.addf %5, %7 : vector<64x128xf32>
    %cst_7 = arith.constant 0.000000e+00 : f32
    %9 = vector.broadcast %cst_7 : f32 to vector<64x128xf32>
    %10 = arith.maximumf %8, %9 : vector<64x128xf32>
    %11 = arith.truncf %10 : vector<64x128xf32> to vector<64x128xbf16>
    %c0_8 = arith.constant 0 : index
    %c0_9 = arith.constant 0 : index
    %12 = vector.load %arg6[%c0_8, %c0_9] : memref<64x128xbf16, #tpu.memory_space<vmem>>, vector<64x128xbf16>
    tpu.vector_store %arg6[%c0_8, %c0_9], %11 {strides = array<i32>} : memref<64x128xbf16, #tpu.memory_space<vmem>>, vector<64x128xbf16>,
    return
  }
  func.func @transform_0(%arg0: i32, %arg1: i32) -> (i32, i32) {
    %c0_i32 = arith.constant 0 : i32
    %c0_i32_0 = arith.constant 0 : i32
    return %arg0, %c0_i32 : i32, i32
  }
  func.func @transform_1(%arg0: i32, %arg1: i32) -> (i32, i32) {
    %c0_i32 = arith.constant 0 : i32
    %c0_i32_0 = arith.constant 0 : i32
    return %c0_i32, %arg1 : i32, i32
  }
  func.func @transform_2(%arg0: i32, %arg1: i32) -> (i32, i32) {
    %c0_i32 = arith.constant 0 : i32
    %c0_i32_0 = arith.constant 0 : i32
    return %c0_i32, %arg1 : i32, i32
  }
  func.func @transform_3(%arg0: i32, %arg1: i32) -> (i32, i32) {
    %c0_i32 = arith.constant 0 : i32
    return %arg0, %arg1 : i32, i32
  }
  func.func @transform_4(%arg0: i32, %arg1: i32) -> (i32, i32) {
    %c0_i32 = arith.constant 0 : i32
    return %arg0, %arg1 : i32, i32
  }
}

module attributes {stable_mosaic.version = 11 : i64} {
  func.func @_mm_k1_kernel(%arg0: i32, %arg1: i32, %arg2: memref<16x128xbf16, #tpu.memory_space<vmem>>, %arg3: memref<128x128xbf16, #tpu.memory_space<vmem>>, %arg4: memref<1x128xf32, #tpu.memory_space<vmem>>, %arg5: memref<16x128xbf16, #tpu.memory_space<vmem>>, %arg6: memref<16x128xbf16, #tpu.memory_space<vmem>>) attributes {dimension_semantics = [#tpu.dimension_semantics<parallel>, #tpu.dimension_semantics<parallel>], iteration_bounds = array<i64: 2, 1>, scalar_prefetch = 0 : i64, scratch_operands = 0 : i64, tpu.core_type = #tpu.core_type<tc>, window_params = [{transform_indices = @transform_0, window_bounds = array<i64: 16, 128>}, {transform_indices = @transform_1, window_bounds = array<i64: 128, 128>}, {transform_indices = @transform_2, window_bounds = array<i64: 1, 128>}, {transform_indices = @transform_3, window_bounds = array<i64: 16, 128>}, {transform_indices = @transform_4, window_bounds = array<i64: 16, 128>}]} {
    %c0 = arith.constant 0 : index
    %c0_0 = arith.constant 0 : index
    %0 = vector.load %arg2[%c0, %c0_0] : memref<16x128xbf16, #tpu.memory_space<vmem>>, vector<16x128xbf16>
    %c0_1 = arith.constant 0 : index
    %c0_2 = arith.constant 0 : index
    %1 = vector.load %arg3[%c0_1, %c0_2] : memref<128x128xbf16, #tpu.memory_space<vmem>>, vector<128x128xbf16>
    %cst = arith.constant dense<0.000000e+00> : vector<16x128xf32>
    %2 = tpu.matmul %0, %1, %cst {dimension_numbers = #tpu.dot_dimension_numbers<[1], [0], [0], [1], [0, 0, 1, 1], [], []>} : vector<16x128xbf16>, vector<128x128xbf16>, vector<16x128xf32> -> vector<16x128xf32>
    %c0_3 = arith.constant 0 : index
    %c0_4 = arith.constant 0 : index
    %3 = vector.load %arg4[%c0_3, %c0_4] : memref<1x128xf32, #tpu.memory_space<vmem>>, vector<1x128xf32>
    %4 = vector.broadcast %3 : vector<1x128xf32> to vector<16x128xf32>
    %5 = arith.addf %2, %4 : vector<16x128xf32>
    %c0_5 = arith.constant 0 : index
    %c0_6 = arith.constant 0 : index
    %6 = vector.load %arg5[%c0_5, %c0_6] : memref<16x128xbf16, #tpu.memory_space<vmem>>, vector<16x128xbf16>
    %7 = arith.extf %6 : vector<16x128xbf16> to vector<16x128xf32>
    %8 = arith.addf %5, %7 : vector<16x128xf32>
    %cst_7 = arith.constant 0.000000e+00 : f32
    %9 = vector.broadcast %cst_7 : f32 to vector<16x128xf32>
    %10 = arith.maximumf %8, %9 : vector<16x128xf32>
    %11 = arith.truncf %10 : vector<16x128xf32> to vector<16x128xbf16>
    %c0_8 = arith.constant 0 : index
    %c0_9 = arith.constant 0 : index
    %12 = vector.load %arg6[%c0_8, %c0_9] : memref<16x128xbf16, #tpu.memory_space<vmem>>, vector<16x128xbf16>
    tpu.vector_store %arg6[%c0_8, %c0_9], %11 {strides = array<i32>} : memref<16x128xbf16, #tpu.memory_space<vmem>>, vector<16x128xbf16>,
    return
  }
  func.func @transform_0(%arg0: i32, %arg1: i32) -> (i32, i32) {
    %c0_i32 = arith.constant 0 : i32
    %c0_i32_0 = arith.constant 0 : i32
    return %arg0, %c0_i32 : i32, i32
  }
  func.func @transform_1(%arg0: i32, %arg1: i32) -> (i32, i32) {
    %c0_i32 = arith.constant 0 : i32
    %c0_i32_0 = arith.constant 0 : i32
    return %c0_i32, %arg1 : i32, i32
  }
  func.func @transform_2(%arg0: i32, %arg1: i32) -> (i32, i32) {
    %c0_i32 = arith.constant 0 : i32
    %c0_i32_0 = arith.constant 0 : i32
    return %c0_i32, %arg1 : i32, i32
  }
  func.func @transform_3(%arg0: i32, %arg1: i32) -> (i32, i32) {
    %c0_i32 = arith.constant 0 : i32
    return %arg0, %arg1 : i32, i32
  }
  func.func @transform_4(%arg0: i32, %arg1: i32) -> (i32, i32) {
    %c0_i32 = arith.constant 0 : i32
    return %arg0, %arg1 : i32, i32
  }
}

module attributes {stable_mosaic.version = 11 : i64} {
  func.func @_mm_k1_kernel(%arg0: i32, %arg1: i32, %arg2: memref<16x1152xbf16, #tpu.memory_space<vmem>>, %arg3: memref<1152x128xbf16, #tpu.memory_space<vmem>>, %arg4: memref<1x128xf32, #tpu.memory_space<vmem>>, %arg5: memref<16x128xbf16, #tpu.memory_space<vmem>>) attributes {dimension_semantics = [#tpu.dimension_semantics<parallel>, #tpu.dimension_semantics<parallel>], iteration_bounds = array<i64: 2, 1>, scalar_prefetch = 0 : i64, scratch_operands = 0 : i64, tpu.core_type = #tpu.core_type<tc>, window_params = [{transform_indices = @transform_0, window_bounds = array<i64: 16, 1152>}, {transform_indices = @transform_1, window_bounds = array<i64: 1152, 128>}, {transform_indices = @transform_2, window_bounds = array<i64: 1, 128>}, {transform_indices = @transform_3, window_bounds = array<i64: 16, 128>}]} {
    %c0 = arith.constant 0 : index
    %c0_0 = arith.constant 0 : index
    %0 = vector.load %arg2[%c0, %c0_0] : memref<16x1152xbf16, #tpu.memory_space<vmem>>, vector<16x1152xbf16>
    %c0_1 = arith.constant 0 : index
    %c0_2 = arith.constant 0 : index
    %1 = vector.load %arg3[%c0_1, %c0_2] : memref<1152x128xbf16, #tpu.memory_space<vmem>>, vector<1152x128xbf16>
    %cst = arith.constant dense<0.000000e+00> : vector<16x128xf32>
    %2 = tpu.matmul %0, %1, %cst {dimension_numbers = #tpu.dot_dimension_numbers<[1], [0], [0], [1], [0, 0, 1, 1], [], []>} : vector<16x1152xbf16>, vector<1152x128xbf16>, vector<16x128xf32> -> vector<16x128xf32>
    %c0_3 = arith.constant 0 : index
    %c0_4 = arith.constant 0 : index
    %3 = vector.load %arg4[%c0_3, %c0_4] : memref<1x128xf32, #tpu.memory_space<vmem>>, vector<1x128xf32>
    %4 = vector.broadcast %3 : vector<1x128xf32> to vector<16x128xf32>
    %5 = arith.addf %2, %4 : vector<16x128xf32>
    %cst_5 = arith.constant 0.000000e+00 : f32
    %6 = vector.broadcast %cst_5 : f32 to vector<16x128xf32>
    %7 = arith.maximumf %5, %6 : vector<16x128xf32>
    %8 = arith.truncf %7 : vector<16x128xf32> to vector<16x128xbf16>
    %c0_6 = arith.constant 0 : index
    %c0_7 = arith.constant 0 : index
    %9 = vector.load %arg5[%c0_6, %c0_7] : memref<16x128xbf16, #tpu.memory_space<vmem>>, vector<16x128xbf16>
    tpu.vector_store %arg5[%c0_6, %c0_7], %8 {strides = array<i32>} : memref<16x128xbf16, #tpu.memory_space<vmem>>, vector<16x128xbf16>,
    return
  }
  func.func @transform_0(%arg0: i32, %arg1: i32) -> (i32, i32) {
    %c0_i32 = arith.constant 0 : i32
    %c0_i32_0 = arith.constant 0 : i32
    return %arg0, %c0_i32 : i32, i32
  }
  func.func @transform_1(%arg0: i32, %arg1: i32) -> (i32, i32) {
    %c0_i32 = arith.constant 0 : i32
    %c0_i32_0 = arith.constant 0 : i32
    return %c0_i32, %arg1 : i32, i32
  }
  func.func @transform_2(%arg0: i32, %arg1: i32) -> (i32, i32) {
    %c0_i32 = arith.constant 0 : i32
    %c0_i32_0 = arith.constant 0 : i32
    return %c0_i32, %arg1 : i32, i32
  }
  func.func @transform_3(%arg0: i32, %arg1: i32) -> (i32, i32) {
    %c0_i32 = arith.constant 0 : i32
    return %arg0, %arg1 : i32, i32
  }
}

module attributes {stable_mosaic.version = 11 : i64} {
  func.func @_mm_k1_kernel(%arg0: i32, %arg1: i32, %arg2: memref<16x128xbf16, #tpu.memory_space<vmem>>, %arg3: memref<128x128xbf16, #tpu.memory_space<vmem>>, %arg4: memref<1x128xf32, #tpu.memory_space<vmem>>, %arg5: memref<16x128xbf16, #tpu.memory_space<vmem>>) attributes {dimension_semantics = [#tpu.dimension_semantics<parallel>, #tpu.dimension_semantics<parallel>], iteration_bounds = array<i64: 2, 1>, scalar_prefetch = 0 : i64, scratch_operands = 0 : i64, tpu.core_type = #tpu.core_type<tc>, window_params = [{transform_indices = @transform_0, window_bounds = array<i64: 16, 128>}, {transform_indices = @transform_1, window_bounds = array<i64: 128, 128>}, {transform_indices = @transform_2, window_bounds = array<i64: 1, 128>}, {transform_indices = @transform_3, window_bounds = array<i64: 16, 128>}]} {
    %c0 = arith.constant 0 : index
    %c0_0 = arith.constant 0 : index
    %0 = vector.load %arg2[%c0, %c0_0] : memref<16x128xbf16, #tpu.memory_space<vmem>>, vector<16x128xbf16>
    %c0_1 = arith.constant 0 : index
    %c0_2 = arith.constant 0 : index
    %1 = vector.load %arg3[%c0_1, %c0_2] : memref<128x128xbf16, #tpu.memory_space<vmem>>, vector<128x128xbf16>
    %cst = arith.constant dense<0.000000e+00> : vector<16x128xf32>
    %2 = tpu.matmul %0, %1, %cst {dimension_numbers = #tpu.dot_dimension_numbers<[1], [0], [0], [1], [0, 0, 1, 1], [], []>} : vector<16x128xbf16>, vector<128x128xbf16>, vector<16x128xf32> -> vector<16x128xf32>
    %c0_3 = arith.constant 0 : index
    %c0_4 = arith.constant 0 : index
    %3 = vector.load %arg4[%c0_3, %c0_4] : memref<1x128xf32, #tpu.memory_space<vmem>>, vector<1x128xf32>
    %4 = vector.broadcast %3 : vector<1x128xf32> to vector<16x128xf32>
    %5 = arith.addf %2, %4 : vector<16x128xf32>
    %6 = arith.truncf %5 : vector<16x128xf32> to vector<16x128xbf16>
    %c0_5 = arith.constant 0 : index
    %c0_6 = arith.constant 0 : index
    %7 = vector.load %arg5[%c0_5, %c0_6] : memref<16x128xbf16, #tpu.memory_space<vmem>>, vector<16x128xbf16>
    tpu.vector_store %arg5[%c0_5, %c0_6], %6 {strides = array<i32>} : memref<16x128xbf16, #tpu.memory_space<vmem>>, vector<16x128xbf16>,
    return
  }
  func.func @transform_0(%arg0: i32, %arg1: i32) -> (i32, i32) {
    %c0_i32 = arith.constant 0 : i32
    %c0_i32_0 = arith.constant 0 : i32
    return %arg0, %c0_i32 : i32, i32
  }
  func.func @transform_1(%arg0: i32, %arg1: i32) -> (i32, i32) {
    %c0_i32 = arith.constant 0 : i32
    %c0_i32_0 = arith.constant 0 : i32
    return %c0_i32, %arg1 : i32, i32
  }
  func.func @transform_2(%arg0: i32, %arg1: i32) -> (i32, i32) {
    %c0_i32 = arith.constant 0 : i32
    %c0_i32_0 = arith.constant 0 : i32
    return %c0_i32, %arg1 : i32, i32
  }
  func.func @transform_3(%arg0: i32, %arg1: i32) -> (i32, i32) {
    %c0_i32 = arith.constant 0 : i32
    return %arg0, %arg1 : i32, i32
  }
}

module attributes {stable_mosaic.version = 11 : i64} {
  func.func @_mm_k1_kernel(%arg0: i32, %arg1: i32, %arg2: memref<16x128xbf16, #tpu.memory_space<vmem>>, %arg3: memref<128x256xbf16, #tpu.memory_space<vmem>>, %arg4: memref<1x256xf32, #tpu.memory_space<vmem>>, %arg5: memref<16x256xbf16, #tpu.memory_space<vmem>>) attributes {dimension_semantics = [#tpu.dimension_semantics<parallel>, #tpu.dimension_semantics<parallel>], iteration_bounds = array<i64: 2, 1>, scalar_prefetch = 0 : i64, scratch_operands = 0 : i64, tpu.core_type = #tpu.core_type<tc>, window_params = [{transform_indices = @transform_0, window_bounds = array<i64: 16, 128>}, {transform_indices = @transform_1, window_bounds = array<i64: 128, 256>}, {transform_indices = @transform_2, window_bounds = array<i64: 1, 256>}, {transform_indices = @transform_3, window_bounds = array<i64: 16, 256>}]} {
    %c0 = arith.constant 0 : index
    %c0_0 = arith.constant 0 : index
    %0 = vector.load %arg2[%c0, %c0_0] : memref<16x128xbf16, #tpu.memory_space<vmem>>, vector<16x128xbf16>
    %c0_1 = arith.constant 0 : index
    %c0_2 = arith.constant 0 : index
    %1 = vector.load %arg3[%c0_1, %c0_2] : memref<128x256xbf16, #tpu.memory_space<vmem>>, vector<128x256xbf16>
    %cst = arith.constant dense<0.000000e+00> : vector<16x256xf32>
    %2 = tpu.matmul %0, %1, %cst {dimension_numbers = #tpu.dot_dimension_numbers<[1], [0], [0], [1], [0, 0, 1, 1], [], []>} : vector<16x128xbf16>, vector<128x256xbf16>, vector<16x256xf32> -> vector<16x256xf32>
    %c0_3 = arith.constant 0 : index
    %c0_4 = arith.constant 0 : index
    %3 = vector.load %arg4[%c0_3, %c0_4] : memref<1x256xf32, #tpu.memory_space<vmem>>, vector<1x256xf32>
    %4 = vector.broadcast %3 : vector<1x256xf32> to vector<16x256xf32>
    %5 = arith.addf %2, %4 : vector<16x256xf32>
    %6 = arith.truncf %5 : vector<16x256xf32> to vector<16x256xbf16>
    %c0_5 = arith.constant 0 : index
    %c0_6 = arith.constant 0 : index
    %7 = vector.load %arg5[%c0_5, %c0_6] : memref<16x256xbf16, #tpu.memory_space<vmem>>, vector<16x256xbf16>
    tpu.vector_store %arg5[%c0_5, %c0_6], %6 {strides = array<i32>} : memref<16x256xbf16, #tpu.memory_space<vmem>>, vector<16x256xbf16>,
    return
  }
  func.func @transform_0(%arg0: i32, %arg1: i32) -> (i32, i32) {
    %c0_i32 = arith.constant 0 : i32
    %c0_i32_0 = arith.constant 0 : i32
    return %arg0, %c0_i32 : i32, i32
  }
  func.func @transform_1(%arg0: i32, %arg1: i32) -> (i32, i32) {
    %c0_i32 = arith.constant 0 : i32
    %c0_i32_0 = arith.constant 0 : i32
    return %c0_i32, %arg1 : i32, i32
  }
  func.func @transform_2(%arg0: i32, %arg1: i32) -> (i32, i32) {
    %c0_i32 = arith.constant 0 : i32
    %c0_i32_0 = arith.constant 0 : i32
    return %c0_i32, %arg1 : i32, i32
  }
  func.func @transform_3(%arg0: i32, %arg1: i32) -> (i32, i32) {
    %c0_i32 = arith.constant 0 : i32
    return %arg0, %arg1 : i32, i32
  }
}

module attributes {stable_mosaic.version = 11 : i64} {
  func.func @_mm_k1_kernel(%arg0: i32, %arg1: i32, %arg2: memref<16x1152xbf16, #tpu.memory_space<vmem>>, %arg3: memref<1152x128xbf16, #tpu.memory_space<vmem>>, %arg4: memref<1x128xf32, #tpu.memory_space<vmem>>, %arg5: memref<16x128xbf16, #tpu.memory_space<vmem>>) attributes {dimension_semantics = [#tpu.dimension_semantics<parallel>, #tpu.dimension_semantics<parallel>], iteration_bounds = array<i64: 2, 1>, scalar_prefetch = 0 : i64, scratch_operands = 0 : i64, tpu.core_type = #tpu.core_type<tc>, window_params = [{transform_indices = @transform_0, window_bounds = array<i64: 16, 1152>}, {transform_indices = @transform_1, window_bounds = array<i64: 1152, 128>}, {transform_indices = @transform_2, window_bounds = array<i64: 1, 128>}, {transform_indices = @transform_3, window_bounds = array<i64: 16, 128>}]} {
    %c0 = arith.constant 0 : index
    %c0_0 = arith.constant 0 : index
    %0 = vector.load %arg2[%c0, %c0_0] : memref<16x1152xbf16, #tpu.memory_space<vmem>>, vector<16x1152xbf16>
    %cst = arith.constant 0.000000e+00 : bf16
    %1 = vector.broadcast %cst : bf16 to vector<16x1152xbf16>
    %2 = arith.maximumf %0, %1 : vector<16x1152xbf16>
    %c0_1 = arith.constant 0 : index
    %c0_2 = arith.constant 0 : index
    %3 = vector.load %arg3[%c0_1, %c0_2] : memref<1152x128xbf16, #tpu.memory_space<vmem>>, vector<1152x128xbf16>
    %cst_3 = arith.constant dense<0.000000e+00> : vector<16x128xf32>
    %4 = tpu.matmul %2, %3, %cst_3 {dimension_numbers = #tpu.dot_dimension_numbers<[1], [0], [0], [1], [0, 0, 1, 1], [], []>} : vector<16x1152xbf16>, vector<1152x128xbf16>, vector<16x128xf32> -> vector<16x128xf32>
    %c0_4 = arith.constant 0 : index
    %c0_5 = arith.constant 0 : index
    %5 = vector.load %arg4[%c0_4, %c0_5] : memref<1x128xf32, #tpu.memory_space<vmem>>, vector<1x128xf32>
    %6 = vector.broadcast %5 : vector<1x128xf32> to vector<16x128xf32>
    %7 = arith.addf %4, %6 : vector<16x128xf32>
    %cst_6 = arith.constant 0.000000e+00 : f32
    %8 = vector.broadcast %cst_6 : f32 to vector<16x128xf32>
    %9 = arith.maximumf %7, %8 : vector<16x128xf32>
    %10 = arith.truncf %9 : vector<16x128xf32> to vector<16x128xbf16>
    %c0_7 = arith.constant 0 : index
    %c0_8 = arith.constant 0 : index
    %11 = vector.load %arg5[%c0_7, %c0_8] : memref<16x128xbf16, #tpu.memory_space<vmem>>, vector<16x128xbf16>
    tpu.vector_store %arg5[%c0_7, %c0_8], %10 {strides = array<i32>} : memref<16x128xbf16, #tpu.memory_space<vmem>>, vector<16x128xbf16>,
    return
  }
  func.func @transform_0(%arg0: i32, %arg1: i32) -> (i32, i32) {
    %c0_i32 = arith.constant 0 : i32
    %c0_i32_0 = arith.constant 0 : i32
    return %arg0, %c0_i32 : i32, i32
  }
  func.func @transform_1(%arg0: i32, %arg1: i32) -> (i32, i32) {
    %c0_i32 = arith.constant 0 : i32
    %c0_i32_0 = arith.constant 0 : i32
    return %c0_i32, %arg1 : i32, i32
  }
  func.func @transform_2(%arg0: i32, %arg1: i32) -> (i32, i32) {
    %c0_i32 = arith.constant 0 : i32
    %c0_i32_0 = arith.constant 0 : i32
    return %c0_i32, %arg1 : i32, i32
  }
  func.func @transform_3(%arg0: i32, %arg1: i32) -> (i32, i32) {
    %c0_i32 = arith.constant 0 : i32
    return %arg0, %arg1 : i32, i32
  }
}

module attributes {stable_mosaic.version = 11 : i64} {
  func.func @_mm_k1_kernel(%arg0: i32, %arg1: i32, %arg2: memref<16x128xbf16, #tpu.memory_space<vmem>>, %arg3: memref<128x128xbf16, #tpu.memory_space<vmem>>, %arg4: memref<1x128xf32, #tpu.memory_space<vmem>>, %arg5: memref<16x128xbf16, #tpu.memory_space<vmem>>) attributes {dimension_semantics = [#tpu.dimension_semantics<parallel>, #tpu.dimension_semantics<parallel>], iteration_bounds = array<i64: 2, 3>, scalar_prefetch = 0 : i64, scratch_operands = 0 : i64, tpu.core_type = #tpu.core_type<tc>, window_params = [{transform_indices = @transform_0, window_bounds = array<i64: 16, 128>}, {transform_indices = @transform_1, window_bounds = array<i64: 128, 128>}, {transform_indices = @transform_2, window_bounds = array<i64: 1, 128>}, {transform_indices = @transform_3, window_bounds = array<i64: 16, 128>}]} {
    %c0 = arith.constant 0 : index
    %c0_0 = arith.constant 0 : index
    %0 = vector.load %arg2[%c0, %c0_0] : memref<16x128xbf16, #tpu.memory_space<vmem>>, vector<16x128xbf16>
    %c0_1 = arith.constant 0 : index
    %c0_2 = arith.constant 0 : index
    %1 = vector.load %arg3[%c0_1, %c0_2] : memref<128x128xbf16, #tpu.memory_space<vmem>>, vector<128x128xbf16>
    %cst = arith.constant dense<0.000000e+00> : vector<16x128xf32>
    %2 = tpu.matmul %0, %1, %cst {dimension_numbers = #tpu.dot_dimension_numbers<[1], [0], [0], [1], [0, 0, 1, 1], [], []>} : vector<16x128xbf16>, vector<128x128xbf16>, vector<16x128xf32> -> vector<16x128xf32>
    %c0_3 = arith.constant 0 : index
    %c0_4 = arith.constant 0 : index
    %3 = vector.load %arg4[%c0_3, %c0_4] : memref<1x128xf32, #tpu.memory_space<vmem>>, vector<1x128xf32>
    %4 = vector.broadcast %3 : vector<1x128xf32> to vector<16x128xf32>
    %5 = arith.addf %2, %4 : vector<16x128xf32>
    %6 = arith.truncf %5 : vector<16x128xf32> to vector<16x128xbf16>
    %c0_5 = arith.constant 0 : index
    %c0_6 = arith.constant 0 : index
    %7 = vector.load %arg5[%c0_5, %c0_6] : memref<16x128xbf16, #tpu.memory_space<vmem>>, vector<16x128xbf16>
    tpu.vector_store %arg5[%c0_5, %c0_6], %6 {strides = array<i32>} : memref<16x128xbf16, #tpu.memory_space<vmem>>, vector<16x128xbf16>,
    return
  }
  func.func @transform_0(%arg0: i32, %arg1: i32) -> (i32, i32) {
    %c0_i32 = arith.constant 0 : i32
    %c0_i32_0 = arith.constant 0 : i32
    return %arg0, %c0_i32 : i32, i32
  }
  func.func @transform_1(%arg0: i32, %arg1: i32) -> (i32, i32) {
    %c0_i32 = arith.constant 0 : i32
    %c0_i32_0 = arith.constant 0 : i32
    return %c0_i32, %arg1 : i32, i32
  }
  func.func @transform_2(%arg0: i32, %arg1: i32) -> (i32, i32) {
    %c0_i32 = arith.constant 0 : i32
    %c0_i32_0 = arith.constant 0 : i32
    return %c0_i32, %arg1 : i32, i32
  }
  func.func @transform_3(%arg0: i32, %arg1: i32) -> (i32, i32) {
    %c0_i32 = arith.constant 0 : i32
    return %arg0, %arg1 : i32, i32
  }
}

module attributes {stable_mosaic.version = 11 : i64} {
  func.func @_gap_kernel(%arg0: i32, %arg1: memref<1x16x256xbf16, #tpu.memory_space<vmem>>, %arg2: memref<1x1x256xbf16, #tpu.memory_space<vmem>>) attributes {dimension_semantics = [#tpu.dimension_semantics<parallel>], iteration_bounds = array<i64: 2>, scalar_prefetch = 0 : i64, scratch_operands = 0 : i64, tpu.core_type = #tpu.core_type<tc>, window_params = [{transform_indices = @transform_0, window_bounds = array<i64: 1, 16, 256>}, {transform_indices = @transform_1, window_bounds = array<i64: 1, 1, 256>}]} {
    %c0 = arith.constant 0 : index
    %c0_0 = arith.constant 0 : index
    %c0_1 = arith.constant 0 : index
    %0 = vector.load %arg1[%c0, %c0_0, %c0_1] : memref<1x16x256xbf16, #tpu.memory_space<vmem>>, vector<1x16x256xbf16>
    %1 = arith.extf %0 : vector<1x16x256xbf16> to vector<1x16x256xf32>
    %cst = arith.constant dense<0.000000e+00> : vector<1x256xf32>
    %2 = vector.multi_reduction <add>, %1, %cst [1] : vector<1x16x256xf32> to vector<1x256xf32>
    %3 = vector.shape_cast %2 : vector<1x256xf32> to vector<1x1x256xf32>
    %cst_2 = arith.constant 1.600000e+01 : f32
    %4 = vector.broadcast %cst_2 : f32 to vector<1x1x256xf32>
    %5 = arith.divf %3, %4 : vector<1x1x256xf32>
    %6 = arith.truncf %5 : vector<1x1x256xf32> to vector<1x1x256xbf16>
    %c0_3 = arith.constant 0 : index
    %c0_4 = arith.constant 0 : index
    %c0_5 = arith.constant 0 : index
    %7 = vector.load %arg2[%c0_3, %c0_4, %c0_5] : memref<1x1x256xbf16, #tpu.memory_space<vmem>>, vector<1x1x256xbf16>
    tpu.vector_store %arg2[%c0_3, %c0_4, %c0_5], %6 {strides = array<i32>} : memref<1x1x256xbf16, #tpu.memory_space<vmem>>, vector<1x1x256xbf16>,
    return
  }
  func.func @transform_0(%arg0: i32) -> (i32, i32, i32) {
    %c0_i32 = arith.constant 0 : i32
    %c0_i32_0 = arith.constant 0 : i32
    %c0_i32_1 = arith.constant 0 : i32
    return %arg0, %c0_i32, %c0_i32_0 : i32, i32, i32
  }
  func.func @transform_1(%arg0: i32) -> (i32, i32, i32) {
    %c0_i32 = arith.constant 0 : i32
    %c0_i32_0 = arith.constant 0 : i32
    %c0_i32_1 = arith.constant 0 : i32
    return %arg0, %c0_i32, %c0_i32_0 : i32, i32, i32
  }
}

module attributes {stable_mosaic.version = 11 : i64} {
  func.func @_mm_k1_kernel(%arg0: i32, %arg1: i32, %arg2: memref<16x128xbf16, #tpu.memory_space<vmem>>, %arg3: memref<128x128xbf16, #tpu.memory_space<vmem>>, %arg4: memref<1x128xf32, #tpu.memory_space<vmem>>, %arg5: memref<16x128xbf16, #tpu.memory_space<vmem>>) attributes {dimension_semantics = [#tpu.dimension_semantics<parallel>, #tpu.dimension_semantics<parallel>], iteration_bounds = array<i64: 2, 1>, scalar_prefetch = 0 : i64, scratch_operands = 0 : i64, tpu.core_type = #tpu.core_type<tc>, window_params = [{transform_indices = @transform_0, window_bounds = array<i64: 16, 128>}, {transform_indices = @transform_1, window_bounds = array<i64: 128, 128>}, {transform_indices = @transform_2, window_bounds = array<i64: 1, 128>}, {transform_indices = @transform_3, window_bounds = array<i64: 16, 128>}]} {
    %c0 = arith.constant 0 : index
    %c0_0 = arith.constant 0 : index
    %0 = vector.load %arg2[%c0, %c0_0] : memref<16x128xbf16, #tpu.memory_space<vmem>>, vector<16x128xbf16>
    %cst = arith.constant 0.000000e+00 : bf16
    %1 = vector.broadcast %cst : bf16 to vector<16x128xbf16>
    %2 = arith.maximumf %0, %1 : vector<16x128xbf16>
    %c0_1 = arith.constant 0 : index
    %c0_2 = arith.constant 0 : index
    %3 = vector.load %arg3[%c0_1, %c0_2] : memref<128x128xbf16, #tpu.memory_space<vmem>>, vector<128x128xbf16>
    %cst_3 = arith.constant dense<0.000000e+00> : vector<16x128xf32>
    %4 = tpu.matmul %2, %3, %cst_3 {dimension_numbers = #tpu.dot_dimension_numbers<[1], [0], [0], [1], [0, 0, 1, 1], [], []>} : vector<16x128xbf16>, vector<128x128xbf16>, vector<16x128xf32> -> vector<16x128xf32>
    %c0_4 = arith.constant 0 : index
    %c0_5 = arith.constant 0 : index
    %5 = vector.load %arg4[%c0_4, %c0_5] : memref<1x128xf32, #tpu.memory_space<vmem>>, vector<1x128xf32>
    %6 = vector.broadcast %5 : vector<1x128xf32> to vector<16x128xf32>
    %7 = arith.addf %4, %6 : vector<16x128xf32>
    %cst_6 = arith.constant 0.000000e+00 : f32
    %8 = vector.broadcast %cst_6 : f32 to vector<16x128xf32>
    %9 = arith.maximumf %7, %8 : vector<16x128xf32>
    %10 = arith.truncf %9 : vector<16x128xf32> to vector<16x128xbf16>
    %c0_7 = arith.constant 0 : index
    %c0_8 = arith.constant 0 : index
    %11 = vector.load %arg5[%c0_7, %c0_8] : memref<16x128xbf16, #tpu.memory_space<vmem>>, vector<16x128xbf16>
    tpu.vector_store %arg5[%c0_7, %c0_8], %10 {strides = array<i32>} : memref<16x128xbf16, #tpu.memory_space<vmem>>, vector<16x128xbf16>,
    return
  }
  func.func @transform_0(%arg0: i32, %arg1: i32) -> (i32, i32) {
    %c0_i32 = arith.constant 0 : i32
    %c0_i32_0 = arith.constant 0 : i32
    return %arg0, %c0_i32 : i32, i32
  }
  func.func @transform_1(%arg0: i32, %arg1: i32) -> (i32, i32) {
    %c0_i32 = arith.constant 0 : i32
    %c0_i32_0 = arith.constant 0 : i32
    return %c0_i32, %arg1 : i32, i32
  }
  func.func @transform_2(%arg0: i32, %arg1: i32) -> (i32, i32) {
    %c0_i32 = arith.constant 0 : i32
    %c0_i32_0 = arith.constant 0 : i32
    return %c0_i32, %arg1 : i32, i32
  }
  func.func @transform_3(%arg0: i32, %arg1: i32) -> (i32, i32) {
    %c0_i32 = arith.constant 0 : i32
    return %arg0, %arg1 : i32, i32
  }
}

module attributes {stable_mosaic.version = 11 : i64} {
  func.func @_mm_k1_kernel(%arg0: i32, %arg1: i32, %arg2: memref<16x128xbf16, #tpu.memory_space<vmem>>, %arg3: memref<128x256xbf16, #tpu.memory_space<vmem>>, %arg4: memref<1x256xf32, #tpu.memory_space<vmem>>, %arg5: memref<16x256xbf16, #tpu.memory_space<vmem>>, %arg6: memref<16x256xbf16, #tpu.memory_space<vmem>>) attributes {dimension_semantics = [#tpu.dimension_semantics<parallel>, #tpu.dimension_semantics<parallel>], iteration_bounds = array<i64: 2, 1>, scalar_prefetch = 0 : i64, scratch_operands = 0 : i64, tpu.core_type = #tpu.core_type<tc>, window_params = [{transform_indices = @transform_0, window_bounds = array<i64: 16, 128>}, {transform_indices = @transform_1, window_bounds = array<i64: 128, 256>}, {transform_indices = @transform_2, window_bounds = array<i64: 1, 256>}, {transform_indices = @transform_3, window_bounds = array<i64: 16, 256>}, {transform_indices = @transform_4, window_bounds = array<i64: 16, 256>}]} {
    %c0 = arith.constant 0 : index
    %c0_0 = arith.constant 0 : index
    %0 = vector.load %arg2[%c0, %c0_0] : memref<16x128xbf16, #tpu.memory_space<vmem>>, vector<16x128xbf16>
    %c0_1 = arith.constant 0 : index
    %c0_2 = arith.constant 0 : index
    %1 = vector.load %arg3[%c0_1, %c0_2] : memref<128x256xbf16, #tpu.memory_space<vmem>>, vector<128x256xbf16>
    %cst = arith.constant dense<0.000000e+00> : vector<16x256xf32>
    %2 = tpu.matmul %0, %1, %cst {dimension_numbers = #tpu.dot_dimension_numbers<[1], [0], [0], [1], [0, 0, 1, 1], [], []>} : vector<16x128xbf16>, vector<128x256xbf16>, vector<16x256xf32> -> vector<16x256xf32>
    %c0_3 = arith.constant 0 : index
    %c0_4 = arith.constant 0 : index
    %3 = vector.load %arg4[%c0_3, %c0_4] : memref<1x256xf32, #tpu.memory_space<vmem>>, vector<1x256xf32>
    %4 = vector.broadcast %3 : vector<1x256xf32> to vector<16x256xf32>
    %5 = arith.addf %2, %4 : vector<16x256xf32>
    %c0_5 = arith.constant 0 : index
    %c0_6 = arith.constant 0 : index
    %6 = vector.load %arg5[%c0_5, %c0_6] : memref<16x256xbf16, #tpu.memory_space<vmem>>, vector<16x256xbf16>
    %7 = arith.extf %6 : vector<16x256xbf16> to vector<16x256xf32>
    %8 = arith.addf %5, %7 : vector<16x256xf32>
    %cst_7 = arith.constant 0.000000e+00 : f32
    %9 = vector.broadcast %cst_7 : f32 to vector<16x256xf32>
    %10 = arith.maximumf %8, %9 : vector<16x256xf32>
    %11 = arith.truncf %10 : vector<16x256xf32> to vector<16x256xbf16>
    %c0_8 = arith.constant 0 : index
    %c0_9 = arith.constant 0 : index
    %12 = vector.load %arg6[%c0_8, %c0_9] : memref<16x256xbf16, #tpu.memory_space<vmem>>, vector<16x256xbf16>
    tpu.vector_store %arg6[%c0_8, %c0_9], %11 {strides = array<i32>} : memref<16x256xbf16, #tpu.memory_space<vmem>>, vector<16x256xbf16>,
    return
  }
  func.func @transform_0(%arg0: i32, %arg1: i32) -> (i32, i32) {
    %c0_i32 = arith.constant 0 : i32
    %c0_i32_0 = arith.constant 0 : i32
    return %arg0, %c0_i32 : i32, i32
  }
  func.func @transform_1(%arg0: i32, %arg1: i32) -> (i32, i32) {
    %c0_i32 = arith.constant 0 : i32
    %c0_i32_0 = arith.constant 0 : i32
    return %c0_i32, %arg1 : i32, i32
  }
  func.func @transform_2(%arg0: i32, %arg1: i32) -> (i32, i32) {
    %c0_i32 = arith.constant 0 : i32
    %c0_i32_0 = arith.constant 0 : i32
    return %c0_i32, %arg1 : i32, i32
  }
  func.func @transform_3(%arg0: i32, %arg1: i32) -> (i32, i32) {
    %c0_i32 = arith.constant 0 : i32
    return %arg0, %arg1 : i32, i32
  }
  func.func @transform_4(%arg0: i32, %arg1: i32) -> (i32, i32) {
    %c0_i32 = arith.constant 0 : i32
    return %arg0, %arg1 : i32, i32
  }
}

module attributes {stable_mosaic.version = 11 : i64} {
  func.func @_mm_k1_kernel(%arg0: i32, %arg1: i32, %arg2: memref<16x256xbf16, #tpu.memory_space<vmem>>, %arg3: memref<256x128xbf16, #tpu.memory_space<vmem>>, %arg4: memref<1x128xf32, #tpu.memory_space<vmem>>, %arg5: memref<16x128xbf16, #tpu.memory_space<vmem>>) attributes {dimension_semantics = [#tpu.dimension_semantics<parallel>, #tpu.dimension_semantics<parallel>], iteration_bounds = array<i64: 2, 1>, scalar_prefetch = 0 : i64, scratch_operands = 0 : i64, tpu.core_type = #tpu.core_type<tc>, window_params = [{transform_indices = @transform_0, window_bounds = array<i64: 16, 256>}, {transform_indices = @transform_1, window_bounds = array<i64: 256, 128>}, {transform_indices = @transform_2, window_bounds = array<i64: 1, 128>}, {transform_indices = @transform_3, window_bounds = array<i64: 16, 128>}]} {
    %c0 = arith.constant 0 : index
    %c0_0 = arith.constant 0 : index
    %0 = vector.load %arg2[%c0, %c0_0] : memref<16x256xbf16, #tpu.memory_space<vmem>>, vector<16x256xbf16>
    %c0_1 = arith.constant 0 : index
    %c0_2 = arith.constant 0 : index
    %1 = vector.load %arg3[%c0_1, %c0_2] : memref<256x128xbf16, #tpu.memory_space<vmem>>, vector<256x128xbf16>
    %cst = arith.constant dense<0.000000e+00> : vector<16x128xf32>
    %2 = tpu.matmul %0, %1, %cst {dimension_numbers = #tpu.dot_dimension_numbers<[1], [0], [0], [1], [0, 0, 1, 1], [], []>} : vector<16x256xbf16>, vector<256x128xbf16>, vector<16x128xf32> -> vector<16x128xf32>
    %c0_3 = arith.constant 0 : index
    %c0_4 = arith.constant 0 : index
    %3 = vector.load %arg4[%c0_3, %c0_4] : memref<1x128xf32, #tpu.memory_space<vmem>>, vector<1x128xf32>
    %4 = vector.broadcast %3 : vector<1x128xf32> to vector<16x128xf32>
    %5 = arith.addf %2, %4 : vector<16x128xf32>
    %cst_5 = arith.constant 0.000000e+00 : f32
    %6 = vector.broadcast %cst_5 : f32 to vector<16x128xf32>
    %7 = arith.maximumf %5, %6 : vector<16x128xf32>
    %8 = arith.truncf %7 : vector<16x128xf32> to vector<16x128xbf16>
    %c0_6 = arith.constant 0 : index
    %c0_7 = arith.constant 0 : index
    %9 = vector.load %arg5[%c0_6, %c0_7] : memref<16x128xbf16, #tpu.memory_space<vmem>>, vector<16x128xbf16>
    tpu.vector_store %arg5[%c0_6, %c0_7], %8 {strides = array<i32>} : memref<16x128xbf16, #tpu.memory_space<vmem>>, vector<16x128xbf16>,
    return
  }
  func.func @transform_0(%arg0: i32, %arg1: i32) -> (i32, i32) {
    %c0_i32 = arith.constant 0 : i32
    %c0_i32_0 = arith.constant 0 : i32
    return %arg0, %c0_i32 : i32, i32
  }
  func.func @transform_1(%arg0: i32, %arg1: i32) -> (i32, i32) {
    %c0_i32 = arith.constant 0 : i32
    %c0_i32_0 = arith.constant 0 : i32
    return %c0_i32, %arg1 : i32, i32
  }
  func.func @transform_2(%arg0: i32, %arg1: i32) -> (i32, i32) {
    %c0_i32 = arith.constant 0 : i32
    %c0_i32_0 = arith.constant 0 : i32
    return %c0_i32, %arg1 : i32, i32
  }
  func.func @transform_3(%arg0: i32, %arg1: i32) -> (i32, i32) {
    %c0_i32 = arith.constant 0 : i32
    return %arg0, %arg1 : i32, i32
  }
}

module attributes {stable_mosaic.version = 11 : i64} {
  func.func @_mm_k1_kernel(%arg0: i32, %arg1: i32, %arg2: memref<2x256xbf16, #tpu.memory_space<vmem>>, %arg3: memref<256x128xbf16, #tpu.memory_space<vmem>>, %arg4: memref<1x128xf32, #tpu.memory_space<vmem>>, %arg5: memref<2x128xbf16, #tpu.memory_space<vmem>>) attributes {dimension_semantics = [#tpu.dimension_semantics<parallel>, #tpu.dimension_semantics<parallel>], iteration_bounds = array<i64: 1, 1>, scalar_prefetch = 0 : i64, scratch_operands = 0 : i64, tpu.core_type = #tpu.core_type<tc>, window_params = [{transform_indices = @transform_0, window_bounds = array<i64: 2, 256>}, {transform_indices = @transform_1, window_bounds = array<i64: 256, 128>}, {transform_indices = @transform_2, window_bounds = array<i64: 1, 128>}, {transform_indices = @transform_3, window_bounds = array<i64: 2, 128>}]} {
    %c0 = arith.constant 0 : index
    %c0_0 = arith.constant 0 : index
    %0 = vector.load %arg2[%c0, %c0_0] : memref<2x256xbf16, #tpu.memory_space<vmem>>, vector<2x256xbf16>
    %c0_1 = arith.constant 0 : index
    %c0_2 = arith.constant 0 : index
    %1 = vector.load %arg3[%c0_1, %c0_2] : memref<256x128xbf16, #tpu.memory_space<vmem>>, vector<256x128xbf16>
    %cst = arith.constant dense<0.000000e+00> : vector<2x128xf32>
    %2 = tpu.matmul %0, %1, %cst {dimension_numbers = #tpu.dot_dimension_numbers<[1], [0], [0], [1], [0, 0, 1, 1], [], []>} : vector<2x256xbf16>, vector<256x128xbf16>, vector<2x128xf32> -> vector<2x128xf32>
    %c0_3 = arith.constant 0 : index
    %c0_4 = arith.constant 0 : index
    %3 = vector.load %arg4[%c0_3, %c0_4] : memref<1x128xf32, #tpu.memory_space<vmem>>, vector<1x128xf32>
    %4 = vector.broadcast %3 : vector<1x128xf32> to vector<2x128xf32>
    %5 = arith.addf %2, %4 : vector<2x128xf32>
    %cst_5 = arith.constant 0.000000e+00 : f32
    %6 = vector.broadcast %cst_5 : f32 to vector<2x128xf32>
    %7 = arith.maximumf %5, %6 : vector<2x128xf32>
    %8 = arith.truncf %7 : vector<2x128xf32> to vector<2x128xbf16>
    %c0_6 = arith.constant 0 : index
    %c0_7 = arith.constant 0 : index
    %9 = vector.load %arg5[%c0_6, %c0_7] : memref<2x128xbf16, #tpu.memory_space<vmem>>, vector<2x128xbf16>
    tpu.vector_store %arg5[%c0_6, %c0_7], %8 {strides = array<i32>} : memref<2x128xbf16, #tpu.memory_space<vmem>>, vector<2x128xbf16>,
    return
  }
  func.func @transform_0(%arg0: i32, %arg1: i32) -> (i32, i32) {
    %c0_i32 = arith.constant 0 : i32
    %c0_i32_0 = arith.constant 0 : i32
    return %arg0, %c0_i32 : i32, i32
  }
  func.func @transform_1(%arg0: i32, %arg1: i32) -> (i32, i32) {
    %c0_i32 = arith.constant 0 : i32
    %c0_i32_0 = arith.constant 0 : i32
    return %c0_i32, %arg1 : i32, i32
  }
  func.func @transform_2(%arg0: i32, %arg1: i32) -> (i32, i32) {
    %c0_i32 = arith.constant 0 : i32
    %c0_i32_0 = arith.constant 0 : i32
    return %c0_i32, %arg1 : i32, i32
  }
  func.func @transform_3(%arg0: i32, %arg1: i32) -> (i32, i32) {
    %c0_i32 = arith.constant 0 : i32
    return %arg0, %arg1 : i32, i32
  }
}

module attributes {stable_mosaic.version = 11 : i64} {
  func.func @_interp_kernel(%arg0: i32, %arg1: memref<32x4xbf16, #tpu.memory_space<vmem>>, %arg2: memref<1x4x256xbf16, #tpu.memory_space<vmem>>, %arg3: memref<1x32x256xbf16, #tpu.memory_space<vmem>>) attributes {dimension_semantics = [#tpu.dimension_semantics<parallel>], iteration_bounds = array<i64: 8>, scalar_prefetch = 0 : i64, scratch_operands = 0 : i64, tpu.core_type = #tpu.core_type<tc>, window_params = [{pipeline_mode = #tpu.pipeline_mode<synchronous>, transform_indices = @transform_0, window_bounds = array<i64: 32, 4>}, {transform_indices = @transform_1, window_bounds = array<i64: 1, 4, 256>}, {transform_indices = @transform_2, window_bounds = array<i64: 1, 32, 256>}]} {
    %c0 = arith.constant 0 : index
    %c0_0 = arith.constant 0 : index
    %0 = vector.load %arg1[%c0, %c0_0] : memref<32x4xbf16, #tpu.memory_space<vmem>>, vector<32x4xbf16>
    %c0_1 = arith.constant 0 : index
    %c0_2 = arith.constant 0 : index
    %c0_3 = arith.constant 0 : index
    %1 = vector.load %arg2[%c0_1, %c0_2, %c0_3] : memref<1x4x256xbf16, #tpu.memory_space<vmem>>, vector<1x4x256xbf16>
    %2 = vector.shape_cast %1 : vector<1x4x256xbf16> to vector<4x256xbf16>
    %cst = arith.constant dense<0.000000e+00> : vector<32x256xf32>
    %3 = tpu.matmul %0, %2, %cst {dimension_numbers = #tpu.dot_dimension_numbers<[1], [0], [0], [1], [0, 0, 1, 1], [], []>} : vector<32x4xbf16>, vector<4x256xbf16>, vector<32x256xf32> -> vector<32x256xf32>
    %4 = vector.shape_cast %3 : vector<32x256xf32> to vector<1x32x256xf32>
    %5 = arith.truncf %4 : vector<1x32x256xf32> to vector<1x32x256xbf16>
    %c0_4 = arith.constant 0 : index
    %c0_5 = arith.constant 0 : index
    %c0_6 = arith.constant 0 : index
    %6 = vector.load %arg3[%c0_4, %c0_5, %c0_6] : memref<1x32x256xbf16, #tpu.memory_space<vmem>>, vector<1x32x256xbf16>
    tpu.vector_store %arg3[%c0_4, %c0_5, %c0_6], %5 {strides = array<i32>} : memref<1x32x256xbf16, #tpu.memory_space<vmem>>, vector<1x32x256xbf16>,
    return
  }
  func.func @transform_0(%arg0: i32) -> (i32, i32) {
    %c0_i32 = arith.constant 0 : i32
    %c0_i32_0 = arith.constant 0 : i32
    %c0_i32_1 = arith.constant 0 : i32
    return %c0_i32, %c0_i32_0 : i32, i32
  }
  func.func @transform_1(%arg0: i32) -> (i32, i32, i32) {
    %c0_i32 = arith.constant 0 : i32
    %c0_i32_0 = arith.constant 0 : i32
    %c0_i32_1 = arith.constant 0 : i32
    return %arg0, %c0_i32, %c0_i32_0 : i32, i32, i32
  }
  func.func @transform_2(%arg0: i32) -> (i32, i32, i32) {
    %c0_i32 = arith.constant 0 : i32
    %c0_i32_0 = arith.constant 0 : i32
    %c0_i32_1 = arith.constant 0 : i32
    return %arg0, %c0_i32, %c0_i32_0 : i32, i32, i32
  }
}

module attributes {stable_mosaic.version = 11 : i64} {
  func.func @_interp_kernel(%arg0: i32, %arg1: memref<32x4xbf16, #tpu.memory_space<vmem>>, %arg2: memref<1x4x64xbf16, #tpu.memory_space<vmem>>, %arg3: memref<1x32x64xf32, #tpu.memory_space<vmem>>) attributes {dimension_semantics = [#tpu.dimension_semantics<parallel>], iteration_bounds = array<i64: 2>, scalar_prefetch = 0 : i64, scratch_operands = 0 : i64, tpu.core_type = #tpu.core_type<tc>, window_params = [{pipeline_mode = #tpu.pipeline_mode<synchronous>, transform_indices = @transform_0, window_bounds = array<i64: 32, 4>}, {transform_indices = @transform_1, window_bounds = array<i64: 1, 4, 64>}, {transform_indices = @transform_2, window_bounds = array<i64: 1, 32, 64>}]} {
    %c0 = arith.constant 0 : index
    %c0_0 = arith.constant 0 : index
    %0 = vector.load %arg1[%c0, %c0_0] : memref<32x4xbf16, #tpu.memory_space<vmem>>, vector<32x4xbf16>
    %c0_1 = arith.constant 0 : index
    %c0_2 = arith.constant 0 : index
    %c0_3 = arith.constant 0 : index
    %1 = vector.load %arg2[%c0_1, %c0_2, %c0_3] : memref<1x4x64xbf16, #tpu.memory_space<vmem>>, vector<1x4x64xbf16>
    %2 = vector.shape_cast %1 : vector<1x4x64xbf16> to vector<4x64xbf16>
    %cst = arith.constant dense<0.000000e+00> : vector<32x64xf32>
    %3 = tpu.matmul %0, %2, %cst {dimension_numbers = #tpu.dot_dimension_numbers<[1], [0], [0], [1], [0, 0, 1, 1], [], []>} : vector<32x4xbf16>, vector<4x64xbf16>, vector<32x64xf32> -> vector<32x64xf32>
    %cst_4 = arith.constant 0.000000e+00 : f32
    %4 = vector.broadcast %cst_4 : f32 to vector<32x64xf32>
    %5 = arith.subf %4, %3 : vector<32x64xf32>
    %6 = math.exp %5 : vector<32x64xf32>
    %cst_5 = arith.constant 1.000000e+00 : f32
    %7 = vector.broadcast %cst_5 : f32 to vector<32x64xf32>
    %8 = arith.addf %7, %6 : vector<32x64xf32>
    %cst_6 = arith.constant 1.000000e+00 : f32
    %9 = vector.broadcast %cst_6 : f32 to vector<32x64xf32>
    %10 = arith.divf %9, %8 : vector<32x64xf32>
    %11 = vector.shape_cast %10 : vector<32x64xf32> to vector<1x32x64xf32>
    %c0_7 = arith.constant 0 : index
    %c0_8 = arith.constant 0 : index
    %c0_9 = arith.constant 0 : index
    %12 = vector.load %arg3[%c0_7, %c0_8, %c0_9] : memref<1x32x64xf32, #tpu.memory_space<vmem>>, vector<1x32x64xf32>
    tpu.vector_store %arg3[%c0_7, %c0_8, %c0_9], %11 {strides = array<i32>} : memref<1x32x64xf32, #tpu.memory_space<vmem>>, vector<1x32x64xf32>,
    return
  }
  func.func @transform_0(%arg0: i32) -> (i32, i32) {
    %c0_i32 = arith.constant 0 : i32
    %c0_i32_0 = arith.constant 0 : i32
    %c0_i32_1 = arith.constant 0 : i32
    return %c0_i32, %c0_i32_0 : i32, i32
  }
  func.func @transform_1(%arg0: i32) -> (i32, i32, i32) {
    %c0_i32 = arith.constant 0 : i32
    %c0_i32_0 = arith.constant 0 : i32
    %c0_i32_1 = arith.constant 0 : i32
    return %arg0, %c0_i32, %c0_i32_0 : i32, i32, i32
  }
  func.func @transform_2(%arg0: i32) -> (i32, i32, i32) {
    %c0_i32 = arith.constant 0 : i32
    %c0_i32_0 = arith.constant 0 : i32
    %c0_i32_1 = arith.constant 0 : i32
    return %arg0, %c0_i32, %c0_i32_0 : i32, i32, i32
  }
}

</mosaic_0001>

<bundles_post_ra>
// kernel: deeplabv3_fcn_forward.25
= control target key start
LH: loop header
LB: loop body
LE: loop exit
PB: predicated region body
PF: predicated region fallthrough
CT: control target
= control target key end

     0   :  { %s1382_s12 = smov 0   ;;  %s1384_s13 = smov 0   ;;  %s1554_s0 = inlined_call_operand.vmem [shape: bf16[512,147], index: 0, kind: input, shape index: {}]   ;;  %s1555_s1 = inlined_call_operand.vmem [shape: bf16[147,128], index: 1, kind: input, shape index: {}]   ;;  %s1556_s2 = inlined_call_operand.vmem [shape: f32[1,128], index: 2, kind: input, shape index: {}]   ;;  %s1557_s3 = inlined_call_operand.vmem [shape: bf16[512,128], index: 3, kind: output, shape index: {}]  }
   0x1   :  { %s1386_s14 = smov 0  }
   0x2 LB: > { %s25_s15 = sadd.s32 1, %s1354_s13  ;;  %p1005_p0 = scmp.ge.s32.totalorder %s1358_s14, 1  ;;  %s1358_s14 = sphi %s1386_s14, %s13_s14   ;;  %s1354_s13 = sphi %s1384_s13, %s1559_s13   ;;  %s1350_s12 = sphi %s1382_s12, %s1558_s12  }
   0x3   : > { %p27_p1 = scmp.ge.s32.totalorder %s25_s15, 2  ;;  %p170_p2 = scmp.lt.s32.totalorder %s1358_s14, 3 }
   0x5   : > { %s1561_s15 = smov (%p27_p1, %s25_s15), 0  ;;  %p171_p3 = pnand %p1005_p0, %p170_p2 }
   0x6   : > { %v1278_v0 = vld [vmem:[%s1555_s1] sm:$0xff] (!%p171_p3)   ;;  %v1360_v1 = vmov (!%p171_p3), 0   ;;  %v1279_v2 = vld [vmem:[%s1555_s1 + $0x8] sm:$0xff] (!%p171_p3)   ;;  %v1280_v3 = vld [vmem:[%s1555_s1 + $0x10] sm:$0xff] (!%p171_p3)   ;;  %s1006_s22 = sshll.u32 (!%p171_p3), %s1350_s12, 5  ;;  %vm488_vm0 = vcmask (!%p171_p3), 154624  }
   0x7   : > { %174 = sbr.rel (%p171_p3) target bundleno = 324 (0x144), region = 32  ;;  %544 = vmatprep.subr.bf16.mxu0 (!%p171_p3), %v1360_v1  ;;  %1232 = vmatprep.subr.bf16.mxu1 (!%p171_p3), %v1360_v1  ;;  %p206_p4 = scmp.lt.s32.totalorder (!%p171_p3), %s1006_s22, 63  ;;  %v1281_v4 = vld [vmem:[%s1555_s1 + $0x18] sm:$0xff] (!%p171_p3)   ;;  %v1282_v5 = vld [vmem:[%s1555_s1 + $0x20] sm:$0xff] (!%p171_p3)   ;;  %v1283_v8 = vld [vmem:[%s1555_s1 + $0x28] sm:$0xff] (!%p171_p3)   ;;  %vm537_vm1 = vcmask (!%p171_p3), 1040384  }
   0x8   : > { %545 = vmatpush1.bf16.msra.mxu0 (!%p171_p3), %v1278_v0  ;;  %1242 = vmatpush1.bf16.msra.mxu1 (!%p171_p3), %v1278_v0  ;;  %v1284_v9 = vld [vmem:[%s1555_s1 + $0x30] sm:$0xff] (!%p171_p3)   ;;  %v1285_v10 = vld [vmem:[%s1555_s1 + $0x38] sm:$0xff] (!%p171_p3)   ;;  %vm538_vm2 = vcmask (!%p171_p3), 1041408   ;;  %v1361_v11 = vmov (!%p171_p3), 65535   ;;  %v1286_v13 = vld [vmem:[%s1555_s1 + $0x40] sm:$0xff] (!%p171_p3)  }
   0x9   : > { %546 = vmatprep.subr.bf16.mxu0 (!%p171_p3), %v1360_v1  ;;  %1233 = vmatprep.subr.bf16.mxu1 (!%p171_p3), %v1360_v1  ;;  %v539_v12 = vsel (!%p171_p3), %vm537_vm1, 4294967295, %v1361_v11  ;;  %v1287_v14 = vld [vmem:[%s1555_s1 + $0x48] ss:$0 sps:$4 sm:$0x33] (!%p171_p3)   ;;  %v1489_v47 = vld [vmem:[%s1556_s2] ss:$0 sm:$0xff] (!%p171_p3) }
   0xa   : > { %v540_v15 = vsel (!%p171_p3), %vm538_vm2, %v539_v12, 0 }
   0xb   : > { %v542_v16 = vand.u32 (!%p171_p3), %v1287_v14, %v540_v15 }
   0xc   : > { %547 = vmatpush1.bf16.msra.mxu0 (!%p171_p3), %v1279_v2  ;;  %1243 = vmatpush1.bf16.msra.mxu1 (!%p171_p3), %v1279_v2 }
   0xd   : > { %548 = vmatprep.subr.bf16.mxu0 (!%p171_p3), %v1360_v1  ;;  %1234 = vmatprep.subr.bf16.mxu1 (!%p171_p3), %v1360_v1 }
   0xe   : > { %s1563_s22 = smov (!%p206_p4, %s1006_s22), 63 }
   0xf   : > { %s1104_s25 = sshll.u32 %s1563_s22, 3  ;;  %s1010_s19 = sshll.u32 %s1563_s22, 2 }
  0x10   : > { %549 = vmatpush1.bf16.msra.mxu0 %v1280_v3  ;;  %1244 = vmatpush1.bf16.msra.mxu1 %v1280_v3  ;;  %s1418_s28 = scalar_lea.vmem %s1554_s0, %s1104_s25  ;;  %s1499_s23 = scalar_lea.vmem %s1557_s3, %s1010_s19 }
  0x11   : > { %550 = vmatprep.subr.bf16.mxu0 %v1360_v1  ;;  %1235 = vmatprep.subr.bf16.mxu1 %v1360_v1  ;;  %v1290_v6 = vld [vmem:[%s1418_s28 + $0x4] ss:$8 sps:$4 sm:$0xff]   ;;  %v1288_v17 = vld [vmem:[%s1418_s28] ss:$8 sps:$4 sm:$0xff]   ;;  %v1294_v19 = vld [vmem:[%s1418_s28 + $0x14] ss:$8 sps:$4 sm:$0xff]  }
  0x12   : > { %v1293_v7 = vld [vmem:[%s1418_s28 + $0x84] ss:$8 sps:$4 sm:$0xff]   ;;  %1054 = vmatprep.mubr.msk.bf16.mxu0 %vm488_vm0, %v1290_v6  ;;  %v1291_v18 = vld [vmem:[%s1418_s28 + $0x80] ss:$8 sps:$4 sm:$0xff]   ;;  %v1296_v20 = vld [vmem:[%s1418_s28 + $0x94] ss:$8 sps:$4 sm:$0xff]  }
  0x13   : > { %1062 = vmatprep.mubr.msk.bf16.mxu1 %vm488_vm0, %v1293_v7  ;;  %v1298_v21 = vld [vmem:[%s1418_s28 + $0x10] ss:$8 sps:$4 sm:$0xff]   ;;  %v1300_v23 = vld [vmem:[%s1418_s28 + $0x24] ss:$8 sps:$4 sm:$0xff]   ;;  %v1304_v25 = vld [vmem:[%s1418_s28 + $0x20] ss:$8 sps:$4 sm:$0xff]  }
  0x14   : > { %551 = vmatpush1.bf16.msra.mxu0 %v1281_v4  ;;  %1245 = vmatpush1.bf16.msra.mxu1 %v1281_v4  ;;  %v1299_v22 = vld [vmem:[%s1418_s28 + $0x90] ss:$8 sps:$4 sm:$0xff]   ;;  %v1302_v24 = vld [vmem:[%s1418_s28 + $0xa4] ss:$8 sps:$4 sm:$0xff]   ;;  %v1305_v26 = vld [vmem:[%s1418_s28 + $0xa0] ss:$8 sps:$4 sm:$0xff]  }
  0x15   : > { %552 = vmatprep.subr.bf16.mxu0 %v1360_v1  ;;  %1236 = vmatprep.subr.bf16.mxu1 %v1360_v1  ;;  %v1306_v27 = vld [vmem:[%s1418_s28 + $0x34] ss:$8 sps:$4 sm:$0xff]   ;;  %v1310_v29 = vld [vmem:[%s1418_s28 + $0x30] ss:$8 sps:$4 sm:$0xff]   ;;  %v1312_v31 = vld [vmem:[%s1418_s28 + $0x44] ss:$8 sps:$4 sm:$0xff]  }
  0x16   : > { %v1308_v28 = vld [vmem:[%s1418_s28 + $0xb4] ss:$8 sps:$4 sm:$0xff]   ;;  %v1311_v30 = vld [vmem:[%s1418_s28 + $0xb0] ss:$8 sps:$4 sm:$0xff]   ;;  %v1314_v32 = vld [vmem:[%s1418_s28 + $0xc4] ss:$8 sps:$4 sm:$0xff]  }
  0x17   : > { %v1316_v33 = vld [vmem:[%s1418_s28 + $0x40] ss:$8 sps:$4 sm:$0xff]   ;;  %v1318_v35 = vld [vmem:[%s1418_s28 + $0x54] ss:$8 sps:$4 sm:$0xff]   ;;  %v1322_v37 = vld [vmem:[%s1418_s28 + $0x50] ss:$8 sps:$4 sm:$0xff]  }
  0x18   : > { %553 = vmatpush1.bf16.msra.mxu0 %v1282_v5  ;;  %1246 = vmatpush1.bf16.msra.mxu1 %v1282_v5  ;;  %v1317_v34 = vld [vmem:[%s1418_s28 + $0xc0] ss:$8 sps:$4 sm:$0xff]   ;;  %v1320_v36 = vld [vmem:[%s1418_s28 + $0xd4] ss:$8 sps:$4 sm:$0xff]   ;;  %v1323_v38 = vld [vmem:[%s1418_s28 + $0xd0] ss:$8 sps:$4 sm:$0xff]  }
  0x19   : > { %554 = vmatprep.subr.bf16.mxu0 %v1360_v1  ;;  %1237 = vmatprep.subr.bf16.mxu1 %v1360_v1  ;;  %v1324_v39 = vld [vmem:[%s1418_s28 + $0x64] ss:$8 sps:$4 sm:$0xff]   ;;  %v1328_v41 = vld [vmem:[%s1418_s28 + $0x60] ss:$8 sps:$4 sm:$0xff]   ;;  %v1330_v43 = vld [vmem:[%s1418_s28 + $0x74] ss:$8 sps:$4 sm:$0xff]  }
  0x1a   : > { %v1326_v40 = vld [vmem:[%s1418_s28 + $0xe4] ss:$8 sps:$4 sm:$0xff]   ;;  %v1329_v42 = vld [vmem:[%s1418_s28 + $0xe0] ss:$8 sps:$4 sm:$0xff]   ;;  %v1332_v44 = vld [vmem:[%s1418_s28 + $0xf4] ss:$8 sps:$4 sm:$0xff]  }
  0x1b   : > { %v1334_v45 = vld [vmem:[%s1418_s28 + $0x70] ss:$8 sps:$4 sm:$0xff]  }
  0x1c   : > { %555 = vmatpush1.bf16.msra.mxu0 %v1283_v8  ;;  %1247 = vmatpush1.bf16.msra.mxu1 %v1283_v8  ;;  %v1335_v46 = vld [vmem:[%s1418_s28 + $0xf0] ss:$8 sps:$4 sm:$0xff]  }
  0x1d   : > { %556 = vmatprep.subr.bf16.mxu0 %v1360_v1  ;;  %1238 = vmatprep.subr.bf16.mxu1 %v1360_v1 }
  0x20   : > { %557 = vmatpush1.bf16.msra.mxu0 %v1284_v9  ;;  %1248 = vmatpush1.bf16.msra.mxu1 %v1284_v9 }
  0x21   : > { %558 = vmatprep.subr.bf16.mxu0 %v1360_v1  ;;  %1239 = vmatprep.subr.bf16.mxu1 %v1360_v1 }
  0x24   : > { %559 = vmatpush1.bf16.msra.mxu0 %v1285_v10  ;;  %1249 = vmatpush1.bf16.msra.mxu1 %v1285_v10 }
  0x25   : > { %560 = vmatprep.subr.bf16.mxu0 %v1360_v1  ;;  %1240 = vmatprep.subr.bf16.mxu1 %v1360_v1 }
  0x28   : > { %561 = vmatpush1.bf16.msra.mxu0 %v1286_v13  ;;  %1250 = vmatpush1.bf16.msra.mxu1 %v1286_v13 }
  0x29   : > { %562 = vmatprep.subr.bf16.mxu0 %v1360_v1  ;;  %1241 = vmatprep.subr.bf16.mxu1 %v1360_v1 }
  0x2c   : > { %563 = vmatpush1.bf16.msra.mxu0 %v542_v16  ;;  %1251 = vmatpush1.bf16.msra.mxu1 %v542_v16 }
  0x2f   : > { %577 = vmatmul.mubr.bf16.vlgmr.msra.gmra.mrb[0].mxu0 %v1288_v17  ;;  %641 = vmatmul.mubr.bf16.vlgmr.msra.gmra.mrb[0].mxu1 %v1291_v18 }
  0x30   : > { %1055 = vmatprep.mubr.msk.bf16.mxu0 %vm488_vm0, %v1294_v19  ;;  %1063 = vmatprep.mubr.msk.bf16.mxu1 %vm488_vm0, %v1296_v20 }
  0x37   : > { %585 = vmatmul.mubr.bf16.gmra.mrb[4].mxu0 %v1298_v21  ;;  %649 = vmatmul.mubr.bf16.gmra.mrb[4].mxu1 %v1299_v22 }
  0x38   : > { %1056 = vmatprep.mubr.msk.bf16.mxu0 %vm488_vm0, %v1300_v23  ;;  %1064 = vmatprep.mubr.msk.bf16.mxu1 %vm488_vm0, %v1302_v24 }
  0x3f   : > { %593 = vmatmul.mubr.bf16.gmra.mrb[8].mxu0 %v1304_v25  ;;  %657 = vmatmul.mubr.bf16.gmra.mrb[8].mxu1 %v1305_v26 }
  0x40   : > { %1057 = vmatprep.mubr.msk.bf16.mxu0 %vm488_vm0, %v1306_v27  ;;  %1065 = vmatprep.mubr.msk.bf16.mxu1 %vm488_vm0, %v1308_v28 }
  0x47   : > { %601 = vmatmul.mubr.bf16.gmra.mrb[12].mxu0 %v1310_v29  ;;  %665 = vmatmul.mubr.bf16.gmra.mrb[12].mxu1 %v1311_v30 }
  0x48   : > { %1058 = vmatprep.mubr.msk.bf16.mxu0 %vm488_vm0, %v1312_v31  ;;  %1066 = vmatprep.mubr.msk.bf16.mxu1 %vm488_vm0, %v1314_v32 }
  0x4f   : > { %609 = vmatmul.mubr.bf16.gmra.mrb[16].mxu0 %v1316_v33  ;;  %673 = vmatmul.mubr.bf16.gmra.mrb[16].mxu1 %v1317_v34 }
  0x50   : > { %1059 = vmatprep.mubr.msk.bf16.mxu0 %vm488_vm0, %v1318_v35  ;;  %1067 = vmatprep.mubr.msk.bf16.mxu1 %vm488_vm0, %v1320_v36 }
  0x57   : > { %617 = vmatmul.mubr.bf16.gmra.mrb[20].mxu0 %v1322_v37  ;;  %681 = vmatmul.mubr.bf16.gmra.mrb[20].mxu1 %v1323_v38 }
  0x58   : > { %1060 = vmatprep.mubr.msk.bf16.mxu0 %vm488_vm0, %v1324_v39  ;;  %1068 = vmatprep.mubr.msk.bf16.mxu1 %vm488_vm0, %v1326_v40 }
  0x5f   : > { %625 = vmatmul.mubr.bf16.gmra.mrb[24].mxu0 %v1328_v41  ;;  %689 = vmatmul.mubr.bf16.gmra.mrb[24].mxu1 %v1329_v42 }
  0x60   : > { %1061 = vmatprep.mubr.msk.bf16.mxu0 %vm488_vm0, %v1330_v43  ;;  %1069 = vmatprep.mubr.msk.bf16.mxu1 %vm488_vm0, %v1332_v44 }
  0x67   : > { %633 = vmatmul.mubr.bf16.gmra.mrb[28].mxu0 %v1334_v45  ;;  %697 = vmatmul.mubr.bf16.gmra.mrb[28].mxu1 %v1335_v46 }
 0x102   : > { %v578_v48 = vpop.f32.mrb[0].mxu0  ;;  %v642_v49 = vpop.f32.mrb[0].mxu1 }
 0x103   : > { %v579_v50 = vadd.f32 %v1489_v47, %v578_v48  ;;  %v643_v51 = vadd.f32 %v1489_v47, %v642_v49  ;;  %v580_v52 = vpop.f32.mrb[1].mxu0  ;;  %v644_v53 = vpop.f32.mrb[1].mxu1 }
 0x104   : > { %v581_v54 = vpop.f32.mrb[2].mxu0  ;;  %v645_v55 = vpop.f32.mrb[2].mxu1 }
 0x105   : > { %v582_v56 = vadd.f32 %v1489_v47, %v581_v54  ;;  %v646_v57 = vadd.f32 %v1489_v47, %v645_v55  ;;  %v583_v58 = vpop.f32.mrb[3].mxu0  ;;  %v647_v59 = vpop.f32.mrb[3].mxu1  ;;  %v705_v60 = vmax.f32 %v579_v50, 0.0  ;;  %v721_v61 = vmax.f32 %v643_v51, 0.0 }
 0x107   : > { %v706_v62 = vmax.f32 %v582_v56, 0.0  ;;  %v722_v63 = vmax.f32 %v646_v57, 0.0 }
 0x109   : > { %v1140_v0 = vpack.c.bf16 %v706_v62, %v705_v60  ;;  %v1180_v1 = vpack.c.bf16 %v722_v63, %v721_v61 }
 0x10a   : > { %v586_v2 = vpop.f32.mrb[4].mxu0  ;;  %v650_v3 = vpop.f32.mrb[4].mxu1 }
 0x10b   : > { %1141 = vst [vmem:[%s1499_s23] sm:$0xff] %v1140_v0   ;;  %1224 = vst [vmem:[%s1499_s23 + $0x40] sm:$0xff] %v1180_v1   ;;  %v587_v4 = vadd.f32 %v1489_v47, %v586_v2  ;;  %v651_v5 = vadd.f32 %v1489_v47, %v650_v3  ;;  %v588_v6 = vpop.f32.mrb[5].mxu0  ;;  %v652_v7 = vpop.f32.mrb[5].mxu1 }
 0x10c   : > { %v589_v8 = vpop.f32.mrb[6].mxu0  ;;  %v653_v9 = vpop.f32.mrb[6].mxu1 }
 0x10d   : > { %v590_v10 = vadd.f32 %v1489_v47, %v589_v8  ;;  %v654_v11 = vadd.f32 %v1489_v47, %v653_v9  ;;  %v591_v12 = vpop.f32.mrb[7].mxu0  ;;  %v655_v13 = vpop.f32.mrb[7].mxu1  ;;  %v707_v14 = vmax.f32 %v587_v4, 0.0  ;;  %v723_v15 = vmax.f32 %v651_v5, 0.0 }
 0x10f   : > { %v708_v16 = vmax.f32 %v590_v10, 0.0  ;;  %v724_v17 = vmax.f32 %v654_v11, 0.0 }
 0x111   : > { %v1145_v18 = vpack.c.bf16 %v708_v16, %v707_v14  ;;  %v1185_v19 = vpack.c.bf16 %v724_v17, %v723_v15 }
 0x112   : > { %v594_v20 = vpop.f32.mrb[8].mxu0  ;;  %v658_v21 = vpop.f32.mrb[8].mxu1 }
 0x113   : > { %1217 = vst [vmem:[%s1499_s23 + $0x8] sm:$0xff] %v1145_v18   ;;  %1225 = vst [vmem:[%s1499_s23 + $0x48] sm:$0xff] %v1185_v19   ;;  %v595_v22 = vadd.f32 %v1489_v47, %v594_v20  ;;  %v659_v23 = vadd.f32 %v1489_v47, %v658_v21  ;;  %v596_v24 = vpop.f32.mrb[9].mxu0  ;;  %v660_v25 = vpop.f32.mrb[9].mxu1 }
 0x114   : > { %v597_v26 = vpop.f32.mrb[10].mxu0  ;;  %v661_v27 = vpop.f32.mrb[10].mxu1 }
 0x115   : > { %v598_v28 = vadd.f32 %v1489_v47, %v597_v26  ;;  %v662_v29 = vadd.f32 %v1489_v47, %v661_v27  ;;  %v599_v30 = vpop.f32.mrb[11].mxu0  ;;  %v663_v31 = vpop.f32.mrb[11].mxu1  ;;  %v709_v32 = vmax.f32 %v595_v22, 0.0  ;;  %v725_v33 = vmax.f32 %v659_v23, 0.0 }
 0x117   : > { %v710_v34 = vmax.f32 %v598_v28, 0.0  ;;  %v726_v35 = vmax.f32 %v662_v29, 0.0 }
 0x119   : > { %v1150_v36 = vpack.c.bf16 %v710_v34, %v709_v32  ;;  %v1190_v37 = vpack.c.bf16 %v726_v35, %v725_v33 }
 0x11a   : > { %v602_v38 = vpop.f32.mrb[12].mxu0  ;;  %v666_v39 = vpop.f32.mrb[12].mxu1 }
 0x11b   : > { %1218 = vst [vmem:[%s1499_s23 + $0x10] sm:$0xff] %v1150_v36   ;;  %1226 = vst [vmem:[%s1499_s23 + $0x50] sm:$0xff] %v1190_v37   ;;  %v603_v40 = vadd.f32 %v1489_v47, %v602_v38  ;;  %v667_v41 = vadd.f32 %v1489_v47, %v666_v39  ;;  %v604_v42 = vpop.f32.mrb[13].mxu0  ;;  %v668_v43 = vpop.f32.mrb[13].mxu1 }
 0x11c   : > { %v605_v44 = vpop.f32.mrb[14].mxu0  ;;  %v669_v45 = vpop.f32.mrb[14].mxu1 }
 0x11d   : > { %v606_v46 = vadd.f32 %v1489_v47, %v605_v44  ;;  %v670_v48 = vadd.f32 %v1489_v47, %v669_v45  ;;  %v607_v49 = vpop.f32.mrb[15].mxu0  ;;  %v671_v50 = vpop.f32.mrb[15].mxu1  ;;  %v711_v51 = vmax.f32 %v603_v40, 0.0  ;;  %v727_v52 = vmax.f32 %v667_v41, 0.0 }
 0x11f   : > { %v712_v53 = vmax.f32 %v606_v46, 0.0  ;;  %v728_v54 = vmax.f32 %v670_v48, 0.0 }
 0x121   : > { %v1155_v55 = vpack.c.bf16 %v712_v53, %v711_v51  ;;  %v1195_v56 = vpack.c.bf16 %v728_v54, %v727_v52 }
 0x122   : > { %v610_v57 = vpop.f32.mrb[16].mxu0  ;;  %v674_v58 = vpop.f32.mrb[16].mxu1 }
 0x123   : > { %1219 = vst [vmem:[%s1499_s23 + $0x18] sm:$0xff] %v1155_v55   ;;  %1227 = vst [vmem:[%s1499_s23 + $0x58] sm:$0xff] %v1195_v56   ;;  %v611_v59 = vadd.f32 %v1489_v47, %v610_v57  ;;  %v675_v60 = vadd.f32 %v1489_v47, %v674_v58  ;;  %v612_v61 = vpop.f32.mrb[17].mxu0  ;;  %v676_v62 = vpop.f32.mrb[17].mxu1 }
 0x124   : > { %v613_v63 = vpop.f32.mrb[18].mxu0  ;;  %v677_v0 = vpop.f32.mrb[18].mxu1 }
 0x125   : > { %v614_v1 = vadd.f32 %v1489_v47, %v613_v63  ;;  %v678_v2 = vadd.f32 %v1489_v47, %v677_v0  ;;  %v615_v3 = vpop.f32.mrb[19].mxu0  ;;  %v679_v4 = vpop.f32.mrb[19].mxu1  ;;  %v713_v5 = vmax.f32 %v611_v59, 0.0  ;;  %v729_v6 = vmax.f32 %v675_v60, 0.0 }
 0x127   : > { %v714_v7 = vmax.f32 %v614_v1, 0.0  ;;  %v730_v8 = vmax.f32 %v678_v2, 0.0 }
 0x129   : > { %v1160_v9 = vpack.c.bf16 %v714_v7, %v713_v5  ;;  %v1200_v10 = vpack.c.bf16 %v730_v8, %v729_v6 }
 0x12a   : > { %v618_v11 = vpop.f32.mrb[20].mxu0  ;;  %v682_v12 = vpop.f32.mrb[20].mxu1 }
 0x12b   : > { %1220 = vst [vmem:[%s1499_s23 + $0x20] sm:$0xff] %v1160_v9   ;;  %1228 = vst [vmem:[%s1499_s23 + $0x60] sm:$0xff] %v1200_v10   ;;  %v619_v13 = vadd.f32 %v1489_v47, %v618_v11  ;;  %v683_v14 = vadd.f32 %v1489_v47, %v682_v12  ;;  %v620_v15 = vpop.f32.mrb[21].mxu0  ;;  %v684_v16 = vpop.f32.mrb[21].mxu1 }
 0x12c   : > { %v621_v17 = vpop.f32.mrb[22].mxu0  ;;  %v685_v18 = vpop.f32.mrb[22].mxu1 }
 0x12d   : > { %v622_v19 = vadd.f32 %v1489_v47, %v621_v17  ;;  %v686_v20 = vadd.f32 %v1489_v47, %v685_v18  ;;  %v623_v21 = vpop.f32.mrb[23].mxu0  ;;  %v687_v22 = vpop.f32.mrb[23].mxu1  ;;  %v715_v23 = vmax.f32 %v619_v13, 0.0  ;;  %v731_v24 = vmax.f32 %v683_v14, 0.0 }
 0x12f   : > { %v716_v25 = vmax.f32 %v622_v19, 0.0  ;;  %v732_v26 = vmax.f32 %v686_v20, 0.0 }
 0x131   : > { %v1165_v27 = vpack.c.bf16 %v716_v25, %v715_v23  ;;  %v1205_v28 = vpack.c.bf16 %v732_v26, %v731_v24 }
 0x132   : > { %v626_v29 = vpop.f32.mrb[24].mxu0  ;;  %v690_v30 = vpop.f32.mrb[24].mxu1 }
 0x133   : > { %1221 = vst [vmem:[%s1499_s23 + $0x28] sm:$0xff] %v1165_v27   ;;  %1229 = vst [vmem:[%s1499_s23 + $0x68] sm:$0xff] %v1205_v28   ;;  %v627_v31 = vadd.f32 %v1489_v47, %v626_v29  ;;  %v691_v32 = vadd.f32 %v1489_v47, %v690_v30  ;;  %v628_v33 = vpop.f32.mrb[25].mxu0  ;;  %v692_v34 = vpop.f32.mrb[25].mxu1 }
 0x134   : > { %v629_v35 = vpop.f32.mrb[26].mxu0  ;;  %v693_v36 = vpop.f32.mrb[26].mxu1 }
 0x135   : > { %v630_v37 = vadd.f32 %v1489_v47, %v629_v35  ;;  %v694_v38 = vadd.f32 %v1489_v47, %v693_v36  ;;  %v631_v39 = vpop.f32.mrb[27].mxu0  ;;  %v695_v40 = vpop.f32.mrb[27].mxu1  ;;  %v717_v41 = vmax.f32 %v627_v31, 0.0  ;;  %v733_v42 = vmax.f32 %v691_v32, 0.0 }
 0x137   : > { %v718_v43 = vmax.f32 %v630_v37, 0.0  ;;  %v734_v44 = vmax.f32 %v694_v38, 0.0 }
 0x139   : > { %v1170_v45 = vpack.c.bf16 %v718_v43, %v717_v41  ;;  %v1210_v46 = vpack.c.bf16 %v734_v44, %v733_v42 }
 0x13a   : > { %v634_v48 = vpop.f32.mrb[28].mxu0  ;;  %v698_v49 = vpop.f32.mrb[28].mxu1 }
 0x13b   : > { %1222 = vst [vmem:[%s1499_s23 + $0x30] sm:$0xff] %v1170_v45   ;;  %1230 = vst [vmem:[%s1499_s23 + $0x70] sm:$0xff] %v1210_v46   ;;  %v635_v50 = vadd.f32 %v1489_v47, %v634_v48  ;;  %v699_v51 = vadd.f32 %v1489_v47, %v698_v49  ;;  %v636_v52 = vpop.f32.mrb[29].mxu0  ;;  %v700_v53 = vpop.f32.mrb[29].mxu1 }
 0x13c   : > { %v637_v54 = vpop.f32.mrb[30].mxu0  ;;  %v701_v55 = vpop.f32.mrb[30].mxu1 }
 0x13d   : > { %v638_v56 = vadd.f32 %v1489_v47, %v637_v54  ;;  %v702_v57 = vadd.f32 %v1489_v47, %v701_v55  ;;  %v639_v58 = vpop.f32.mrb[31].mxu0  ;;  %v703_v59 = vpop.f32.mrb[31].mxu1  ;;  %v719_v60 = vmax.f32 %v635_v50, 0.0  ;;  %v735_v61 = vmax.f32 %v699_v51, 0.0 }
 0x13f   : > { %v720_v62 = vmax.f32 %v638_v56, 0.0  ;;  %v736_v63 = vmax.f32 %v702_v57, 0.0 }
 0x141   : > { %v1175_v0 = vpack.c.bf16 %v720_v62, %v719_v60  ;;  %v1215_v1 = vpack.c.bf16 %v736_v63, %v735_v61 }
 0x143   : > { %1223 = vst [vmem:[%s1499_s23 + $0x38] sm:$0xff] %v1175_v0   ;;  %1231 = vst [vmem:[%s1499_s23 + $0x78] sm:$0xff] %v1215_v1  }
 0x144 PF: > { %s13_s14 = sadd.s32 1, %s1358_s14   ;;  %s1558_s12 = smov %s1354_s13 }
 0x145   : > { %p10_p5 = scmp.ge.s32.totalorder %s13_s14, 4   ;;  %s1559_s13 = smov %s1561_s15 }
 0x147   :  { %12 = sbr.rel (!%p10_p5) target bundleno = 2 (0x2), region = 68 }

// kernel: deeplabv3_fcn_forward.26
= control target key start
LH: loop header
LB: loop body
LE: loop exit
PB: predicated region body
PF: predicated region fallthrough
CT: control target
= control target key end

     0   :  { %s822_s6 = smov 0   ;;  %s824_s7 = smov 0   ;;  %s1034_s0 = inlined_call_operand.vmem [shape: bf16[9,128,128], index: 0, kind: input, shape index: {}]   ;;  %s1035_s1 = inlined_call_operand.vmem [shape: bf16[128,128], index: 1, kind: output, shape index: {}]  }
   0x1   :  { %s826_s8 = smov 0  }
   0x2 LB: > { %s659_s9 = sadd.s32 4294967295, %s810_s8   ;;  %s839_s10 = sadd.s32 1, %s810_s8   ;;  %s810_s8 = sphi %s826_s8, %s1038_s8   ;;  %s806_s7 = sphi %s824_s7, %s1037_s7   ;;  %s802_s6 = sphi %s822_s6, %s1036_s6  }
   0x3   : > { %s15_s11 = ssub.s32 %s810_s8, %s839_s10  ;;  %s18_s12 = sadd.s32 1, %s806_s7 }
   0x4   : > { %p16_p0 = scmp.eq.s32.totalorder %s15_s11, 0  ;;  %p25_p1 = scmp.ne.s32.totalorder %s806_s7, %s802_s6 }
   0x5   : > { %p26_p2 = scmp.eq.s32.totalorder %s810_s8, 0  ;;  %p662_p4 = scmp.ge.s32.totalorder %s810_s8, 2 }
   0x6   : > { %s848_s13 = scalar_select %p16_p0, %s806_s7, %s18_s12  }
   0x7   : > { %p27_p3 = por %p26_p2, %p25_p1  ;;  %77 = sbr.rel (%p662_p4) target bundleno = 37 (0x25), region = 16 }
   0xe   : > { %80 = sbr.rel (!%p27_p3) target bundleno = 37 (0x25), region = 20  ;;  %s82_s14 = sand.u32 (%p27_p3), 1, %s806_s7  }
   0xf   : > { %s734_s15 = sshll.u32 (%p27_p3), %s810_s8, 5  ;;  %s762_s16 = smul.u32 (%p27_p3), 288, %s82_s14 }
  0x10   : > { %s856_s19 = scalar_lea.vmem (%p27_p3), %s1034_s0, %s734_s15 }
  0x11   : > { %v103_v0 = vld [vmem:[%s856_s19] sm:$0xff] (%p27_p3)   ;;  %v107_v1 = vld [vmem:[%s856_s19 + $0x8] sm:$0xff] (%p27_p3)   ;;  %v111_v2 = vld [vmem:[%s856_s19 + $0x10] sm:$0xff] (%p27_p3)   ;;  %s864_s20 = scalar_lea.vmem (%p27_p3), [#allocation2], %s762_s16 }
  0x12   : > { %v115_v3 = vld [vmem:[%s856_s19 + $0x18] sm:$0xff] (%p27_p3)   ;;  %v119_v4 = vld [vmem:[%s856_s19 + $0x40] sm:$0xff] (%p27_p3)   ;;  %v123_v5 = vld [vmem:[%s856_s19 + $0x48] sm:$0xff] (%p27_p3)   ;;  %104 = vst [vmem:[%s864_s20] sm:$0xff] (%p27_p3), %v103_v0  }
  0x13   : > { %108 = vst [vmem:[%s864_s20 + $0x8] sm:$0xff] (%p27_p3), %v107_v1   ;;  %112 = vst [vmem:[%s864_s20 + $0x10] sm:$0xff] (%p27_p3), %v111_v2   ;;  %v127_v6 = vld [vmem:[%s856_s19 + $0x50] sm:$0xff] (%p27_p3)   ;;  %v131_v7 = vld [vmem:[%s856_s19 + $0x58] sm:$0xff] (%p27_p3)  }
  0x14   : > { %116 = vst [vmem:[%s864_s20 + $0x18] sm:$0xff] (%p27_p3), %v115_v3   ;;  %120 = vst [vmem:[%s864_s20 + $0x20] sm:$0xff] (%p27_p3), %v119_v4   ;;  %v135_v8 = vld [vmem:[%s856_s19 + $0x80] sm:$0xff] (%p27_p3)   ;;  %v139_v9 = vld [vmem:[%s856_s19 + $0x88] sm:$0xff] (%p27_p3)  }
  0x15   : > { %124 = vst [vmem:[%s864_s20 + $0x28] sm:$0xff] %v123_v5   ;;  %128 = vst [vmem:[%s864_s20 + $0x30] sm:$0xff] %v127_v6   ;;  %v143_v10 = vld [vmem:[%s856_s19 + $0x90] sm:$0xff]   ;;  %v147_v11 = vld [vmem:[%s856_s19 + $0x98] sm:$0xff]  }
  0x16   : > { %132 = vst [vmem:[%s864_s20 + $0x38] sm:$0xff] %v131_v7   ;;  %136 = vst [vmem:[%s864_s20 + $0x40] sm:$0xff] %v135_v8   ;;  %v151_v12 = vld [vmem:[%s856_s19 + $0xc0] sm:$0xff]   ;;  %v155_v13 = vld [vmem:[%s856_s19 + $0xc8] sm:$0xff]  }
  0x17   : > { %140 = vst [vmem:[%s864_s20 + $0x48] sm:$0xff] %v139_v9   ;;  %144 = vst [vmem:[%s864_s20 + $0x50] sm:$0xff] %v143_v10   ;;  %v159_v14 = vld [vmem:[%s856_s19 + $0xd0] sm:$0xff]   ;;  %v163_v15 = vld [vmem:[%s856_s19 + $0xd8] sm:$0xff]  }
  0x18   : > { %148 = vst [vmem:[%s864_s20 + $0x58] sm:$0xff] %v147_v11   ;;  %152 = vst [vmem:[%s864_s20 + $0x60] sm:$0xff] %v151_v12   ;;  %v167_v16 = vld [vmem:[%s856_s19 + $0x100] sm:$0xff]   ;;  %v171_v17 = vld [vmem:[%s856_s19 + $0x108] sm:$0xff]  }
  0x19   : > { %156 = vst [vmem:[%s864_s20 + $0x68] sm:$0xff] %v155_v13   ;;  %160 = vst [vmem:[%s864_s20 + $0x70] sm:$0xff] %v159_v14   ;;  %v175_v18 = vld [vmem:[%s856_s19 + $0x110] sm:$0xff]   ;;  %v179_v19 = vld [vmem:[%s856_s19 + $0x118] sm:$0xff]  }
  0x1a   : > { %164 = vst [vmem:[%s864_s20 + $0x78] sm:$0xff] %v163_v15   ;;  %168 = vst [vmem:[%s864_s20 + $0x80] sm:$0xff] %v167_v16   ;;  %v183_v20 = vld [vmem:[%s856_s19 + $0x140] sm:$0xff]   ;;  %v187_v21 = vld [vmem:[%s856_s19 + $0x148] sm:$0xff]  }
  0x1b   : > { %172 = vst [vmem:[%s864_s20 + $0x88] sm:$0xff] %v171_v17   ;;  %176 = vst [vmem:[%s864_s20 + $0x90] sm:$0xff] %v175_v18   ;;  %v191_v22 = vld [vmem:[%s856_s19 + $0x150] sm:$0xff]   ;;  %v195_v23 = vld [vmem:[%s856_s19 + $0x158] sm:$0xff]  }
  0x1c   : > { %180 = vst [vmem:[%s864_s20 + $0x98] sm:$0xff] %v179_v19   ;;  %184 = vst [vmem:[%s864_s20 + $0xa0] sm:$0xff] %v183_v20   ;;  %v199_v24 = vld [vmem:[%s856_s19 + $0x180] sm:$0xff]   ;;  %v203_v25 = vld [vmem:[%s856_s19 + $0x188] sm:$0xff]  }
  0x1d   : > { %188 = vst [vmem:[%s864_s20 + $0xa8] sm:$0xff] %v187_v21   ;;  %192 = vst [vmem:[%s864_s20 + $0xb0] sm:$0xff] %v191_v22   ;;  %v207_v26 = vld [vmem:[%s856_s19 + $0x190] sm:$0xff]   ;;  %v211_v27 = vld [vmem:[%s856_s19 + $0x198] sm:$0xff]  }
  0x1e   : > { %196 = vst [vmem:[%s864_s20 + $0xb8] sm:$0xff] %v195_v23   ;;  %200 = vst [vmem:[%s864_s20 + $0xc0] sm:$0xff] %v199_v24   ;;  %v215_v28 = vld [vmem:[%s856_s19 + $0x1c0] sm:$0xff]   ;;  %v219_v29 = vld [vmem:[%s856_s19 + $0x1c8] sm:$0xff]  }
  0x1f   : > { %204 = vst [vmem:[%s864_s20 + $0xc8] sm:$0xff] %v203_v25   ;;  %208 = vst [vmem:[%s864_s20 + $0xd0] sm:$0xff] %v207_v26   ;;  %v223_v30 = vld [vmem:[%s856_s19 + $0x1d0] sm:$0xff]   ;;  %v227_v31 = vld [vmem:[%s856_s19 + $0x1d8] sm:$0xff]  }
  0x20   : > { %212 = vst [vmem:[%s864_s20 + $0xd8] sm:$0xff] %v211_v27   ;;  %216 = vst [vmem:[%s864_s20 + $0xe0] sm:$0xff] %v215_v28   ;;  %v231_v32 = vld [vmem:[%s856_s19 + $0x200] sm:$0xff]   ;;  %v235_v33 = vld [vmem:[%s856_s19 + $0x208] sm:$0xff]  }
  0x21   : > { %220 = vst [vmem:[%s864_s20 + $0xe8] sm:$0xff] %v219_v29   ;;  %224 = vst [vmem:[%s864_s20 + $0xf0] sm:$0xff] %v223_v30   ;;  %v239_v34 = vld [vmem:[%s856_s19 + $0x210] sm:$0xff]   ;;  %v243_v35 = vld [vmem:[%s856_s19 + $0x218] sm:$0xff]  }
  0x22   : > { %228 = vst [vmem:[%s864_s20 + $0xf8] sm:$0xff] %v227_v31   ;;  %232 = vst [vmem:[%s864_s20 + $0x100] sm:$0xff] %v231_v32  }
  0x23   : > { %236 = vst [vmem:[%s864_s20 + $0x108] sm:$0xff] %v235_v33   ;;  %240 = vst [vmem:[%s864_s20 + $0x110] sm:$0xff] %v239_v34  }
  0x24   : > { %244 = vst [vmem:[%s864_s20 + $0x118] sm:$0xff] %v243_v35  }
  0x25 PF: > { %p665_p5 = scmp.ge.s32.totalorder %s810_s8, 1  ;;  %p412_p6 = scmp.lt.s32.totalorder %s810_s8, 3 }
  0x27   : > { %p413_p7 = pnand %p665_p5, %p412_p6 }
  0x28   : > { %s419_s21 = sand.u32 (!%p413_p7), 1, %s802_s6   ;;  %s666_s24 = sshll.u32 (!%p413_p7), %s659_s9, 3 }
  0x29   : > { %416 = sbr.rel (%p413_p7) target bundleno = 82 (0x52), region = 61  ;;  %p440_p8 = scmp.lt.s32.totalorder (!%p413_p7), %s666_s24, 15 }
  0x2a   : > { %s763_s22 = smul.u32 (!%p413_p7), 288, %s419_s21 }
  0x2c   : > { %s935_s23 = scalar_lea.vmem (!%p413_p7), [#allocation2], %s763_s22 }
  0x2d   : > { %v445_v36 = vld [vmem:[%s935_s23] sm:$0xf] (!%p413_p7)  ;;  %v446_v37 = vld [vmem:[%s935_s23 + $0x4] sm:$0xf] (!%p413_p7)  ;;  %v447_v54 = vld [vmem:[%s935_s23 + $0x8] sm:$0xf] (!%p413_p7) }
  0x2e   : > { %v668_v38 = vld [vmem:[%s935_s23 + $0x20] sm:$0xf] (!%p413_p7)  ;;  %v669_v39 = vld [vmem:[%s935_s23 + $0x24] sm:$0xf] (!%p413_p7)  ;;  %v448_v55 = vld [vmem:[%s935_s23 + $0xc] sm:$0xf] (!%p413_p7) }
  0x2f   : > { %v676_v40 = vld [vmem:[%s935_s23 + $0x40] sm:$0xf] (!%p413_p7)  ;;  %v462_v41 = vmax.bf16 (!%p413_p7), %v668_v38, %v445_v36  ;;  %v463_v42 = vmax.bf16 (!%p413_p7), %v669_v39, %v446_v37  ;;  %v677_v43 = vld [vmem:[%s935_s23 + $0x44] sm:$0xf] (!%p413_p7)  ;;  %v670_v56 = vld [vmem:[%s935_s23 + $0x28] sm:$0xf] (!%p413_p7) }
  0x30   : > { %v684_v44 = vld [vmem:[%s935_s23 + $0x60] sm:$0xf]  ;;  %v685_v45 = vld [vmem:[%s935_s23 + $0x64] sm:$0xf]  ;;  %v671_v57 = vld [vmem:[%s935_s23 + $0x2c] sm:$0xf]  ;;  %v464_v61 = vmax.bf16 %v670_v56, %v447_v54 }
  0x31   : > { %v479_v46 = vmax.bf16 %v676_v40, %v462_v41  ;;  %v480_v47 = vmax.bf16 %v677_v43, %v463_v42  ;;  %v692_v48 = vld [vmem:[%s935_s23 + $0x80] sm:$0xf]  ;;  %v693_v49 = vld [vmem:[%s935_s23 + $0x84] sm:$0xf]  ;;  %v465_v62 = vmax.bf16 %v671_v57, %v448_v55  ;;  %v678_v63 = vld [vmem:[%s935_s23 + $0x48] sm:$0xf] }
  0x32   : > { %v700_v52 = vld [vmem:[%s935_s23 + $0xa0] sm:$0xf]  ;;  %v701_v53 = vld [vmem:[%s935_s23 + $0xa4] sm:$0xf]  ;;  %v679_v0 = vld [vmem:[%s935_s23 + $0x4c] sm:$0xf]  ;;  %v481_v8 = vmax.bf16 %v678_v63, %v464_v61 }
  0x33   : > { %v496_v50 = vmax.bf16 %v684_v44, %v479_v46  ;;  %v497_v51 = vmax.bf16 %v685_v45, %v480_v47  ;;  %v708_v60 = vld [vmem:[%s935_s23 + $0xc0] sm:$0xf]  ;;  %v709_v1 = vld [vmem:[%s935_s23 + $0xc4] sm:$0xf]  ;;  %v686_v2 = vld [vmem:[%s935_s23 + $0x68] sm:$0xf]  ;;  %v482_v9 = vmax.bf16 %v679_v0, %v465_v62 }
  0x34   : > { %v687_v3 = vld [vmem:[%s935_s23 + $0x6c] sm:$0xf]  ;;  %s1040_s24 = smov (!%p440_p8, %s666_s24), 15  ;;  %v716_v6 = vld [vmem:[%s935_s23 + $0xe0] sm:$0xf]  ;;  %v498_v16 = vmax.bf16 %v686_v2, %v481_v8 }
  0x35   : > { %v513_v58 = vmax.bf16 %v692_v48, %v496_v50  ;;  %v514_v59 = vmax.bf16 %v693_v49, %v497_v51  ;;  %v717_v7 = vld [vmem:[%s935_s23 + $0xe4] sm:$0xf]  ;;  %v724_v10 = vld [vmem:[%s935_s23 + $0x100] sm:$0xf]  ;;  %v694_v12 = vld [vmem:[%s935_s23 + $0x88] sm:$0xf]  ;;  %v499_v17 = vmax.bf16 %v687_v3, %v482_v9 }
  0x36   : > { %v725_v11 = vld [vmem:[%s935_s23 + $0x104] sm:$0xf]  ;;  %v695_v13 = vld [vmem:[%s935_s23 + $0x8c] sm:$0xf]  ;;  %v702_v18 = vld [vmem:[%s935_s23 + $0xa8] sm:$0xf]  ;;  %v515_v26 = vmax.bf16 %v694_v12, %v498_v16 }
  0x37   : > { %v530_v4 = vmax.bf16 %v700_v52, %v513_v58  ;;  %v531_v5 = vmax.bf16 %v701_v53, %v514_v59  ;;  %v703_v19 = vld [vmem:[%s935_s23 + $0xac] sm:$0xf]  ;;  %v449_v20 = vld [vmem:[%s935_s23 + $0x10] sm:$0xf]  ;;  %v450_v21 = vld [vmem:[%s935_s23 + $0x14] sm:$0xf]  ;;  %v516_v27 = vmax.bf16 %v695_v13, %v499_v17 }
  0x38   : > { %v672_v22 = vld [vmem:[%s935_s23 + $0x30] sm:$0xf]  ;;  %v673_v23 = vld [vmem:[%s935_s23 + $0x34] sm:$0xf]  ;;  %s667_s25 = sshll.u32 %s1040_s24, 2  ;;  %v532_v37 = vmax.bf16 %v702_v18, %v515_v26 }
  0x39   : > { %v547_v14 = vmax.bf16 %v708_v60, %v530_v4  ;;  %v548_v15 = vmax.bf16 %v709_v1, %v531_v5  ;;  %v680_v28 = vld [vmem:[%s935_s23 + $0x50] sm:$0xf]  ;;  %v681_v29 = vld [vmem:[%s935_s23 + $0x54] sm:$0xf]  ;;  %v710_v30 = vld [vmem:[%s935_s23 + $0xc8] sm:$0xf]  ;;  %v466_v33 = vmax.bf16 %v672_v22, %v449_v20  ;;  %v467_v34 = vmax.bf16 %v673_v23, %v450_v21  ;;  %s988_s28 = scalar_lea.vmem %s1035_s1, %s667_s25 }
  0x3a   : > { %v711_v31 = vld [vmem:[%s935_s23 + $0xcc] sm:$0xf]  ;;  %v718_v32 = vld [vmem:[%s935_s23 + $0xe8] sm:$0xf]  ;;  %v533_v38 = vmax.bf16 %v703_v19, %v516_v27  ;;  %v688_v40 = vld [vmem:[%s935_s23 + $0x70] sm:$0xf]  ;;  %v549_v48 = vmax.bf16 %v710_v30, %v532_v37 }
  0x3b   : > { %v564_v24 = vmax.bf16 %v716_v6, %v547_v14  ;;  %v565_v25 = vmax.bf16 %v717_v7, %v548_v15  ;;  %v719_v39 = vld [vmem:[%s935_s23 + $0xec] sm:$0xf]  ;;  %v689_v41 = vld [vmem:[%s935_s23 + $0x74] sm:$0xf]  ;;  %v726_v42 = vld [vmem:[%s935_s23 + $0x108] sm:$0xf]  ;;  %v483_v44 = vmax.bf16 %v680_v28, %v466_v33  ;;  %v484_v45 = vmax.bf16 %v681_v29, %v467_v34 }
  0x3c   : > { %v727_v43 = vld [vmem:[%s935_s23 + $0x10c] sm:$0xf]  ;;  %v696_v46 = vld [vmem:[%s935_s23 + $0x90] sm:$0xf]  ;;  %v550_v49 = vmax.bf16 %v711_v31, %v533_v38  ;;  %v697_v50 = vld [vmem:[%s935_s23 + $0x94] sm:$0xf]  ;;  %v566_v58 = vmax.bf16 %v718_v32, %v549_v48 }
  0x3d   : > { %v581_v35 = vmax.bf16 %v724_v10, %v564_v24  ;;  %v582_v36 = vmax.bf16 %v725_v11, %v565_v25  ;;  %v704_v51 = vld [vmem:[%s935_s23 + $0xb0] sm:$0xf]  ;;  %v451_v52 = vld [vmem:[%s935_s23 + $0x18] sm:$0xf]  ;;  %v500_v53 = vmax.bf16 %v688_v40, %v483_v44  ;;  %v501_v54 = vmax.bf16 %v689_v41, %v484_v45  ;;  %v452_v55 = vld [vmem:[%s935_s23 + $0x1c] sm:$0xf] }
  0x3e   : > { %v674_v56 = vld [vmem:[%s935_s23 + $0x38] sm:$0xf]  ;;  %v675_v57 = vld [vmem:[%s935_s23 + $0x3c] sm:$0xf]  ;;  %v567_v59 = vmax.bf16 %v719_v39, %v550_v49  ;;  %v705_v60 = vld [vmem:[%s935_s23 + $0xb4] sm:$0xf]  ;;  %v583_v5 = vmax.bf16 %v726_v42, %v566_v58 }
  0x3f   : > { %v755_v47 = vcombine.low %v581_v35, %v582_v36  ;;  %v468_v61 = vmax.bf16 %v674_v56, %v451_v52  ;;  %v469_v62 = vmax.bf16 %v675_v57, %v452_v55  ;;  %v682_v63 = vld [vmem:[%s935_s23 + $0x58] sm:$0xf]  ;;  %v683_v0 = vld [vmem:[%s935_s23 + $0x5c] sm:$0xf]  ;;  %v517_v1 = vmax.bf16 %v696_v46, %v500_v53  ;;  %v712_v7 = vld [vmem:[%s935_s23 + $0xd0] sm:$0xf] }
  0x40   : > { %v518_v2 = vmax.bf16 %v697_v50, %v501_v54  ;;  %v690_v3 = vld [vmem:[%s935_s23 + $0x78] sm:$0xf]  ;;  %v691_v4 = vld [vmem:[%s935_s23 + $0x7c] sm:$0xf]  ;;  %v584_v6 = vmax.bf16 %v727_v43, %v567_v59  ;;  %v713_v8 = vld [vmem:[%s935_s23 + $0xd4] sm:$0xf] }
  0x41   : > { %739 = vst [vmem:[%s988_s28] sm:$0xff] %v755_v47   ;;  %v485_v9 = vmax.bf16 %v682_v63, %v468_v61  ;;  %v486_v10 = vmax.bf16 %v683_v0, %v469_v62  ;;  %v534_v11 = vmax.bf16 %v704_v51, %v517_v1  ;;  %v698_v13 = vld [vmem:[%s935_s23 + $0x98] sm:$0xf]  ;;  %v699_v14 = vld [vmem:[%s935_s23 + $0x9c] sm:$0xf]  ;;  %v720_v16 = vld [vmem:[%s935_s23 + $0xf0] sm:$0xf] }
  0x42   : > { %v535_v12 = vmax.bf16 %v705_v60, %v518_v2  ;;  %v756_v15 = vcombine.low %v583_v5, %v584_v6  ;;  %v721_v17 = vld [vmem:[%s935_s23 + $0xf4] sm:$0xf]  ;;  %v706_v22 = vld [vmem:[%s935_s23 + $0xb8] sm:$0xf]  ;;  %v707_v23 = vld [vmem:[%s935_s23 + $0xbc] sm:$0xf] }
  0x43   : > { %v502_v18 = vmax.bf16 %v690_v3, %v485_v9  ;;  %v503_v19 = vmax.bf16 %v691_v4, %v486_v10  ;;  %v551_v20 = vmax.bf16 %v712_v7, %v534_v11  ;;  %v728_v24 = vld [vmem:[%s935_s23 + $0x110] sm:$0xf]  ;;  %v729_v25 = vld [vmem:[%s935_s23 + $0x114] sm:$0xf]  ;;  %v714_v30 = vld [vmem:[%s935_s23 + $0xd8] sm:$0xf] }
  0x44   : > { %v552_v21 = vmax.bf16 %v713_v8, %v535_v12  ;;  %757 = vst [vmem:[%s988_s28 + $0x8] sm:$0xff] %v756_v15   ;;  %v715_v31 = vld [vmem:[%s935_s23 + $0xdc] sm:$0xf]  ;;  %v722_v36 = vld [vmem:[%s935_s23 + $0xf8] sm:$0xf] }
  0x45   : > { %v519_v26 = vmax.bf16 %v698_v13, %v502_v18  ;;  %v520_v27 = vmax.bf16 %v699_v14, %v503_v19  ;;  %v568_v28 = vmax.bf16 %v720_v16, %v551_v20  ;;  %v723_v37 = vld [vmem:[%s935_s23 + $0xfc] sm:$0xf]  ;;  %v730_v41 = vld [vmem:[%s935_s23 + $0x118] sm:$0xf] }
  0x46   : > { %v569_v29 = vmax.bf16 %v721_v17, %v552_v21  ;;  %v731_v42 = vld [vmem:[%s935_s23 + $0x11c] sm:$0xf] }
  0x47   : > { %v536_v32 = vmax.bf16 %v706_v22, %v519_v26  ;;  %v537_v33 = vmax.bf16 %v707_v23, %v520_v27  ;;  %v585_v34 = vmax.bf16 %v728_v24, %v568_v28 }
  0x48   : > { %v586_v35 = vmax.bf16 %v729_v25, %v569_v29 }
  0x49   : > { %v553_v38 = vmax.bf16 %v714_v30, %v536_v32  ;;  %v554_v39 = vmax.bf16 %v715_v31, %v537_v33 }
  0x4a   : > { %v758_v40 = vcombine.low %v585_v34, %v586_v35 }
  0x4b   : > { %v570_v43 = vmax.bf16 %v722_v36, %v553_v38  ;;  %v571_v44 = vmax.bf16 %v723_v37, %v554_v39 }
  0x4c   : > { %759 = vst [vmem:[%s988_s28 + $0x10] sm:$0xff] %v758_v40  }
  0x4d   : > { %v587_v45 = vmax.bf16 %v730_v41, %v570_v43  ;;  %v588_v46 = vmax.bf16 %v731_v42, %v571_v44 }
  0x4f   : > { %v760_v47 = vcombine.low %v587_v45, %v588_v46 }
  0x51   : > { %761 = vst [vmem:[%s988_s28 + $0x18] sm:$0xff] %v760_v47  }
  0x52 PF: > { %p8_p9 = scmp.ge.s32.totalorder %s839_s10, 4   ;;  %s1036_s6 = smov %s806_s7 }
  0x53   : > { %s1037_s7 = smov %s848_s13  ;;  %s1038_s8 = smov %s839_s10 }
  0x54   :  { %10 = sbr.rel (!%p8_p9) target bundleno = 2 (0x2), region = 108 }

// kernel: deeplabv3_fcn_forward.27
= control target key start
LH: loop header
LB: loop body
LE: loop exit
PB: predicated region body
PF: predicated region fallthrough
CT: control target
= control target key end

     0   :  { %s786_s12 = smov 0   ;;  %s788_s13 = smov 0   ;;  %s890_s0 = inlined_call_operand.vmem [shape: bf16[128,128], index: 0, kind: input, shape index: {}]   ;;  %s891_s1 = inlined_call_operand.vmem [shape: bf16[128,256], index: 1, kind: input, shape index: {}]   ;;  %s892_s2 = inlined_call_operand.vmem [shape: f32[1,256], index: 2, kind: input, shape index: {}]   ;;  %s893_s3 = inlined_call_operand.vmem [shape: bf16[128,256], index: 3, kind: output, shape index: {}]  }
   0x1   :  { %s790_s14 = smov 0  }
   0x2 LB: > { %s25_s15 = sadd.s32 1, %s759_s13  ;;  %p627_p0 = scmp.ge.s32.totalorder %s763_s14, 1  ;;  %s763_s14 = sphi %s790_s14, %s13_s14   ;;  %s759_s13 = sphi %s788_s13, %s895_s13   ;;  %s755_s12 = sphi %s786_s12, %s894_s12  }
   0x3   : > { %p27_p1 = scmp.ge.s32.totalorder %s25_s15, 2  ;;  %p173_p2 = scmp.lt.s32.totalorder %s763_s14, 3 }
   0x5   : > { %s897_s15 = smov (%p27_p1, %s25_s15), 0  ;;  %p174_p3 = pnand %p627_p0, %p173_p2 }
   0x6   : > { %v713_v0 = vld [vmem:[%s891_s1 + $0x4] ss:$8 sps:$4 sm:$0xff] (!%p174_p3)   ;;  %s628_s18 = sshll.u32 (!%p174_p3), %s755_s12, 3  ;;  %v715_v1 = vld [vmem:[%s891_s1] ss:$8 sps:$4 sm:$0xff] (!%p174_p3)   ;;  %v765_v2 = vmov (!%p174_p3), 0   ;;  %v267_v21 = vlaneseq (!%p174_p3) }
   0x7   : > { %177 = sbr.rel (%p174_p3) target bundleno = 268 (0x10c), region = 32  ;;  %413 = vmatprep.mubr.bf16.mxu0 (!%p174_p3), %v765_v2  ;;  %433 = vmatprep.mubr.bf16.mxu1 (!%p174_p3), %v765_v2  ;;  %p212_p4 = scmp.lt.s32.totalorder (!%p174_p3), %s628_s18, 15  ;;  %v716_v3 = vld [vmem:[%s891_s1 + $0x14] ss:$8 sps:$4 sm:$0xff] (!%p174_p3)   ;;  %v718_v4 = vld [vmem:[%s891_s1 + $0x10] ss:$8 sps:$4 sm:$0xff] (!%p174_p3)  }
   0x8   : > { %381 = vmatprep.subr.bf16.mxu0 (!%p174_p3), %v713_v0  ;;  %672 = vmatprep.subr.bf16.mxu1 (!%p174_p3), %v713_v0  ;;  %v719_v5 = vld [vmem:[%s891_s1 + $0x24] ss:$8 sps:$4 sm:$0xff] (!%p174_p3)   ;;  %v721_v6 = vld [vmem:[%s891_s1 + $0x20] ss:$8 sps:$4 sm:$0xff] (!%p174_p3)   ;;  %v722_v7 = vld [vmem:[%s891_s1 + $0x34] ss:$8 sps:$4 sm:$0xff] (!%p174_p3)  }
   0x9   : > { %382 = vmatpush1.bf16.msra.mxu0 (!%p174_p3), %v715_v1  ;;  %680 = vmatpush1.bf16.msra.mxu1 (!%p174_p3), %v715_v1  ;;  %v724_v8 = vld [vmem:[%s891_s1 + $0x30] ss:$8 sps:$4 sm:$0xff] (!%p174_p3)   ;;  %v725_v9 = vld [vmem:[%s891_s1 + $0x44] ss:$8 sps:$4 sm:$0xff] (!%p174_p3)   ;;  %v727_v10 = vld [vmem:[%s891_s1 + $0x40] ss:$8 sps:$4 sm:$0xff] (!%p174_p3)  }
   0xa   : > { %383 = vmatprep.subr.bf16.mxu0 (!%p174_p3), %v716_v3  ;;  %673 = vmatprep.subr.bf16.mxu1 (!%p174_p3), %v716_v3  ;;  %v728_v11 = vld [vmem:[%s891_s1 + $0x54] ss:$8 sps:$4 sm:$0xff] (!%p174_p3)   ;;  %v730_v12 = vld [vmem:[%s891_s1 + $0x50] ss:$8 sps:$4 sm:$0xff] (!%p174_p3)   ;;  %v731_v13 = vld [vmem:[%s891_s1 + $0x64] ss:$8 sps:$4 sm:$0xff] (!%p174_p3)  }
   0xb   : > { %v733_v14 = vld [vmem:[%s891_s1 + $0x60] ss:$8 sps:$4 sm:$0xff] (!%p174_p3)   ;;  %v734_v15 = vld [vmem:[%s891_s1 + $0x74] ss:$8 sps:$4 sm:$0xff] (!%p174_p3)   ;;  %v736_v16 = vld [vmem:[%s891_s1 + $0x70] ss:$8 sps:$4 sm:$0xff] (!%p174_p3)  }
   0xc   : > { %v268_v22 = vshrl.u32 (!%p174_p3), %v267_v21, 7  ;;  %v265_v24 = vld [vmem:[%s892_s2] sm:$0x3] (!%p174_p3) }
   0xd   : > { %384 = vmatpush1.bf16.msra.mxu0 (!%p174_p3), %v718_v4  ;;  %681 = vmatpush1.bf16.msra.mxu1 (!%p174_p3), %v718_v4 }
   0xe   : > { %s899_s18 = smov (!%p212_p4, %s628_s18), 15  ;;  %385 = vmatprep.subr.bf16.mxu0 %v719_v5  ;;  %674 = vmatprep.subr.bf16.mxu1 %v719_v5  ;;  %v269_v23 = vsub.s32 0, %v268_v22  ;;  %v273_v25 = vsub.s32 1, %v268_v22 }
   0xf   : > { %s629_s27 = sshll.u32 %s899_s18, 2  ;;  %s663_s5 = sshll.u32 %s899_s18, 3 }
  0x10   : > { %s831_s7 = scalar_lea.vmem %s890_s0, %s629_s27  ;;  %v270_v26 = vrot.slane %v265_v24, %v269_v23  ;;  %v274_v27 = vrot.slane %v265_v24, %v273_v25  ;;  %s871_s8 = scalar_lea.vmem %s893_s3, %s663_s5 }
  0x11   : > { %386 = vmatpush1.bf16.msra.mxu0 %v721_v6  ;;  %682 = vmatpush1.bf16.msra.mxu1 %v721_v6  ;;  %v737_v17 = vld [vmem:[%s831_s7] sm:$0xff]   ;;  %v738_v18 = vld [vmem:[%s831_s7 + $0x10] sm:$0xff]   ;;  %v739_v19 = vld [vmem:[%s831_s7 + $0x8] sm:$0xff]  }
  0x12   : > { %387 = vmatprep.subr.bf16.mxu0 %v722_v7  ;;  %675 = vmatprep.subr.bf16.mxu1 %v722_v7  ;;  %v740_v20 = vld [vmem:[%s831_s7 + $0x18] sm:$0xff]  }
  0x15   : > { %388 = vmatpush1.bf16.msra.mxu0 %v724_v8  ;;  %683 = vmatpush1.bf16.msra.mxu1 %v724_v8 }
  0x16   : > { %389 = vmatprep.subr.bf16.mxu0 %v725_v9  ;;  %676 = vmatprep.subr.bf16.mxu1 %v725_v9 }
  0x19   : > { %390 = vmatpush1.bf16.msra.mxu0 %v727_v10  ;;  %684 = vmatpush1.bf16.msra.mxu1 %v727_v10 }
  0x1a   : > { %391 = vmatprep.subr.bf16.mxu0 %v728_v11  ;;  %677 = vmatprep.subr.bf16.mxu1 %v728_v11 }
  0x1d   : > { %392 = vmatpush1.bf16.msra.mxu0 %v730_v12  ;;  %685 = vmatpush1.bf16.msra.mxu1 %v730_v12 }
  0x1e   : > { %393 = vmatprep.subr.bf16.mxu0 %v731_v13  ;;  %678 = vmatprep.subr.bf16.mxu1 %v731_v13 }
  0x21   : > { %394 = vmatpush1.bf16.msra.mxu0 %v733_v14  ;;  %686 = vmatpush1.bf16.msra.mxu1 %v733_v14 }
  0x22   : > { %395 = vmatprep.subr.bf16.mxu0 %v734_v15  ;;  %679 = vmatprep.subr.bf16.mxu1 %v734_v15 }
  0x25   : > { %396 = vmatpush1.bf16.msra.mxu0 %v736_v16  ;;  %687 = vmatpush1.bf16.msra.mxu1 %v736_v16 }
  0x28   : > { %414 = vmatmul.mubr.bf16.vlgmr.msra.gmra.mrb[0].mxu0 %v737_v17  ;;  %434 = vmatmul.mubr.bf16.vlgmr.msra.gmra.mrb[0].mxu1 %v738_v18 }
  0x29   : > { %423 = vmatprep.mubr.bf16.mxu0 %v765_v2  ;;  %443 = vmatprep.mubr.bf16.mxu1 %v765_v2 }
  0x30   : > { %424 = vmatmul.mubr.bf16.gmra.mrb[4].mxu0 %v739_v19  ;;  %444 = vmatmul.mubr.bf16.gmra.mrb[4].mxu1 %v740_v20 }
  0xfb   : > { %v415_v28 = vpop.f32.mrb[0].mxu0  ;;  %v435_v29 = vpop.f32.mrb[0].mxu1 }
  0xfc   : > { %v416_v30 = vadd.f32 %v415_v28, %v270_v26  ;;  %v436_v31 = vadd.f32 %v435_v29, %v270_v26  ;;  %v417_v32 = vpop.f32.mrb[1].mxu0  ;;  %v437_v33 = vpop.f32.mrb[1].mxu1 }
  0xfd   : > { %v418_v34 = vadd.f32 %v417_v32, %v274_v27  ;;  %v438_v35 = vadd.f32 %v437_v33, %v274_v27  ;;  %v419_v36 = vpop.f32.mrb[2].mxu0  ;;  %v439_v37 = vpop.f32.mrb[2].mxu1 }
  0xfe   : > { %v420_v38 = vadd.f32 %v419_v36, %v270_v26  ;;  %v440_v39 = vadd.f32 %v439_v37, %v270_v26  ;;  %v421_v40 = vpop.f32.mrb[3].mxu0  ;;  %v441_v41 = vpop.f32.mrb[3].mxu1 }
  0xff   : > { %v664_v42 = vpack.c.bf16 %v418_v34, %v416_v30  ;;  %v668_v43 = vpack.c.bf16 %v438_v35, %v436_v31  ;;  %v422_v44 = vadd.f32 %v421_v40, %v274_v27  ;;  %v442_v45 = vadd.f32 %v441_v41, %v274_v27 }
 0x101   : > { %502 = vst [vmem:[%s871_s8] sm:$0xff] %v664_v42  ;;  %506 = vst [vmem:[%s871_s8 + $0x20] sm:$0xff] %v668_v43  ;;  %v665_v46 = vpack.c.bf16 %v422_v44, %v420_v38  ;;  %v669_v47 = vpack.c.bf16 %v442_v45, %v440_v39 }
 0x103   : > { %503 = vst [vmem:[%s871_s8 + $0x8] sm:$0xff] %v665_v46  ;;  %507 = vst [vmem:[%s871_s8 + $0x28] sm:$0xff] %v669_v47  ;;  %v425_v48 = vpop.f32.mrb[4].mxu0  ;;  %v445_v49 = vpop.f32.mrb[4].mxu1 }
 0x104   : > { %v426_v50 = vadd.f32 %v425_v48, %v270_v26  ;;  %v446_v51 = vadd.f32 %v445_v49, %v270_v26  ;;  %v427_v52 = vpop.f32.mrb[5].mxu0  ;;  %v447_v53 = vpop.f32.mrb[5].mxu1 }
 0x105   : > { %v428_v54 = vadd.f32 %v427_v52, %v274_v27  ;;  %v448_v55 = vadd.f32 %v447_v53, %v274_v27  ;;  %v429_v56 = vpop.f32.mrb[6].mxu0  ;;  %v449_v57 = vpop.f32.mrb[6].mxu1 }
 0x106   : > { %v430_v58 = vadd.f32 %v429_v56, %v270_v26  ;;  %v450_v59 = vadd.f32 %v449_v57, %v270_v26  ;;  %v431_v60 = vpop.f32.mrb[7].mxu0  ;;  %v451_v61 = vpop.f32.mrb[7].mxu1 }
 0x107   : > { %v666_v62 = vpack.c.bf16 %v428_v54, %v426_v50  ;;  %v670_v63 = vpack.c.bf16 %v448_v55, %v446_v51  ;;  %v432_v0 = vadd.f32 %v431_v60, %v274_v27  ;;  %v452_v1 = vadd.f32 %v451_v61, %v274_v27 }
 0x109   : > { %504 = vst [vmem:[%s871_s8 + $0x10] sm:$0xff] %v666_v62  ;;  %508 = vst [vmem:[%s871_s8 + $0x30] sm:$0xff] %v670_v63  ;;  %v667_v2 = vpack.c.bf16 %v432_v0, %v430_v58  ;;  %v671_v3 = vpack.c.bf16 %v452_v1, %v450_v59 }
 0x10b   : > { %505 = vst [vmem:[%s871_s8 + $0x18] sm:$0xff] %v667_v2  ;;  %509 = vst [vmem:[%s871_s8 + $0x38] sm:$0xff] %v671_v3 }
 0x10c PF: > { %s13_s14 = sadd.s32 1, %s763_s14   ;;  %s894_s12 = smov %s759_s13 }
 0x10d   : > { %p10_p5 = scmp.ge.s32.totalorder %s13_s14, 4   ;;  %s895_s13 = smov %s897_s15 }
 0x10f   :  { %12 = sbr.rel (!%p10_p5) target bundleno = 2 (0x2), region = 68 }

// kernel: deeplabv3_fcn_forward.31
= control target key start
LH: loop header
LB: loop body
LE: loop exit
PB: predicated region body
PF: predicated region fallthrough
CT: control target
= control target key end

     0   :  { %s741_s12 = smov 0   ;;  %s743_s13 = smov 0   ;;  %s814_s0 = inlined_call_operand.vmem [shape: bf16[128,128], index: 0, kind: input, shape index: {}]   ;;  %s815_s1 = inlined_call_operand.vmem [shape: bf16[128,128], index: 1, kind: input, shape index: {}]   ;;  %s816_s2 = inlined_call_operand.vmem [shape: f32[1,128], index: 2, kind: input, shape index: {}]   ;;  %s817_s3 = inlined_call_operand.vmem [shape: bf16[128,128], index: 3, kind: output, shape index: {}]  }
   0x1   :  { %s745_s14 = smov 0  }
   0x2 LB: > { %s25_s15 = sadd.s32 1, %s715_s13  ;;  %p550_p0 = scmp.ge.s32.totalorder %s719_s14, 1  ;;  %s719_s14 = sphi %s745_s14, %s13_s14   ;;  %s715_s13 = sphi %s743_s13, %s819_s13   ;;  %s711_s12 = sphi %s741_s12, %s818_s12  }
   0x3   : > { %p27_p1 = scmp.ge.s32.totalorder %s25_s15, 2  ;;  %p169_p2 = scmp.lt.s32.totalorder %s719_s14, 3 }
   0x5   : > { %s821_s15 = smov (%p27_p1, %s25_s15), 0  ;;  %p170_p3 = pnand %p550_p0, %p169_p2 }
   0x6   : > { %v685_v0 = vld [vmem:[%s815_s1] sm:$0xff] (!%p170_p3)   ;;  %s551_s18 = sshll.u32 (!%p170_p3), %s711_s12, 3  ;;  %v686_v1 = vld [vmem:[%s815_s1 + $0x8] sm:$0xff] (!%p170_p3)   ;;  %v687_v2 = vld [vmem:[%s815_s1 + $0x10] sm:$0xff] (!%p170_p3)  }
   0x7   : > { %173 = sbr.rel (%p170_p3) target bundleno = 261 (0x105), region = 32  ;;  %p204_p4 = scmp.lt.s32.totalorder (!%p170_p3), %s551_s18, 15  ;;  %621 = vmatprep.subr.bf16.mxu0 (!%p170_p3), %v685_v0  ;;  %645 = vmatprep.subr.bf16.mxu1 (!%p170_p3), %v685_v0  ;;  %v688_v3 = vld [vmem:[%s815_s1 + $0x18] sm:$0xff] (!%p170_p3)   ;;  %v689_v6 = vld [vmem:[%s815_s1 + $0x20] sm:$0xff] (!%p170_p3)   ;;  %v690_v7 = vld [vmem:[%s815_s1 + $0x28] sm:$0xff] (!%p170_p3)  }
   0x8   : > { %622 = vmatpush3.bf16.msra.mxu0 (!%p170_p3), %v685_v0  ;;  %653 = vmatpush3.bf16.msra.mxu1 (!%p170_p3), %v685_v0  ;;  %v691_v8 = vld [vmem:[%s815_s1 + $0x30] sm:$0xff] (!%p170_p3)   ;;  %v692_v9 = vld [vmem:[%s815_s1 + $0x38] sm:$0xff] (!%p170_p3)   ;;  %v555_v12 = vld [vmem:[%s816_s2] ss:$0 sm:$0xff] (!%p170_p3) }
   0x9   : > { %623 = vmatprep.subr.bf16.mxu0 (!%p170_p3), %v686_v1  ;;  %646 = vmatprep.subr.bf16.mxu1 (!%p170_p3), %v686_v1 }
   0xc   : > { %624 = vmatpush3.bf16.msra.mxu0 (!%p170_p3), %v686_v1  ;;  %654 = vmatpush3.bf16.msra.mxu1 (!%p170_p3), %v686_v1 }
   0xd   : > { %625 = vmatprep.subr.bf16.mxu0 (!%p170_p3), %v687_v2  ;;  %647 = vmatprep.subr.bf16.mxu1 (!%p170_p3), %v687_v2 }
   0xe   : > { %s823_s18 = smov (!%p204_p4, %s551_s18), 15 }
   0xf   : > { %s552_s23 = sshll.u32 %s823_s18, 2 }
  0x10   : > { %s776_s26 = scalar_lea.vmem %s814_s0, %s552_s23  ;;  %626 = vmatpush3.bf16.msra.mxu0 %v687_v2  ;;  %655 = vmatpush3.bf16.msra.mxu1 %v687_v2  ;;  %s223_s17 = scalar_lea.vmem %s817_s3, %s552_s23 }
  0x11   : > { %v693_v4 = vld [vmem:[%s776_s26] sm:$0xff]   ;;  %v694_v5 = vld [vmem:[%s776_s26 + $0x10] sm:$0xff]   ;;  %627 = vmatprep.subr.bf16.mxu0 %v688_v3  ;;  %648 = vmatprep.subr.bf16.mxu1 %v688_v3  ;;  %v695_v10 = vld [vmem:[%s776_s26 + $0x8] sm:$0xff]  }
  0x12   : > { %637 = vmatprep.mubr.bf16.mxu0 %v693_v4  ;;  %641 = vmatprep.mubr.bf16.mxu1 %v694_v5  ;;  %v696_v11 = vld [vmem:[%s776_s26 + $0x18] sm:$0xff]  }
  0x14   : > { %628 = vmatpush3.bf16.msra.mxu0 %v688_v3  ;;  %656 = vmatpush3.bf16.msra.mxu1 %v688_v3 }
  0x15   : > { %629 = vmatprep.subr.bf16.mxu0 %v689_v6  ;;  %649 = vmatprep.subr.bf16.mxu1 %v689_v6 }
  0x18   : > { %630 = vmatpush3.bf16.msra.mxu0 %v689_v6  ;;  %657 = vmatpush3.bf16.msra.mxu1 %v689_v6 }
  0x19   : > { %631 = vmatprep.subr.bf16.mxu0 %v690_v7  ;;  %650 = vmatprep.subr.bf16.mxu1 %v690_v7 }
  0x1c   : > { %632 = vmatpush3.bf16.msra.mxu0 %v690_v7  ;;  %658 = vmatpush3.bf16.msra.mxu1 %v690_v7 }
  0x1d   : > { %633 = vmatprep.subr.bf16.mxu0 %v691_v8  ;;  %651 = vmatprep.subr.bf16.mxu1 %v691_v8 }
  0x20   : > { %634 = vmatpush3.bf16.msra.mxu0 %v691_v8  ;;  %659 = vmatpush3.bf16.msra.mxu1 %v691_v8 }
  0x21   : > { %635 = vmatprep.subr.bf16.mxu0 %v692_v9  ;;  %652 = vmatprep.subr.bf16.mxu1 %v692_v9 }
  0x24   : > { %636 = vmatpush3.bf16.msra.mxu0 %v692_v9  ;;  %660 = vmatpush3.bf16.msra.mxu1 %v692_v9 }
  0x27   : > { %638 = vmatmul.mubr.bf16.vlgmr.msra.gmra.mrb[0].mxu0 %v695_v10  ;;  %642 = vmatmul.mubr.bf16.vlgmr.msra.gmra.mrb[0].mxu1 %v696_v11 }
  0xfa   : > { %v639_v13 = vpop.f32.mrb[0].mxu0  ;;  %v643_v14 = vpop.f32.mrb[0].mxu1 }
  0xfb   : > { %v372_v15 = vadd.f32 %v639_v13, %v555_v12  ;;  %v388_v16 = vadd.f32 %v643_v14, %v555_v12  ;;  %v363_v17 = vpop.f32.mrb[1].mxu0  ;;  %v379_v18 = vpop.f32.mrb[1].mxu1 }
  0xfc   : > { %v364_v19 = vadd.f32 %v555_v12, %v363_v17  ;;  %v380_v20 = vadd.f32 %v555_v12, %v379_v18  ;;  %v640_v21 = vpop.f32.mrb[2].mxu0  ;;  %v644_v22 = vpop.f32.mrb[2].mxu1 }
  0xfd   : > { %v375_v23 = vadd.f32 %v640_v21, %v555_v12  ;;  %v391_v24 = vadd.f32 %v644_v22, %v555_v12  ;;  %v366_v25 = vpop.f32.mrb[3].mxu0  ;;  %v382_v26 = vpop.f32.mrb[3].mxu1  ;;  %v396_v29 = vmax.f32 %v372_v15, 0.0  ;;  %v400_v30 = vmax.f32 %v388_v16, 0.0 }
  0xfe   : > { %v367_v27 = vadd.f32 %v555_v12, %v366_v25  ;;  %v383_v28 = vadd.f32 %v555_v12, %v382_v26  ;;  %v394_v33 = vmax.f32 %v364_v19, 0.0  ;;  %v398_v34 = vmax.f32 %v380_v20, 0.0 }
  0xff   : > { %v397_v31 = vmax.f32 %v375_v23, 0.0  ;;  %v401_v32 = vmax.f32 %v391_v24, 0.0 }
 0x100   : > { %v395_v35 = vmax.f32 %v367_v27, 0.0  ;;  %v399_v36 = vmax.f32 %v383_v28, 0.0 }
 0x101   : > { %v594_v37 = vpack.c.bf16 %v397_v31, %v396_v29  ;;  %v604_v38 = vpack.c.bf16 %v401_v32, %v400_v30 }
 0x102   : > { %v589_v39 = vpack.c.bf16 %v395_v35, %v394_v33  ;;  %v599_v40 = vpack.c.bf16 %v399_v36, %v398_v34 }
 0x103   : > { %606 = vst [vmem:[%s223_s17 + $0x8] sm:$0xff] %v594_v37   ;;  %608 = vst [vmem:[%s223_s17 + $0x18] sm:$0xff] %v604_v38  }
 0x104   : > { %590 = vst [vmem:[%s223_s17] sm:$0xff] %v589_v39   ;;  %607 = vst [vmem:[%s223_s17 + $0x10] sm:$0xff] %v599_v40  }
 0x105 PF: > { %s13_s14 = sadd.s32 1, %s719_s14   ;;  %s818_s12 = smov %s715_s13 }
 0x106   : > { %p10_p5 = scmp.ge.s32.totalorder %s13_s14, 4   ;;  %s819_s13 = smov %s821_s15 }
 0x108   :  { %12 = sbr.rel (!%p10_p5) target bundleno = 2 (0x2), region = 68 }

// kernel: deeplabv3_fcn_forward.29
= control target key start
LH: loop header
LB: loop body
LE: loop exit
PB: predicated region body
PF: predicated region fallthrough
CT: control target
= control target key end

     0   :  { %s866_s15 = smov 0   ;;  %s868_s16 = smov 0   ;;  %s940_s0 = inlined_call_operand.vmem [shape: bf16[128,128], index: 0, kind: input, shape index: {}]   ;;  %s941_s1 = inlined_call_operand.vmem [shape: bf16[128,128], index: 1, kind: input, shape index: {}]   ;;  %s942_s2 = inlined_call_operand.vmem [shape: f32[1,128], index: 2, kind: input, shape index: {}]   ;;  %s943_s3 = inlined_call_operand.vmem [shape: bf16[128,128], index: 3, kind: input, shape index: {}]   ;;  %s944_s4 = inlined_call_operand.vmem [shape: bf16[128,128], index: 4, kind: output, shape index: {}]  }
   0x1   :  { %s870_s17 = smov 0  }
   0x2 LB: > { %s26_s18 = sadd.s32 1, %s835_s16  ;;  %p649_p0 = scmp.ge.s32.totalorder %s839_s17, 1  ;;  %s839_s17 = sphi %s870_s17, %s14_s17   ;;  %s835_s16 = sphi %s868_s16, %s946_s16   ;;  %s831_s15 = sphi %s866_s15, %s945_s15  }
   0x3   : > { %p28_p1 = scmp.ge.s32.totalorder %s26_s18, 2  ;;  %p210_p2 = scmp.lt.s32.totalorder %s839_s17, 3 }
   0x5   : > { %s948_s18 = smov (%p28_p1, %s26_s18), 0  ;;  %p211_p3 = pnand %p649_p0, %p210_p2 }
   0x6   : > { %v805_v0 = vld [vmem:[%s941_s1] sm:$0xff] (!%p211_p3)   ;;  %s650_s21 = sshll.u32 (!%p211_p3), %s831_s15, 3  ;;  %v806_v1 = vld [vmem:[%s941_s1 + $0x8] sm:$0xff] (!%p211_p3)   ;;  %v807_v2 = vld [vmem:[%s941_s1 + $0x10] sm:$0xff] (!%p211_p3)  }
   0x7   : > { %214 = sbr.rel (%p211_p3) target bundleno = 263 (0x107), region = 36  ;;  %p255_p4 = scmp.lt.s32.totalorder (!%p211_p3), %s650_s21, 15  ;;  %741 = vmatprep.subr.bf16.mxu0 (!%p211_p3), %v805_v0  ;;  %765 = vmatprep.subr.bf16.mxu1 (!%p211_p3), %v805_v0  ;;  %v808_v3 = vld [vmem:[%s941_s1 + $0x18] sm:$0xff] (!%p211_p3)   ;;  %v809_v6 = vld [vmem:[%s941_s1 + $0x20] sm:$0xff] (!%p211_p3)   ;;  %v810_v7 = vld [vmem:[%s941_s1 + $0x28] sm:$0xff] (!%p211_p3)  }
   0x8   : > { %742 = vmatpush3.bf16.msra.mxu0 (!%p211_p3), %v805_v0  ;;  %773 = vmatpush3.bf16.msra.mxu1 (!%p211_p3), %v805_v0  ;;  %v811_v8 = vld [vmem:[%s941_s1 + $0x30] sm:$0xff] (!%p211_p3)   ;;  %v812_v9 = vld [vmem:[%s941_s1 + $0x38] sm:$0xff] (!%p211_p3)   ;;  %v656_v16 = vld [vmem:[%s942_s2] ss:$0 sm:$0xff] (!%p211_p3) }
   0x9   : > { %743 = vmatprep.subr.bf16.mxu0 (!%p211_p3), %v806_v1  ;;  %766 = vmatprep.subr.bf16.mxu1 (!%p211_p3), %v806_v1 }
   0xc   : > { %744 = vmatpush3.bf16.msra.mxu0 (!%p211_p3), %v806_v1  ;;  %774 = vmatpush3.bf16.msra.mxu1 (!%p211_p3), %v806_v1 }
   0xd   : > { %745 = vmatprep.subr.bf16.mxu0 (!%p211_p3), %v807_v2  ;;  %767 = vmatprep.subr.bf16.mxu1 (!%p211_p3), %v807_v2 }
   0xe   : > { %s950_s21 = smov (!%p255_p4, %s650_s21), 15 }
   0xf   : > { %s893_s26 = sshll.u32 %s950_s21, 2 }
  0x10   : > { %s899_s29 = scalar_lea.vmem %s940_s0, %s893_s26  ;;  %746 = vmatpush3.bf16.msra.mxu0 %v807_v2  ;;  %775 = vmatpush3.bf16.msra.mxu1 %v807_v2  ;;  %s274_s19 = scalar_lea.vmem %s943_s3, %s893_s26 }
  0x11   : > { %v813_v4 = vld [vmem:[%s899_s29] sm:$0xff]   ;;  %v814_v5 = vld [vmem:[%s899_s29 + $0x10] sm:$0xff]   ;;  %747 = vmatprep.subr.bf16.mxu0 %v808_v3  ;;  %768 = vmatprep.subr.bf16.mxu1 %v808_v3  ;;  %v815_v10 = vld [vmem:[%s899_s29 + $0x8] sm:$0xff]   ;;  %s283_s24 = scalar_lea.vmem %s944_s4, %s893_s26 }
  0x12   : > { %757 = vmatprep.mubr.bf16.mxu0 %v813_v4  ;;  %761 = vmatprep.mubr.bf16.mxu1 %v814_v5  ;;  %v816_v11 = vld [vmem:[%s899_s29 + $0x18] sm:$0xff]   ;;  %v723_v12 = vld [vmem:[%s274_s19 + $0x8] sm:$0xff]   ;;  %v688_v14 = vld [vmem:[%s274_s19] sm:$0xff]  }
  0x13   : > { %v725_v13 = vld [vmem:[%s274_s19 + $0x18] sm:$0xff]   ;;  %v724_v15 = vld [vmem:[%s274_s19 + $0x10] sm:$0xff]   ;;  %v693_v17 = vunpack.c.l.bf16 %v723_v12  ;;  %v689_v21 = vunpack.c.l.bf16 %v688_v14  ;;  %v694_v27 = vunpack.c.h.bf16 %v723_v12  ;;  %v690_v33 = vunpack.c.h.bf16 %v688_v14 }
  0x14   : > { %748 = vmatpush3.bf16.msra.mxu0 %v808_v3  ;;  %776 = vmatpush3.bf16.msra.mxu1 %v808_v3  ;;  %v701_v18 = vunpack.c.l.bf16 %v725_v13  ;;  %v697_v22 = vunpack.c.l.bf16 %v724_v15  ;;  %v702_v28 = vunpack.c.h.bf16 %v725_v13  ;;  %v698_v34 = vunpack.c.h.bf16 %v724_v15 }
  0x15   : > { %749 = vmatprep.subr.bf16.mxu0 %v809_v6  ;;  %769 = vmatprep.subr.bf16.mxu1 %v809_v6 }
  0x18   : > { %750 = vmatpush3.bf16.msra.mxu0 %v809_v6  ;;  %777 = vmatpush3.bf16.msra.mxu1 %v809_v6 }
  0x19   : > { %751 = vmatprep.subr.bf16.mxu0 %v810_v7  ;;  %770 = vmatprep.subr.bf16.mxu1 %v810_v7 }
  0x1c   : > { %752 = vmatpush3.bf16.msra.mxu0 %v810_v7  ;;  %778 = vmatpush3.bf16.msra.mxu1 %v810_v7 }
  0x1d   : > { %753 = vmatprep.subr.bf16.mxu0 %v811_v8  ;;  %771 = vmatprep.subr.bf16.mxu1 %v811_v8 }
  0x20   : > { %754 = vmatpush3.bf16.msra.mxu0 %v811_v8  ;;  %779 = vmatpush3.bf16.msra.mxu1 %v811_v8 }
  0x21   : > { %755 = vmatprep.subr.bf16.mxu0 %v812_v9  ;;  %772 = vmatprep.subr.bf16.mxu1 %v812_v9 }
  0x24   : > { %756 = vmatpush3.bf16.msra.mxu0 %v812_v9  ;;  %780 = vmatpush3.bf16.msra.mxu1 %v812_v9 }
  0x27   : > { %758 = vmatmul.mubr.bf16.vlgmr.msra.gmra.mrb[0].mxu0 %v815_v10  ;;  %762 = vmatmul.mubr.bf16.vlgmr.msra.gmra.mrb[0].mxu1 %v816_v11 }
  0xfa   : > { %v759_v19 = vpop.f32.mrb[0].mxu0  ;;  %v763_v20 = vpop.f32.mrb[0].mxu1 }
  0xfb   : > { %v432_v23 = vadd.f32 %v759_v19, %v656_v16  ;;  %v448_v24 = vadd.f32 %v763_v20, %v656_v16  ;;  %v423_v25 = vpop.f32.mrb[1].mxu0  ;;  %v439_v26 = vpop.f32.mrb[1].mxu1 }
  0xfc   : > { %v424_v29 = vadd.f32 %v656_v16, %v423_v25  ;;  %v440_v30 = vadd.f32 %v656_v16, %v439_v26  ;;  %v760_v31 = vpop.f32.mrb[2].mxu0  ;;  %v764_v32 = vpop.f32.mrb[2].mxu1 }
  0xfd   : > { %v472_v35 = vadd.f32 %v693_v17, %v432_v23  ;;  %v476_v36 = vadd.f32 %v701_v18, %v448_v24  ;;  %v435_v37 = vadd.f32 %v760_v31, %v656_v16  ;;  %v451_v38 = vadd.f32 %v764_v32, %v656_v16  ;;  %v426_v39 = vpop.f32.mrb[3].mxu0  ;;  %v442_v40 = vpop.f32.mrb[3].mxu1 }
  0xfe   : > { %v470_v41 = vadd.f32 %v689_v21, %v424_v29  ;;  %v474_v42 = vadd.f32 %v697_v22, %v440_v30  ;;  %v427_v43 = vadd.f32 %v656_v16, %v426_v39  ;;  %v443_v44 = vadd.f32 %v656_v16, %v442_v40 }
  0xff   : > { %v473_v45 = vadd.f32 %v694_v27, %v435_v37  ;;  %v477_v46 = vadd.f32 %v702_v28, %v451_v38  ;;  %v480_v49 = vmax.f32 %v472_v35, 0.0  ;;  %v484_v50 = vmax.f32 %v476_v36, 0.0 }
 0x100   : > { %v471_v47 = vadd.f32 %v690_v33, %v427_v43  ;;  %v475_v48 = vadd.f32 %v698_v34, %v443_v44  ;;  %v478_v53 = vmax.f32 %v470_v41, 0.0  ;;  %v482_v54 = vmax.f32 %v474_v42, 0.0 }
 0x101   : > { %v481_v51 = vmax.f32 %v473_v45, 0.0  ;;  %v485_v52 = vmax.f32 %v477_v46, 0.0 }
 0x102   : > { %v479_v55 = vmax.f32 %v471_v47, 0.0  ;;  %v483_v56 = vmax.f32 %v475_v48, 0.0 }
 0x103   : > { %v711_v57 = vpack.c.bf16 %v481_v51, %v480_v49  ;;  %v721_v58 = vpack.c.bf16 %v485_v52, %v484_v50 }
 0x104   : > { %v706_v59 = vpack.c.bf16 %v479_v55, %v478_v53  ;;  %v716_v60 = vpack.c.bf16 %v483_v56, %v482_v54 }
 0x105   : > { %726 = vst [vmem:[%s283_s24 + $0x8] sm:$0xff] %v711_v57   ;;  %728 = vst [vmem:[%s283_s24 + $0x18] sm:$0xff] %v721_v58  }
 0x106   : > { %707 = vst [vmem:[%s283_s24] sm:$0xff] %v706_v59   ;;  %727 = vst [vmem:[%s283_s24 + $0x10] sm:$0xff] %v716_v60  }
 0x107 PF: > { %s14_s17 = sadd.s32 1, %s839_s17   ;;  %s945_s15 = smov %s835_s16 }
 0x108   : > { %p11_p5 = scmp.ge.s32.totalorder %s14_s17, 4   ;;  %s946_s16 = smov %s948_s18 }
 0x10a   :  { %13 = sbr.rel (!%p11_p5) target bundleno = 2 (0x2), region = 75 }

// kernel: deeplabv3_fcn_forward.28
= control target key start
LH: loop header
LB: loop body
LE: loop exit
PB: predicated region body
PF: predicated region fallthrough
CT: control target
= control target key end

     0   :  { %s2067_s12 = smov 0   ;;  %s2069_s13 = smov 0   ;;  %s2408_s0 = inlined_call_operand.vmem [shape: bf16[128,1152], index: 0, kind: input, shape index: {}]   ;;  %s2409_s1 = inlined_call_operand.vmem [shape: bf16[1152,128], index: 1, kind: input, shape index: {}]   ;;  %s2410_s2 = inlined_call_operand.vmem [shape: f32[1,128], index: 2, kind: input, shape index: {}]   ;;  %s2411_s3 = inlined_call_operand.vmem [shape: bf16[128,128], index: 3, kind: output, shape index: {}]  }
   0x1   :  { %s2071_s14 = smov 0  }
   0x2 LB: > { %s25_s15 = sadd.s32 1, %s2040_s13  ;;  %p1557_p0 = scmp.ge.s32.totalorder %s2044_s14, 1  ;;  %s2044_s14 = sphi %s2071_s14, %s13_s14   ;;  %s2040_s13 = sphi %s2069_s13, %s2413_s13   ;;  %s2036_s12 = sphi %s2067_s12, %s2412_s12  }
   0x3   : > { %p27_p1 = scmp.ge.s32.totalorder %s25_s15, 2  ;;  %p170_p2 = scmp.lt.s32.totalorder %s2044_s14, 3 }
   0x5   : > { %s2415_s15 = smov (%p27_p1, %s25_s15), 0  ;;  %p171_p3 = pnand %p1557_p0, %p170_p2 }
   0x6   : > { %v1950_v0 = vld [vmem:[%s2409_s1 + $0x40] sm:$0xff] (!%p171_p3)   ;;  %v1954_v4 = vld [vmem:[%s2409_s1 + $0x48] sm:$0xff] (!%p171_p3)   ;;  %v1958_v8 = vld [vmem:[%s2409_s1 + $0x50] sm:$0xff] (!%p171_p3)   ;;  %s1558_s23 = sshll.u32 (!%p171_p3), %s2036_s12, 3  ;;  %v2046_v35 = vmov (!%p171_p3), 0  }
   0x7   : > { %174 = sbr.rel (%p171_p3) target bundleno = 327 (0x147), region = 32  ;;  %v1951_v1 = vld [vmem:[%s2409_s1 + $0xc0] sm:$0xff] (!%p171_p3)   ;;  %1712 = vmatprep.subr.bf16.mxu0 (!%p171_p3), %v1950_v0  ;;  %v1955_v5 = vld [vmem:[%s2409_s1 + $0xc8] sm:$0xff] (!%p171_p3)   ;;  %v1959_v9 = vld [vmem:[%s2409_s1 + $0xd0] sm:$0xff] (!%p171_p3)   ;;  %p206_p4 = scmp.lt.s32.totalorder (!%p171_p3), %s1558_s23, 15 }
   0x8   : > { %v1952_v2 = vld [vmem:[%s2409_s1] sm:$0xff] (!%p171_p3)   ;;  %1752 = vmatprep.subr.bf16.mxu1 (!%p171_p3), %v1951_v1  ;;  %v1956_v6 = vld [vmem:[%s2409_s1 + $0x8] sm:$0xff] (!%p171_p3)   ;;  %v1960_v10 = vld [vmem:[%s2409_s1 + $0x10] sm:$0xff] (!%p171_p3)  }
   0x9   : > { %v1953_v3 = vld [vmem:[%s2409_s1 + $0x80] sm:$0xff] (!%p171_p3)   ;;  %1713 = vmatpush3.bf16.msra.mxu0 (!%p171_p3), %v1952_v2  ;;  %v1957_v7 = vld [vmem:[%s2409_s1 + $0x88] sm:$0xff] (!%p171_p3)   ;;  %v1961_v11 = vld [vmem:[%s2409_s1 + $0x90] sm:$0xff] (!%p171_p3)  }
   0xa   : > { %1753 = vmatpush3.bf16.msra.mxu1 (!%p171_p3), %v1953_v3  ;;  %1714 = vmatprep.subr.bf16.mxu0 (!%p171_p3), %v1954_v4  ;;  %v1962_v12 = vld [vmem:[%s2409_s1 + $0x58] sm:$0xff] (!%p171_p3)   ;;  %v1966_v16 = vld [vmem:[%s2409_s1 + $0x60] sm:$0xff] (!%p171_p3)   ;;  %v1970_v20 = vld [vmem:[%s2409_s1 + $0x68] sm:$0xff] (!%p171_p3)  }
   0xb   : > { %1754 = vmatprep.subr.bf16.mxu1 (!%p171_p3), %v1955_v5  ;;  %v1963_v13 = vld [vmem:[%s2409_s1 + $0xd8] sm:$0xff] (!%p171_p3)   ;;  %v1967_v17 = vld [vmem:[%s2409_s1 + $0xe0] sm:$0xff] (!%p171_p3)   ;;  %v1971_v21 = vld [vmem:[%s2409_s1 + $0xe8] sm:$0xff] (!%p171_p3)  }
   0xc   : > { %v1964_v14 = vld [vmem:[%s2409_s1 + $0x18] sm:$0xff] (!%p171_p3)   ;;  %v1968_v18 = vld [vmem:[%s2409_s1 + $0x20] sm:$0xff] (!%p171_p3)   ;;  %v1972_v22 = vld [vmem:[%s2409_s1 + $0x28] sm:$0xff] (!%p171_p3)  }
   0xd   : > { %1715 = vmatpush3.bf16.msra.mxu0 (!%p171_p3), %v1956_v6  ;;  %v1965_v15 = vld [vmem:[%s2409_s1 + $0x98] sm:$0xff] (!%p171_p3)   ;;  %v1969_v19 = vld [vmem:[%s2409_s1 + $0xa0] sm:$0xff] (!%p171_p3)   ;;  %v1973_v23 = vld [vmem:[%s2409_s1 + $0xa8] sm:$0xff] (!%p171_p3)  }
   0xe   : > { %1755 = vmatpush3.bf16.msra.mxu1 %v1957_v7  ;;  %1716 = vmatprep.subr.bf16.mxu0 %v1958_v8  ;;  %s2417_s23 = smov (!%p206_p4, %s1558_s23), 15  ;;  %v1974_v24 = vld [vmem:[%s2409_s1 + $0x70] sm:$0xff]   ;;  %v1978_v28 = vld [vmem:[%s2409_s1 + $0x78] sm:$0xff]   ;;  %v1982_v41 = vld [vmem:[%s2409_s1 + $0x140] sm:$0xff]  }
   0xf   : > { %1756 = vmatprep.subr.bf16.mxu1 %v1959_v9  ;;  %v1975_v25 = vld [vmem:[%s2409_s1 + $0xf0] sm:$0xff]   ;;  %s1924_s22 = smul.u32 36, %s2417_s23  ;;  %v1979_v29 = vld [vmem:[%s2409_s1 + $0xf8] sm:$0xff]   ;;  %v1983_v44 = vld [vmem:[%s2409_s1 + $0x1c0] sm:$0xff]   ;;  %s1561_s4 = sshll.u32 %s2417_s23, 2 }
  0x10   : > { %v1976_v26 = vld [vmem:[%s2409_s1 + $0x30] sm:$0xff]   ;;  %v1980_v30 = vld [vmem:[%s2409_s1 + $0x38] sm:$0xff]   ;;  %v1984_v47 = vld [vmem:[%s2409_s1 + $0x100] sm:$0xff]   ;;  %s226_s7 = scalar_lea.vmem %s2411_s3, %s1561_s4 }
  0x11   : > { %1717 = vmatpush3.bf16.msra.mxu0 %v1960_v10  ;;  %v1977_v27 = vld [vmem:[%s2409_s1 + $0xb0] sm:$0xff]   ;;  %s2184_s6 = scalar_lea.vmem %s2408_s0, %s1924_s22  ;;  %v1981_v31 = vld [vmem:[%s2409_s1 + $0xb8] sm:$0xff]   ;;  %v1985_v48 = vld [vmem:[%s2409_s1 + $0x180] sm:$0xff]  }
  0x12   : > { %1757 = vmatpush3.bf16.msra.mxu1 %v1961_v11  ;;  %1718 = vmatprep.subr.bf16.mxu0 %v1962_v12  ;;  %v229_v32 = vld [vmem:[%s2184_s6] sm:$0xff]  ;;  %v230_v34 = vld [vmem:[%s2184_s6 + $0x8] sm:$0xff]  ;;  %v240_v57 = vld [vmem:[%s2184_s6 + $0x50] sm:$0xff] }
  0x13   : > { %1758 = vmatprep.subr.bf16.mxu1 %v1963_v13  ;;  %v234_v33 = vld [vmem:[%s2184_s6 + $0x24] sm:$0xff]  ;;  %v269_v36 = vmax.bf16 %v2046_v35, %v229_v32  ;;  %v235_v38 = vld [vmem:[%s2184_s6 + $0x2c] sm:$0xff]  ;;  %v270_v39 = vmax.bf16 %v2046_v35, %v230_v34  ;;  %v245_v58 = vld [vmem:[%s2184_s6 + $0x74] sm:$0xff]  ;;  %v280_v59 = vmax.bf16 %v2046_v35, %v240_v57 }
  0x14   : > { %v274_v37 = vmax.bf16 %v2046_v35, %v234_v33  ;;  %v275_v40 = vmax.bf16 %v2046_v35, %v235_v38  ;;  %v1986_v49 = vld [vmem:[%s2409_s1 + $0x148] sm:$0xff]   ;;  %v285_v60 = vmax.bf16 %v2046_v35, %v245_v58  ;;  %v1990_v61 = vld [vmem:[%s2409_s1 + $0x150] sm:$0xff]   ;;  %v1994_v5 = vld [vmem:[%s2409_s1 + $0x158] sm:$0xff]  }
  0x15   : > { %1719 = vmatpush3.bf16.msra.mxu0 %v1964_v14  ;;  %v1987_v50 = vld [vmem:[%s2409_s1 + $0x1c8] sm:$0xff]   ;;  %v1991_v0 = vld [vmem:[%s2409_s1 + $0x1d0] sm:$0xff]   ;;  %v1995_v6 = vld [vmem:[%s2409_s1 + $0x1d8] sm:$0xff]  }
  0x16   : > { %1759 = vmatpush3.bf16.msra.mxu1 %v1965_v15  ;;  %1720 = vmatprep.subr.bf16.mxu0 %v1966_v16  ;;  %v1564_v42 = vcombine.high %v269_v36, %v274_v37  ;;  %v1563_v43 = vcombine.low %v269_v36, %v274_v37  ;;  %v1566_v45 = vcombine.high %v270_v39, %v275_v40  ;;  %v1988_v51 = vld [vmem:[%s2409_s1 + $0x108] sm:$0xff]   ;;  %v1992_v3 = vld [vmem:[%s2409_s1 + $0x110] sm:$0xff]   ;;  %v1996_v7 = vld [vmem:[%s2409_s1 + $0x118] sm:$0xff]  }
  0x17   : > { %1760 = vmatprep.subr.bf16.mxu1 %v1967_v17  ;;  %v1565_v46 = vcombine.low %v270_v39, %v275_v40  ;;  %v1989_v52 = vld [vmem:[%s2409_s1 + $0x188] sm:$0xff]   ;;  %v1575_v1 = vcombine.high %v280_v59, %v285_v60  ;;  %v1574_v2 = vcombine.low %v280_v59, %v285_v60  ;;  %v1993_v4 = vld [vmem:[%s2409_s1 + $0x190] sm:$0xff]   ;;  %v1997_v8 = vld [vmem:[%s2409_s1 + $0x198] sm:$0xff]  }
  0x18   : > { %1108 = vmatprep.mubr.bf16.mxu0 %v1564_v42  ;;  %1173 = vmatprep.mubr.bf16.mxu1 %v1566_v45  ;;  %v239_v53 = vld [vmem:[%s2184_s6 + $0x48] sm:$0xff]  ;;  %v249_v9 = vld [vmem:[%s2184_s6 + $0x90] sm:$0xff]  ;;  %v250_v12 = vld [vmem:[%s2184_s6 + $0x98] sm:$0xff] }
  0x19   : > { %1721 = vmatpush3.bf16.msra.mxu0 %v1968_v18  ;;  %v244_v54 = vld [vmem:[%s2184_s6 + $0x6c] sm:$0xff]  ;;  %v279_v55 = vmax.bf16 %v2046_v35, %v239_v53  ;;  %v254_v10 = vld [vmem:[%s2184_s6 + $0xb4] sm:$0xff]  ;;  %v289_v11 = vmax.bf16 %v2046_v35, %v249_v9  ;;  %v255_v13 = vld [vmem:[%s2184_s6 + $0xbc] sm:$0xff]  ;;  %v290_v15 = vmax.bf16 %v2046_v35, %v250_v12 }
  0x1a   : > { %1761 = vmatpush3.bf16.msra.mxu1 %v1969_v19  ;;  %1722 = vmatprep.subr.bf16.mxu0 %v1970_v20  ;;  %v284_v56 = vmax.bf16 %v2046_v35, %v244_v54  ;;  %v294_v14 = vmax.bf16 %v2046_v35, %v254_v10  ;;  %v295_v16 = vmax.bf16 %v2046_v35, %v255_v13  ;;  %v1998_v17 = vld [vmem:[%s2409_s1 + $0x160] sm:$0xff]   ;;  %v2006_v38 = vld [vmem:[%s2409_s1 + $0x170] sm:$0xff]   ;;  %v232_v54 = vld [vmem:[%s2184_s6 + $0x18] sm:$0xff] }
  0x1b   : > { %1762 = vmatprep.subr.bf16.mxu1 %v1971_v21  ;;  %v1999_v18 = vld [vmem:[%s2409_s1 + $0x1e0] sm:$0xff]   ;;  %v2009_v45 = vld [vmem:[%s2409_s1 + $0x1b0] sm:$0xff]   ;;  %v252_v13 = vld [vmem:[%s2184_s6 + $0xa8] sm:$0xff] }
  0x1c   : > { %v1573_v62 = vcombine.high %v279_v55, %v284_v56  ;;  %v1572_v63 = vcombine.low %v279_v55, %v284_v56  ;;  %v1582_v19 = vcombine.high %v289_v11, %v294_v14  ;;  %v1584_v20 = vcombine.high %v290_v15, %v295_v16  ;;  %v265_v34 = vld [vmem:[%s2184_s6 + $0x104] sm:$0xff]  ;;  %v237_v55 = vld [vmem:[%s2184_s6 + $0x3c] sm:$0xff] }
  0x1d   : > { %1723 = vmatpush3.bf16.msra.mxu0 %v1972_v22  ;;  %v1581_v21 = vcombine.low %v289_v11, %v294_v14  ;;  %v1583_v22 = vcombine.low %v290_v15, %v295_v16  ;;  %v305_v37 = vmax.bf16 %v2046_v35, %v265_v34  ;;  %v272_v56 = vmax.bf16 %v2046_v35, %v232_v54  ;;  %v2014_v58 = vld [vmem:[%s2409_s1 + $0x200] sm:$0xff]   ;;  %v257_v14 = vld [vmem:[%s2184_s6 + $0xcc] sm:$0xff]  ;;  %v258_v34 = vld [vmem:[%s2184_s6 + $0xd4] sm:$0xf] }
  0x1e   : > { %1763 = vmatpush3.bf16.msra.mxu1 %v1973_v23  ;;  %1724 = vmatprep.subr.bf16.mxu0 %v1974_v24  ;;  %v2000_v23 = vld [vmem:[%s2409_s1 + $0x120] sm:$0xff]   ;;  %v277_v57 = vmax.bf16 %v2046_v35, %v237_v55 }
  0x1f   : > { %1764 = vmatprep.subr.bf16.mxu1 %v1975_v25  ;;  %v2001_v24 = vld [vmem:[%s2409_s1 + $0x1a0] sm:$0xff]   ;;  %v2002_v25 = vld [vmem:[%s2409_s1 + $0x168] sm:$0xff]  }
  0x20   : > { %v251_v11 = vld [vmem:[%s2184_s6 + $0xa0] sm:$0xff] }
  0x21   : > { %1725 = vmatpush3.bf16.msra.mxu0 %v1976_v26  ;;  %v2003_v26 = vld [vmem:[%s2409_s1 + $0x1e8] sm:$0xff]   ;;  %v291_v15 = vmax.bf16 %v2046_v35, %v251_v11 }
  0x22   : > { %1765 = vmatpush3.bf16.msra.mxu1 %v1977_v27  ;;  %1726 = vmatprep.subr.bf16.mxu0 %v1978_v28  ;;  %v2004_v27 = vld [vmem:[%s2409_s1 + $0x128] sm:$0xff]  }
  0x23   : > { %1766 = vmatprep.subr.bf16.mxu1 %v1979_v29  ;;  %v2005_v28 = vld [vmem:[%s2409_s1 + $0x1a8] sm:$0xff]   ;;  %v259_v29 = vld [vmem:[%s2184_s6 + $0xd8] sm:$0xff] }
  0x24   : > { %v299_v32 = vmax.bf16 %v2046_v35, %v259_v29  ;;  %v256_v12 = vld [vmem:[%s2184_s6 + $0xc4] sm:$0xff] }
  0x25   : > { %1727 = vmatpush3.bf16.msra.mxu0 %v1980_v30  ;;  %v264_v30 = vld [vmem:[%s2184_s6 + $0xfc] sm:$0xff]  ;;  %v296_v16 = vmax.bf16 %v2046_v35, %v256_v12 }
  0x26   : > { %1767 = vmatpush3.bf16.msra.mxu1 %v1981_v31  ;;  %1792 = vmatprep.subr.bf16.mxu0 %v1982_v41  ;;  %v260_v31 = vld [vmem:[%s2184_s6 + $0xe0] sm:$0xff]  ;;  %v304_v33 = vmax.bf16 %v2046_v35, %v264_v30  ;;  %v2007_v41 = vld [vmem:[%s2409_s1 + $0x1f0] sm:$0xff]  }
  0x27   : > { %1832 = vmatprep.subr.bf16.mxu1 %v1983_v44  ;;  %v300_v36 = vmax.bf16 %v2046_v35, %v260_v31  ;;  %v2008_v44 = vld [vmem:[%s2409_s1 + $0x130] sm:$0xff]   ;;  %v238_v31 = vld [vmem:[%s2184_s6 + $0x44] sm:$0xf] }
  0x28   : > { %1109 = vmatmul.mubr.bf16.vlgmr.msra.gmra.mrb[0].mxu0 %v1563_v43  ;;  %v1591_v39 = vcombine.high %v299_v32, %v304_v33  ;;  %v1590_v40 = vcombine.low %v299_v32, %v304_v33  ;;  %v253_v33 = vld [vmem:[%s2184_s6 + $0xb0] sm:$0xf] }
  0x29   : > { %1174 = vmatmul.mubr.bf16.vlgmr.msra.gmra.mrb[0].mxu1 %v1565_v46  ;;  %1793 = vmatpush3.bf16.msra.mxu0 %v1984_v47  ;;  %v1593_v42 = vcombine.high %v300_v36, %v305_v37  ;;  %v1592_v43 = vcombine.low %v300_v36, %v305_v37  ;;  %v2010_v46 = vld [vmem:[%s2409_s1 + $0x178] sm:$0xff]   ;;  %v278_v36 = vmax.bf16 %v2046_v35, %v238_v31 }
  0x2a   : > { %1833 = vmatpush3.bf16.msra.mxu1 %v1985_v48  ;;  %1794 = vmatprep.subr.bf16.mxu0 %v1986_v49  ;;  %v2011_v47 = vld [vmem:[%s2409_s1 + $0x1f8] sm:$0xff]   ;;  %v293_v37 = vmax.bf16 %v2046_v35, %v253_v33 }
  0x2b   : > { %1834 = vmatprep.subr.bf16.mxu1 %v1987_v50  ;;  %1116 = vmatprep.mubr.bf16.mxu0 %v1573_v62  ;;  %v2012_v48 = vld [vmem:[%s2409_s1 + $0x138] sm:$0xff]   ;;  %v231_v50 = vld [vmem:[%s2184_s6 + $0x10] sm:$0xff] }
  0x2c   : > { %1181 = vmatprep.mubr.bf16.mxu1 %v1575_v1  ;;  %v2013_v49 = vld [vmem:[%s2409_s1 + $0x1b8] sm:$0xff]  }
  0x2d   : > { %1795 = vmatpush3.bf16.msra.mxu0 %v1988_v51  ;;  %v236_v51 = vld [vmem:[%s2184_s6 + $0x34] sm:$0xff]  ;;  %v246_v1 = vld [vmem:[%s2184_s6 + $0x7c] sm:$0xff] }
  0x2e   : > { %1835 = vmatpush3.bf16.msra.mxu1 %v1989_v52  ;;  %1796 = vmatprep.subr.bf16.mxu0 %v1990_v61  ;;  %v271_v52 = vmax.bf16 %v2046_v35, %v231_v50  ;;  %v276_v53 = vmax.bf16 %v2046_v35, %v236_v51  ;;  %v2015_v61 = vld [vmem:[%s2409_s1 + $0x208] sm:$0xff]   ;;  %v241_v62 = vld [vmem:[%s2184_s6 + $0x58] sm:$0xff]  ;;  %v1585_v50 = vcombine.low %v291_v15, %v296_v16 }
  0x2f   : > { %1836 = vmatprep.subr.bf16.mxu1 %v1991_v0  ;;  %v1570_v0 = vcombine.high %v272_v56, %v277_v57 }
  0x30   : > { %1117 = vmatmul.mubr.bf16.gmra.mrb[4].mxu0 %v1572_v63  ;;  %v1567_v59 = vcombine.low %v271_v52, %v276_v53  ;;  %v1568_v60 = vcombine.high %v271_v52, %v276_v53  ;;  %v1569_v63 = vcombine.low %v272_v56, %v277_v57  ;;  %v2019_v56 = vld [vmem:[%s2409_s1 + $0x228] sm:$0xff]  }
  0x31   : > { %1182 = vmatmul.mubr.bf16.gmra.mrb[4].mxu1 %v1574_v2  ;;  %1797 = vmatpush3.bf16.msra.mxu0 %v1992_v3  ;;  %v281_v2 = vmax.bf16 %v2046_v35, %v241_v62  ;;  %v242_v3 = vld [vmem:[%s2184_s6 + $0x60] sm:$0xff] }
  0x32   : > { %1837 = vmatpush3.bf16.msra.mxu1 %v1993_v4  ;;  %1798 = vmatprep.subr.bf16.mxu0 %v1994_v5  ;;  %v247_v4 = vld [vmem:[%s2184_s6 + $0x84] sm:$0xff]  ;;  %v286_v5 = vmax.bf16 %v2046_v35, %v246_v1 }
  0x33   : > { %1838 = vmatprep.subr.bf16.mxu1 %v1995_v6  ;;  %1124 = vmatprep.mubr.bf16.mxu0 %v1582_v19  ;;  %v282_v6 = vmax.bf16 %v2046_v35, %v242_v3  ;;  %v297_v19 = vmax.bf16 %v2046_v35, %v257_v14 }
  0x34   : > { %1189 = vmatprep.mubr.bf16.mxu1 %v1584_v20  ;;  %v1577_v9 = vcombine.high %v281_v2, %v286_v5 }
  0x35   : > { %1799 = vmatpush3.bf16.msra.mxu0 %v1996_v7  ;;  %v287_v7 = vmax.bf16 %v2046_v35, %v247_v4 }
  0x36   : > { %1839 = vmatpush3.bf16.msra.mxu1 %v1997_v8  ;;  %1800 = vmatprep.subr.bf16.mxu0 %v1998_v17  ;;  %v2016_v8 = vld [vmem:[%s2409_s1 + $0x210] sm:$0xff]   ;;  %v1576_v17 = vcombine.low %v281_v2, %v286_v5 }
  0x37   : > { %1840 = vmatprep.subr.bf16.mxu1 %v1999_v18  ;;  %v1579_v10 = vcombine.high %v282_v6, %v287_v7  ;;  %v292_v18 = vmax.bf16 %v2046_v35, %v252_v13  ;;  %v1578_v20 = vcombine.low %v282_v6, %v287_v7 }
  0x38   : > { %1125 = vmatmul.mubr.bf16.gmra.mrb[8].mxu0 %v1581_v21  ;;  %v261_v21 = vld [vmem:[%s2184_s6 + $0xe8] sm:$0xff] }
  0x39   : > { %1190 = vmatmul.mubr.bf16.gmra.mrb[8].mxu1 %v1583_v22  ;;  %1801 = vmatpush3.bf16.msra.mxu0 %v2000_v23  ;;  %v266_v22 = vld [vmem:[%s2184_s6 + $0x10c] sm:$0xff]  ;;  %v2017_v23 = vld [vmem:[%s2409_s1 + $0x218] sm:$0xff]   ;;  %v301_v29 = vmax.bf16 %v2046_v35, %v261_v21  ;;  %v1587_v54 = vcombine.low %v292_v18, %v297_v19 }
  0x3a   : > { %1841 = vmatpush3.bf16.msra.mxu1 %v2001_v24  ;;  %1802 = vmatprep.subr.bf16.mxu0 %v2002_v25  ;;  %v1586_v24 = vcombine.high %v291_v15, %v296_v16  ;;  %v262_v25 = vld [vmem:[%s2184_s6 + $0xf0] sm:$0xff]  ;;  %v306_v30 = vmax.bf16 %v2046_v35, %v266_v22 }
  0x3b   : > { %1842 = vmatprep.subr.bf16.mxu1 %v2003_v26  ;;  %1132 = vmatprep.mubr.bf16.mxu0 %v1591_v39  ;;  %v267_v26 = vld [vmem:[%s2184_s6 + $0x114] sm:$0xff]  ;;  %v243_v39 = vld [vmem:[%s2184_s6 + $0x68] sm:$0xf]  ;;  %v302_v51 = vmax.bf16 %v2046_v35, %v262_v25 }
  0x3c   : > { %1197 = vmatprep.mubr.bf16.mxu1 %v1593_v42  ;;  %v2018_v42 = vld [vmem:[%s2409_s1 + $0x220] sm:$0xff]   ;;  %v307_v52 = vmax.bf16 %v2046_v35, %v267_v26  ;;  %v1595_v57 = vcombine.high %v301_v29, %v306_v30 }
  0x3d   : > { %1803 = vmatpush3.bf16.msra.mxu0 %v2004_v27  ;;  %v233_v27 = vld [vmem:[%s2184_s6 + $0x20] sm:$0xf] }
  0x3e   : > { %1843 = vmatpush3.bf16.msra.mxu1 %v2005_v28  ;;  %1804 = vmatprep.subr.bf16.mxu0 %v2006_v38  ;;  %v1588_v28 = vcombine.high %v292_v18, %v297_v19  ;;  %v273_v32 = vmax.bf16 %v2046_v35, %v233_v27  ;;  %v298_v38 = vmax.bf16 %v2046_v35, %v258_v34 }
  0x3f   : > { %1844 = vmatprep.subr.bf16.mxu1 %v2007_v41  ;;  %v263_v41 = vld [vmem:[%s2184_s6 + $0xf8] sm:$0xf] }
  0x40   : > { %1133 = vmatmul.mubr.bf16.gmra.mrb[12].mxu0 %v1590_v40  ;;  %v248_v40 = vld [vmem:[%s2184_s6 + $0x8c] sm:$0xf] }
  0x41   : > { %1198 = vmatmul.mubr.bf16.gmra.mrb[12].mxu1 %v1592_v43  ;;  %1805 = vmatpush3.bf16.msra.mxu0 %v2008_v44  ;;  %v283_v43 = vmax.bf16 %v2046_v35, %v243_v39  ;;  %v288_v44 = vmax.bf16 %v2046_v35, %v248_v40 }
  0x42   : > { %1845 = vmatpush3.bf16.msra.mxu1 %v2009_v45  ;;  %1806 = vmatprep.subr.bf16.mxu0 %v2010_v46  ;;  %v268_v45 = vld [vmem:[%s2184_s6 + $0x11c] sm:$0xf]  ;;  %v303_v46 = vmax.bf16 %v2046_v35, %v263_v41 }
  0x43   : > { %1846 = vmatprep.subr.bf16.mxu1 %v2011_v47  ;;  %1238 = vmatprep.mubr.bf16.mxu0 %v1568_v60  ;;  %v1571_v47 = vcombine.low %v273_v32, %v278_v36  ;;  %v1580_v53 = vcombine.low %v283_v43, %v288_v44  ;;  %v1596_v60 = vcombine.low %v302_v51, %v307_v52 }
  0x44   : > { %1303 = vmatprep.mubr.bf16.mxu1 %v1570_v0  ;;  %v1562_v0 = vld [vmem:[%s2410_s2] ss:$0 sm:$0xff] }
  0x45   : > { %1807 = vmatpush3.bf16.msra.mxu0 %v2012_v48  ;;  %v1589_v48 = vcombine.low %v293_v37, %v298_v38 }
  0x46   : > { %1847 = vmatpush3.bf16.msra.mxu1 %v2013_v49  ;;  %1884 = vmatprep.subr.bf16.mxu0 %v2014_v58  ;;  %v308_v49 = vmax.bf16 %v2046_v35, %v268_v45  ;;  %v2020_v35 = vld [vmem:[%s2409_s1 + $0x230] sm:$0xff]  }
  0x47   : > { %1908 = vmatprep.subr.bf16.mxu1 %v2014_v58 }
  0x48   : > { %1239 = vmatmul.mubr.bf16.vlgmr.msra.gmra.mrb[16].mxu0 %v1567_v59  ;;  %v1598_v55 = vcombine.low %v303_v46, %v308_v49  ;;  %v1594_v59 = vcombine.low %v301_v29, %v306_v30 }
  0x49   : > { %1304 = vmatmul.mubr.bf16.vlgmr.msra.gmra.mrb[16].mxu1 %v1569_v63  ;;  %1885 = vmatpush3.bf16.msra.mxu0 %v2014_v58 }
  0x4a   : > { %1916 = vmatpush3.bf16.msra.mxu1 %v2014_v58  ;;  %1886 = vmatprep.subr.bf16.mxu0 %v2015_v61  ;;  %v1597_v58 = vcombine.high %v302_v51, %v307_v52 }
  0x4b   : > { %1909 = vmatprep.subr.bf16.mxu1 %v2015_v61  ;;  %1246 = vmatprep.mubr.bf16.mxu0 %v1577_v9 }
  0x4c   : > { %1311 = vmatprep.mubr.bf16.mxu1 %v1579_v10 }
  0x4d   : > { %1887 = vmatpush3.bf16.msra.mxu0 %v2015_v61 }
  0x4e   : > { %1917 = vmatpush3.bf16.msra.mxu1 %v2015_v61  ;;  %1888 = vmatprep.subr.bf16.mxu0 %v2016_v8  ;;  %v2021_v61 = vld [vmem:[%s2409_s1 + $0x238] sm:$0xff]  }
  0x4f   : > { %1910 = vmatprep.subr.bf16.mxu1 %v2016_v8 }
  0x50   : > { %1247 = vmatmul.mubr.bf16.gmra.mrb[20].mxu0 %v1576_v17 }
  0x51   : > { %1312 = vmatmul.mubr.bf16.gmra.mrb[20].mxu1 %v1578_v20  ;;  %1889 = vmatpush3.bf16.msra.mxu0 %v2016_v8 }
  0x52   : > { %1918 = vmatpush3.bf16.msra.mxu1 %v2016_v8  ;;  %1890 = vmatprep.subr.bf16.mxu0 %v2017_v23 }
  0x53   : > { %1911 = vmatprep.subr.bf16.mxu1 %v2017_v23  ;;  %1254 = vmatprep.mubr.bf16.mxu0 %v1586_v24 }
  0x54   : > { %1319 = vmatprep.mubr.bf16.mxu1 %v1588_v28 }
  0x55   : > { %1891 = vmatpush3.bf16.msra.mxu0 %v2017_v23 }
  0x56   : > { %1919 = vmatpush3.bf16.msra.mxu1 %v2017_v23  ;;  %1892 = vmatprep.subr.bf16.mxu0 %v2018_v42 }
  0x57   : > { %1912 = vmatprep.subr.bf16.mxu1 %v2018_v42 }
  0x58   : > { %1255 = vmatmul.mubr.bf16.gmra.mrb[24].mxu0 %v1585_v50 }
  0x59   : > { %1320 = vmatmul.mubr.bf16.gmra.mrb[24].mxu1 %v1587_v54  ;;  %1893 = vmatpush3.bf16.msra.mxu0 %v2018_v42 }
  0x5a   : > { %1920 = vmatpush3.bf16.msra.mxu1 %v2018_v42  ;;  %1894 = vmatprep.subr.bf16.mxu0 %v2019_v56 }
  0x5b   : > { %1913 = vmatprep.subr.bf16.mxu1 %v2019_v56  ;;  %1262 = vmatprep.mubr.bf16.mxu0 %v1595_v57 }
  0x5c   : > { %1327 = vmatprep.mubr.bf16.mxu1 %v1597_v58 }
  0x5d   : > { %1895 = vmatpush3.bf16.msra.mxu0 %v2019_v56 }
  0x5e   : > { %1921 = vmatpush3.bf16.msra.mxu1 %v2019_v56  ;;  %1896 = vmatprep.subr.bf16.mxu0 %v2020_v35 }
  0x5f   : > { %1914 = vmatprep.subr.bf16.mxu1 %v2020_v35 }
  0x60   : > { %1263 = vmatmul.mubr.bf16.gmra.mrb[28].mxu0 %v1594_v59 }
  0x61   : > { %1328 = vmatmul.mubr.bf16.gmra.mrb[28].mxu1 %v1596_v60  ;;  %1897 = vmatpush3.bf16.msra.mxu0 %v2020_v35 }
  0x62   : > { %1922 = vmatpush3.bf16.msra.mxu1 %v2020_v35  ;;  %1898 = vmatprep.subr.bf16.mxu0 %v2021_v61 }
  0x63   : > { %1915 = vmatprep.subr.bf16.mxu1 %v2021_v61  ;;  %1900 = vmatprep.mubr.bf16.mxu0 %v1571_v47 }
  0x64   : > { %1904 = vmatprep.mubr.bf16.mxu1 %v1589_v48 }
  0x65   : > { %1899 = vmatpush3.bf16.msra.mxu0 %v2021_v61 }
  0x66   : > { %1923 = vmatpush3.bf16.msra.mxu1 %v2021_v61 }
  0x68   : > { %1901 = vmatmul.mubr.bf16.vlgmr.msra.gmra.mrb[32].mxu0 %v1580_v53 }
  0x69   : > { %1905 = vmatmul.mubr.bf16.vlgmr.msra.gmra.mrb[32].mxu1 %v1598_v55 }
  0xfb   : > { %v1728_v62 = vpop.f32.mrb[0].mxu0 }
  0xfc   : > { %v1768_v63 = vpop.f32.mrb[0].mxu1  ;;  %v1729_v1 = vpop.f32.mrb[1].mxu0 }
  0xfd   : > { %v1730_v2 = vadd.f32 %v1729_v1, %v1728_v62  ;;  %v1769_v3 = vpop.f32.mrb[1].mxu1  ;;  %v1731_v4 = vpop.f32.mrb[2].mxu0 }
  0xfe   : > { %v1770_v5 = vadd.f32 %v1769_v3, %v1768_v63  ;;  %v1771_v6 = vpop.f32.mrb[2].mxu1  ;;  %v1732_v7 = vpop.f32.mrb[3].mxu0 }
  0xff   : > { %v1111_v8 = vadd.f32 %v1730_v2, %v1562_v0  ;;  %v1733_v9 = vadd.f32 %v1732_v7, %v1731_v4  ;;  %v1772_v10 = vpop.f32.mrb[3].mxu1 }
 0x100   : > { %v1773_v11 = vadd.f32 %v1772_v10, %v1771_v6 }
 0x101   : > { %v1176_v12 = vadd.f32 %v1770_v5, %v1111_v8  ;;  %v1114_v13 = vadd.f32 %v1733_v9, %v1562_v0 }
 0x103   : > { %v1179_v14 = vadd.f32 %v1773_v11, %v1114_v13  ;;  %v1734_v15 = vpop.f32.mrb[4].mxu0 }
 0x104   : > { %v1774_v16 = vpop.f32.mrb[4].mxu1  ;;  %v1735_v17 = vpop.f32.mrb[5].mxu0 }
 0x105   : > { %v1736_v18 = vadd.f32 %v1735_v17, %v1734_v15  ;;  %v1775_v19 = vpop.f32.mrb[5].mxu1  ;;  %v1737_v20 = vpop.f32.mrb[6].mxu0 }
 0x106   : > { %v1776_v21 = vadd.f32 %v1775_v19, %v1774_v16  ;;  %v1777_v22 = vpop.f32.mrb[6].mxu1  ;;  %v1738_v23 = vpop.f32.mrb[7].mxu0 }
 0x107   : > { %v1119_v24 = vadd.f32 %v1736_v18, %v1562_v0  ;;  %v1739_v25 = vadd.f32 %v1738_v23, %v1737_v20  ;;  %v1778_v26 = vpop.f32.mrb[7].mxu1 }
 0x108   : > { %v1779_v27 = vadd.f32 %v1778_v26, %v1777_v22 }
 0x109   : > { %v1184_v28 = vadd.f32 %v1776_v21, %v1119_v24  ;;  %v1122_v29 = vadd.f32 %v1739_v25, %v1562_v0 }
 0x10b   : > { %v1187_v30 = vadd.f32 %v1779_v27, %v1122_v29  ;;  %v1740_v31 = vpop.f32.mrb[8].mxu0 }
 0x10c   : > { %v1780_v32 = vpop.f32.mrb[8].mxu1  ;;  %v1741_v33 = vpop.f32.mrb[9].mxu0 }
 0x10d   : > { %v1781_v34 = vpop.f32.mrb[9].mxu1  ;;  %v1742_v36 = vadd.f32 %v1741_v33, %v1740_v31  ;;  %v1743_v38 = vpop.f32.mrb[10].mxu0 }
 0x10e   : > { %v1782_v37 = vadd.f32 %v1781_v34, %v1780_v32  ;;  %v1783_v39 = vpop.f32.mrb[10].mxu1  ;;  %v1744_v40 = vpop.f32.mrb[11].mxu0 }
 0x10f   : > { %v1784_v41 = vpop.f32.mrb[11].mxu1  ;;  %v1127_v42 = vadd.f32 %v1742_v36, %v1562_v0  ;;  %v1745_v43 = vadd.f32 %v1744_v40, %v1743_v38 }
 0x110   : > { %v1785_v44 = vadd.f32 %v1784_v41, %v1783_v39 }
 0x111   : > { %v1192_v45 = vadd.f32 %v1782_v37, %v1127_v42  ;;  %v1130_v46 = vadd.f32 %v1745_v43, %v1562_v0 }
 0x113   : > { %v1195_v47 = vadd.f32 %v1785_v44, %v1130_v46  ;;  %v1746_v48 = vpop.f32.mrb[12].mxu0 }
 0x114   : > { %v1786_v49 = vpop.f32.mrb[12].mxu1  ;;  %v1747_v50 = vpop.f32.mrb[13].mxu0 }
 0x115   : > { %v1748_v51 = vadd.f32 %v1747_v50, %v1746_v48  ;;  %v1787_v52 = vpop.f32.mrb[13].mxu1  ;;  %v1749_v53 = vpop.f32.mrb[14].mxu0 }
 0x116   : > { %v1788_v54 = vadd.f32 %v1787_v52, %v1786_v49  ;;  %v1789_v55 = vpop.f32.mrb[14].mxu1  ;;  %v1750_v56 = vpop.f32.mrb[15].mxu0 }
 0x117   : > { %v1135_v57 = vadd.f32 %v1748_v51, %v1562_v0  ;;  %v1751_v58 = vadd.f32 %v1750_v56, %v1749_v53  ;;  %v1790_v35 = vpop.f32.mrb[15].mxu1 }
 0x118   : > { %v1791_v59 = vadd.f32 %v1790_v35, %v1789_v55 }
 0x119   : > { %v1200_v60 = vadd.f32 %v1788_v54, %v1135_v57  ;;  %v1138_v61 = vadd.f32 %v1751_v58, %v1562_v0 }
 0x11b   : > { %v1203_v62 = vadd.f32 %v1791_v59, %v1138_v61  ;;  %v1808_v63 = vpop.f32.mrb[16].mxu0 }
 0x11c   : > { %v1848_v1 = vpop.f32.mrb[16].mxu1  ;;  %v1809_v2 = vpop.f32.mrb[17].mxu0 }
 0x11d   : > { %v1810_v3 = vadd.f32 %v1809_v2, %v1808_v63  ;;  %v1849_v4 = vpop.f32.mrb[17].mxu1  ;;  %v1811_v5 = vpop.f32.mrb[18].mxu0 }
 0x11e   : > { %v1850_v6 = vadd.f32 %v1849_v4, %v1848_v1  ;;  %v1851_v7 = vpop.f32.mrb[18].mxu1  ;;  %v1812_v8 = vpop.f32.mrb[19].mxu0 }
 0x11f   : > { %v1241_v9 = vadd.f32 %v1810_v3, %v1176_v12  ;;  %v1813_v10 = vadd.f32 %v1812_v8, %v1811_v5  ;;  %v1852_v11 = vpop.f32.mrb[19].mxu1 }
 0x120   : > { %v1853_v13 = vadd.f32 %v1852_v11, %v1851_v7 }
 0x121   : > { %v1244_v15 = vadd.f32 %v1813_v10, %v1179_v14  ;;  %v1306_v16 = vadd.f32 %v1850_v6, %v1241_v9 }
 0x123   : > { %v1814_v17 = vpop.f32.mrb[20].mxu0  ;;  %v1309_v18 = vadd.f32 %v1853_v13, %v1244_v15 }
 0x124   : > { %v1854_v19 = vpop.f32.mrb[20].mxu1  ;;  %v1815_v0 = vpop.f32.mrb[21].mxu0 }
 0x125   : > { %v1816_v20 = vadd.f32 %v1815_v0, %v1814_v17  ;;  %v1855_v21 = vpop.f32.mrb[21].mxu1  ;;  %v1817_v22 = vpop.f32.mrb[22].mxu0 }
 0x126   : > { %v1856_v23 = vadd.f32 %v1855_v21, %v1854_v19  ;;  %v1857_v24 = vpop.f32.mrb[22].mxu1  ;;  %v1818_v25 = vpop.f32.mrb[23].mxu0 }
 0x127   : > { %v1249_v26 = vadd.f32 %v1816_v20, %v1184_v28  ;;  %v1819_v27 = vadd.f32 %v1818_v25, %v1817_v22  ;;  %v1858_v29 = vpop.f32.mrb[23].mxu1 }
 0x128   : > { %v1859_v31 = vadd.f32 %v1858_v29, %v1857_v24 }
 0x129   : > { %v1252_v12 = vadd.f32 %v1819_v27, %v1187_v30  ;;  %v1314_v32 = vadd.f32 %v1856_v23, %v1249_v26 }
 0x12b   : > { %v1820_v33 = vpop.f32.mrb[24].mxu0  ;;  %v1317_v34 = vadd.f32 %v1859_v31, %v1252_v12 }
 0x12c   : > { %v1860_v14 = vpop.f32.mrb[24].mxu1  ;;  %v1821_v36 = vpop.f32.mrb[25].mxu0 }
 0x12d   : > { %v1822_v37 = vadd.f32 %v1821_v36, %v1820_v33  ;;  %v1861_v38 = vpop.f32.mrb[25].mxu1  ;;  %v1823_v39 = vpop.f32.mrb[26].mxu0 }
 0x12e   : > { %v1862_v40 = vadd.f32 %v1861_v38, %v1860_v14  ;;  %v1863_v41 = vpop.f32.mrb[26].mxu1  ;;  %v1824_v42 = vpop.f32.mrb[27].mxu0 }
 0x12f   : > { %v1257_v43 = vadd.f32 %v1822_v37, %v1192_v45  ;;  %v1825_v44 = vadd.f32 %v1824_v42, %v1823_v39  ;;  %v1864_v46 = vpop.f32.mrb[27].mxu1 }
 0x130   : > { %v1865_v48 = vadd.f32 %v1864_v46, %v1863_v41 }
 0x131   : > { %v1260_v28 = vadd.f32 %v1825_v44, %v1195_v47  ;;  %v1322_v49 = vadd.f32 %v1862_v40, %v1257_v43 }
 0x133   : > { %v1826_v50 = vpop.f32.mrb[28].mxu0  ;;  %v1325_v51 = vadd.f32 %v1865_v48, %v1260_v28 }
 0x134   : > { %v1866_v30 = vpop.f32.mrb[28].mxu1  ;;  %v1827_v52 = vpop.f32.mrb[29].mxu0 }
 0x135   : > { %v1828_v53 = vadd.f32 %v1827_v52, %v1826_v50  ;;  %v1867_v54 = vpop.f32.mrb[29].mxu1  ;;  %v1829_v55 = vpop.f32.mrb[30].mxu0 }
 0x136   : > { %v1868_v56 = vadd.f32 %v1867_v54, %v1866_v30  ;;  %v1869_v57 = vpop.f32.mrb[30].mxu1  ;;  %v1830_v58 = vpop.f32.mrb[31].mxu0 }
 0x137   : > { %v1265_v35 = vadd.f32 %v1828_v53, %v1200_v60  ;;  %v1831_v59 = vadd.f32 %v1830_v58, %v1829_v55  ;;  %v1870_v61 = vpop.f32.mrb[31].mxu1 }
 0x138   : > { %v1871_v45 = vadd.f32 %v1870_v61, %v1869_v57 }
 0x139   : > { %v1268_v63 = vadd.f32 %v1831_v59, %v1203_v62  ;;  %v1330_v1 = vadd.f32 %v1868_v56, %v1265_v35 }
 0x13b   : > { %v1902_v2 = vpop.f32.mrb[32].mxu0  ;;  %v1333_v47 = vadd.f32 %v1871_v45, %v1268_v63 }
 0x13c   : > { %v1379_v3 = vadd.f32 %v1902_v2, %v1314_v32  ;;  %v1906_v4 = vpop.f32.mrb[32].mxu1  ;;  %v1370_v5 = vpop.f32.mrb[33].mxu0 }
 0x13d   : > { %v1395_v6 = vadd.f32 %v1906_v4, %v1330_v1  ;;  %v1371_v7 = vadd.f32 %v1370_v5, %v1306_v16  ;;  %v1386_v8 = vpop.f32.mrb[33].mxu1  ;;  %v1903_v9 = vpop.f32.mrb[34].mxu0 }
 0x13e   : > { %v1387_v10 = vadd.f32 %v1386_v8, %v1322_v49  ;;  %v1382_v11 = vadd.f32 %v1903_v9, %v1317_v34  ;;  %v1907_v13 = vpop.f32.mrb[34].mxu1  ;;  %v1373_v60 = vpop.f32.mrb[35].mxu0  ;;  %v1403_v0 = vmax.f32 %v1379_v3, 0.0 }
 0x13f   : > { %v1398_v15 = vadd.f32 %v1907_v13, %v1333_v47  ;;  %v1374_v17 = vadd.f32 %v1373_v60, %v1309_v18  ;;  %v1389_v19 = vpop.f32.mrb[35].mxu1  ;;  %v1407_v21 = vmax.f32 %v1395_v6, 0.0  ;;  %v1401_v22 = vmax.f32 %v1371_v7, 0.0 }
 0x140   : > { %v1404_v62 = vmax.f32 %v1382_v11, 0.0  ;;  %v1390_v20 = vadd.f32 %v1389_v19, %v1325_v51  ;;  %v1405_v24 = vmax.f32 %v1387_v10, 0.0 }
 0x141   : > { %v1408_v16 = vmax.f32 %v1398_v15, 0.0  ;;  %v1402_v23 = vmax.f32 %v1374_v17, 0.0 }
 0x142   : > { %v1697_v25 = vpack.c.bf16 %v1404_v62, %v1403_v0  ;;  %v1406_v26 = vmax.f32 %v1390_v20, 0.0 }
 0x143   : > { %v1707_v27 = vpack.c.bf16 %v1408_v16, %v1407_v21  ;;  %v1692_v29 = vpack.c.bf16 %v1402_v23, %v1401_v22 }
 0x144   : > { %1709 = vst [vmem:[%s226_s7 + $0x8] sm:$0xff] %v1697_v25   ;;  %v1702_v31 = vpack.c.bf16 %v1406_v26, %v1405_v24 }
 0x145   : > { %1711 = vst [vmem:[%s226_s7 + $0x18] sm:$0xff] %v1707_v27   ;;  %1693 = vst [vmem:[%s226_s7] sm:$0xff] %v1692_v29  }
 0x146   : > { %1710 = vst [vmem:[%s226_s7 + $0x10] sm:$0xff] %v1702_v31  }
 0x147 PF: > { %s13_s14 = sadd.s32 1, %s2044_s14   ;;  %s2412_s12 = smov %s2040_s13 }
 0x148   : > { %p10_p5 = scmp.ge.s32.totalorder %s13_s14, 4   ;;  %s2413_s13 = smov %s2415_s15 }
 0x14a   :  { %12 = sbr.rel (!%p10_p5) target bundleno = 2 (0x2), region = 68 }

// kernel: deeplabv3_fcn_forward.33
= control target key start
LH: loop header
LB: loop body
LE: loop exit
PB: predicated region body
PF: predicated region fallthrough
CT: control target
= control target key end

     0   :  { %s694_s15 = smov 0   ;;  %s696_s16 = smov 0   ;;  %s762_s0 = inlined_call_operand.vmem [shape: bf16[32,128], index: 0, kind: input, shape index: {}]   ;;  %s763_s1 = inlined_call_operand.vmem [shape: bf16[128,128], index: 1, kind: input, shape index: {}]   ;;  %s764_s2 = inlined_call_operand.vmem [shape: f32[1,128], index: 2, kind: input, shape index: {}]   ;;  %s765_s3 = inlined_call_operand.vmem [shape: bf16[32,128], index: 3, kind: input, shape index: {}]   ;;  %s766_s4 = inlined_call_operand.vmem [shape: bf16[32,128], index: 4, kind: output, shape index: {}]  }
   0x1   :  { %s698_s17 = smov 0  }
   0x2 LB: > { %s26_s18 = sadd.s32 1, %s661_s16  ;;  %p547_p0 = scmp.ge.s32.totalorder %s665_s17, 1  ;;  %s665_s17 = sphi %s698_s17, %s14_s17   ;;  %s661_s16 = sphi %s696_s16, %s768_s16   ;;  %s657_s15 = sphi %s694_s15, %s767_s15  }
   0x3   : > { %p28_p1 = scmp.ge.s32.totalorder %s26_s18, 2  ;;  %p210_p2 = scmp.lt.s32.totalorder %s665_s17, 3 }
   0x5   : > { %s770_s18 = smov (%p28_p1, %s26_s18), 0  ;;  %p211_p3 = pnand %p547_p0, %p210_p2 }
   0x6   : > { %v634_v0 = vld [vmem:[%s763_s1] sm:$0xff] (!%p211_p3)   ;;  %v667_v1 = vmov (!%p211_p3), 0.0   ;;  %v635_v2 = vld [vmem:[%s763_s1 + $0x8] sm:$0xff] (!%p211_p3)   ;;  %vm668_vm0 = vmmov (!%p211_p3), 0   ;;  %s548_s23 = sshll.u32 (!%p211_p3), %s657_s15, 1  ;;  %v636_v3 = vld [vmem:[%s763_s1 + $0x10] sm:$0xff] (!%p211_p3)  }
   0x7   : > { %214 = sbr.rel (%p211_p3) target bundleno = 262 (0x106), region = 36  ;;  %588 = vmatprep.subr.bf16.mxu0 (!%p211_p3), %v667_v1  ;;  %604 = vmatprep.mubr.msk.bf16.mxu0 (!%p211_p3), %vm668_vm0, %v667_v1  ;;  %p255_p4 = scmp.lt.s32.totalorder (!%p211_p3), %s548_s23, 3  ;;  %v637_v4 = vld [vmem:[%s763_s1 + $0x18] sm:$0xff] (!%p211_p3)   ;;  %v638_v5 = vld [vmem:[%s763_s1 + $0x20] sm:$0xff] (!%p211_p3)   ;;  %v639_v6 = vld [vmem:[%s763_s1 + $0x28] sm:$0xff] (!%p211_p3)  }
   0x8   : > { %589 = vmatpush3.bf16.msra.mxu0 (!%p211_p3), %v634_v0  ;;  %v640_v7 = vld [vmem:[%s763_s1 + $0x30] sm:$0xff] (!%p211_p3)   ;;  %v641_v8 = vld [vmem:[%s763_s1 + $0x38] sm:$0xff] (!%p211_p3)   ;;  %v554_v11 = vld [vmem:[%s764_s2] ss:$0 sm:$0xff] (!%p211_p3) }
   0x9   : > { %590 = vmatprep.subr.bf16.mxu0 (!%p211_p3), %v667_v1 }
   0xc   : > { %591 = vmatpush3.bf16.msra.mxu0 (!%p211_p3), %v635_v2 }
   0xd   : > { %592 = vmatprep.subr.bf16.mxu0 (!%p211_p3), %v667_v1 }
   0xe   : > { %s772_s23 = smov (!%p255_p4, %s548_s23), 3 }
   0xf   : > { %s721_s26 = sshll.u32 %s772_s23, 2 }
  0x10   : > { %s258_s29 = scalar_lea.vmem %s762_s0, %s721_s26  ;;  %593 = vmatpush3.bf16.msra.mxu0 %v636_v3  ;;  %s274_s19 = scalar_lea.vmem %s765_s3, %s721_s26 }
  0x11   : > { %594 = vmatprep.subr.bf16.mxu0 %v667_v1  ;;  %v642_v9 = vld [vmem:[%s258_s29] sm:$0xff]   ;;  %s283_s24 = scalar_lea.vmem %s766_s4, %s721_s26 }
  0x12   : > { %v571_v10 = vld [vmem:[%s274_s19] sm:$0xff]  }
  0x13   : > { %v572_v12 = vunpack.c.l.bf16 %v571_v10  ;;  %v573_v16 = vunpack.c.h.bf16 %v571_v10 }
  0x14   : > { %595 = vmatpush3.bf16.msra.mxu0 %v637_v4 }
  0x15   : > { %596 = vmatprep.subr.bf16.mxu0 %v667_v1 }
  0x18   : > { %597 = vmatpush3.bf16.msra.mxu0 %v638_v5 }
  0x19   : > { %598 = vmatprep.subr.bf16.mxu0 %v667_v1 }
  0x1c   : > { %599 = vmatpush3.bf16.msra.mxu0 %v639_v6 }
  0x1d   : > { %600 = vmatprep.subr.bf16.mxu0 %v667_v1 }
  0x20   : > { %601 = vmatpush3.bf16.msra.mxu0 %v640_v7 }
  0x21   : > { %602 = vmatprep.subr.bf16.mxu0 %v667_v1 }
  0x24   : > { %603 = vmatpush3.bf16.msra.mxu0 %v641_v8 }
  0x27   : > { %605 = vmatmul.mubr.bf16.vlgmr.msra.gmra.mrb[0].mxu0 %v642_v9 }
  0xfa   : > { %v399_v13 = vpop.f32.mrb[0].mxu0 }
  0xfb   : > { %v400_v14 = vadd.f32 %v554_v11, %v399_v13  ;;  %v606_v15 = vpop.f32.mrb[1].mxu0 }
  0xfc   : > { %v402_v17 = vpop.f32.mrb[2].mxu0 }
  0xfd   : > { %v410_v18 = vadd.f32 %v572_v12, %v400_v14  ;;  %v403_v19 = vadd.f32 %v554_v11, %v402_v17  ;;  %v607_v20 = vpop.f32.mrb[3].mxu0 }
  0xff   : > { %v411_v21 = vadd.f32 %v573_v16, %v403_v19  ;;  %v412_v22 = vmax.f32 %v410_v18, 0.0 }
 0x101   : > { %v413_v23 = vmax.f32 %v411_v21, 0.0 }
 0x103   : > { %v577_v24 = vpack.c.bf16 %v413_v23, %v412_v22 }
 0x105   : > { %578 = vst [vmem:[%s283_s24] sm:$0xff] %v577_v24  }
 0x106 PF: > { %s14_s17 = sadd.s32 1, %s665_s17   ;;  %s767_s15 = smov %s661_s16 }
 0x107   : > { %p11_p5 = scmp.ge.s32.totalorder %s14_s17, 4   ;;  %s768_s16 = smov %s770_s18 }
 0x109   :  { %13 = sbr.rel (!%p11_p5) target bundleno = 2 (0x2), region = 75 }

// kernel: deeplabv3_fcn_forward.30
= control target key start
LH: loop header
LB: loop body
LE: loop exit
PB: predicated region body
PF: predicated region fallthrough
CT: control target
= control target key end

     0   :  { %s600_s12 = smov 0   ;;  %s602_s13 = smov 0   ;;  %s663_s0 = inlined_call_operand.vmem [shape: bf16[32,128], index: 0, kind: input, shape index: {}]   ;;  %s664_s1 = inlined_call_operand.vmem [shape: bf16[128,128], index: 1, kind: input, shape index: {}]   ;;  %s665_s2 = inlined_call_operand.vmem [shape: f32[1,128], index: 2, kind: input, shape index: {}]   ;;  %s666_s3 = inlined_call_operand.vmem [shape: bf16[32,128], index: 3, kind: output, shape index: {}]  }
   0x1   :  { %s604_s14 = smov 0  }
   0x2 LB: > { %s25_s15 = sadd.s32 1, %s572_s13  ;;  %p464_p0 = scmp.ge.s32.totalorder %s576_s14, 1  ;;  %s576_s14 = sphi %s604_s14, %s13_s14   ;;  %s572_s13 = sphi %s602_s13, %s668_s13   ;;  %s568_s12 = sphi %s600_s12, %s667_s12  }
   0x3   : > { %p27_p1 = scmp.ge.s32.totalorder %s25_s15, 2  ;;  %p169_p2 = scmp.lt.s32.totalorder %s576_s14, 3 }
   0x5   : > { %s670_s15 = smov (%p27_p1, %s25_s15), 0  ;;  %p170_p3 = pnand %p464_p0, %p169_p2 }
   0x6   : > { %v545_v0 = vld [vmem:[%s664_s1] sm:$0xff] (!%p170_p3)   ;;  %v578_v1 = vmov (!%p170_p3), 0.0   ;;  %v546_v2 = vld [vmem:[%s664_s1 + $0x8] sm:$0xff] (!%p170_p3)   ;;  %vm579_vm0 = vmmov (!%p170_p3), 0   ;;  %s465_s20 = sshll.u32 (!%p170_p3), %s568_s12, 1  ;;  %v547_v3 = vld [vmem:[%s664_s1 + $0x10] sm:$0xff] (!%p170_p3)  }
   0x7   : > { %173 = sbr.rel (%p170_p3) target bundleno = 258 (0x102), region = 32  ;;  %499 = vmatprep.subr.bf16.mxu0 (!%p170_p3), %v578_v1  ;;  %515 = vmatprep.mubr.msk.bf16.mxu0 (!%p170_p3), %vm579_vm0, %v578_v1  ;;  %p204_p4 = scmp.lt.s32.totalorder (!%p170_p3), %s465_s20, 3  ;;  %v548_v4 = vld [vmem:[%s664_s1 + $0x18] sm:$0xff] (!%p170_p3)   ;;  %v549_v5 = vld [vmem:[%s664_s1 + $0x20] sm:$0xff] (!%p170_p3)   ;;  %v550_v6 = vld [vmem:[%s664_s1 + $0x28] sm:$0xff] (!%p170_p3)  }
   0x8   : > { %500 = vmatpush3.bf16.msra.mxu0 (!%p170_p3), %v545_v0  ;;  %v551_v7 = vld [vmem:[%s664_s1 + $0x30] sm:$0xff] (!%p170_p3)   ;;  %v552_v8 = vld [vmem:[%s664_s1 + $0x38] sm:$0xff] (!%p170_p3)   ;;  %v469_v10 = vld [vmem:[%s665_s2] ss:$0 sm:$0xff] (!%p170_p3) }
   0x9   : > { %501 = vmatprep.subr.bf16.mxu0 (!%p170_p3), %v578_v1 }
   0xc   : > { %502 = vmatpush3.bf16.msra.mxu0 (!%p170_p3), %v546_v2 }
   0xd   : > { %503 = vmatprep.subr.bf16.mxu0 (!%p170_p3), %v578_v1 }
   0xe   : > { %s672_s20 = smov (!%p204_p4, %s465_s20), 3 }
   0xf   : > { %s466_s23 = sshll.u32 %s672_s20, 2 }
  0x10   : > { %s207_s26 = scalar_lea.vmem %s663_s0, %s466_s23  ;;  %504 = vmatpush3.bf16.msra.mxu0 %v547_v3  ;;  %s223_s17 = scalar_lea.vmem %s666_s3, %s466_s23 }
  0x11   : > { %505 = vmatprep.subr.bf16.mxu0 %v578_v1  ;;  %v553_v9 = vld [vmem:[%s207_s26] sm:$0xff]  }
  0x14   : > { %506 = vmatpush3.bf16.msra.mxu0 %v548_v4 }
  0x15   : > { %507 = vmatprep.subr.bf16.mxu0 %v578_v1 }
  0x18   : > { %508 = vmatpush3.bf16.msra.mxu0 %v549_v5 }
  0x19   : > { %509 = vmatprep.subr.bf16.mxu0 %v578_v1 }
  0x1c   : > { %510 = vmatpush3.bf16.msra.mxu0 %v550_v6 }
  0x1d   : > { %511 = vmatprep.subr.bf16.mxu0 %v578_v1 }
  0x20   : > { %512 = vmatpush3.bf16.msra.mxu0 %v551_v7 }
  0x21   : > { %513 = vmatprep.subr.bf16.mxu0 %v578_v1 }
  0x24   : > { %514 = vmatpush3.bf16.msra.mxu0 %v552_v8 }
  0x27   : > { %516 = vmatmul.mubr.bf16.vlgmr.msra.gmra.mrb[0].mxu0 %v553_v9 }
  0xfa   : > { %v339_v11 = vpop.f32.mrb[0].mxu0 }
  0xfb   : > { %v517_v12 = vpop.f32.mrb[1].mxu0  ;;  %v340_v14 = vadd.f32 %v469_v10, %v339_v11 }
  0xfc   : > { %v342_v13 = vpop.f32.mrb[2].mxu0 }
  0xfd   : > { %v343_v15 = vadd.f32 %v469_v10, %v342_v13  ;;  %v518_v16 = vpop.f32.mrb[3].mxu0 }
  0xff   : > { %v488_v17 = vpack.c.bf16 %v343_v15, %v340_v14 }
 0x101   : > { %489 = vst [vmem:[%s223_s17] sm:$0xff] %v488_v17  }
 0x102 PF: > { %s13_s14 = sadd.s32 1, %s576_s14   ;;  %s667_s12 = smov %s572_s13 }
 0x103   : > { %p10_p5 = scmp.ge.s32.totalorder %s13_s14, 4   ;;  %s668_s13 = smov %s670_s15 }
 0x105   :  { %12 = sbr.rel (!%p10_p5) target bundleno = 2 (0x2), region = 68 }

// kernel: deeplabv3_fcn_forward.34
= control target key start
LH: loop header
LB: loop body
LE: loop exit
PB: predicated region body
PF: predicated region fallthrough
CT: control target
= control target key end

     0   :  { %s656_s12 = smov 0   ;;  %s658_s13 = smov 0   ;;  %s744_s0 = inlined_call_operand.vmem [shape: bf16[32,128], index: 0, kind: input, shape index: {}]   ;;  %s745_s1 = inlined_call_operand.vmem [shape: bf16[128,256], index: 1, kind: input, shape index: {}]   ;;  %s746_s2 = inlined_call_operand.vmem [shape: f32[1,256], index: 2, kind: input, shape index: {}]   ;;  %s747_s3 = inlined_call_operand.vmem [shape: bf16[32,256], index: 3, kind: output, shape index: {}]  }
   0x1   :  { %s660_s14 = smov 0  }
   0x2 LB: > { %s25_s15 = sadd.s32 1, %s629_s13  ;;  %p531_p0 = scmp.ge.s32.totalorder %s633_s14, 1  ;;  %s633_s14 = sphi %s660_s14, %s13_s14   ;;  %s629_s13 = sphi %s658_s13, %s749_s13   ;;  %s625_s12 = sphi %s656_s12, %s748_s12  }
   0x3   : > { %p27_p1 = scmp.ge.s32.totalorder %s25_s15, 2  ;;  %p173_p2 = scmp.lt.s32.totalorder %s633_s14, 3 }
   0x5   : > { %s751_s15 = smov (%p27_p1, %s25_s15), 0  ;;  %p174_p3 = pnand %p531_p0, %p173_p2 }
   0x6   : > { %v586_v0 = vld [vmem:[%s745_s1 + $0x4] ss:$8 sps:$4 sm:$0xff] (!%p174_p3)   ;;  %s532_s18 = sshll.u32 (!%p174_p3), %s625_s12, 1  ;;  %v588_v1 = vld [vmem:[%s745_s1] ss:$8 sps:$4 sm:$0xff] (!%p174_p3)   ;;  %v635_v2 = vmov (!%p174_p3), 0   ;;  %v261_v18 = vlaneseq (!%p174_p3) }
   0x7   : > { %177 = sbr.rel (%p174_p3) target bundleno = 259 (0x103), region = 32  ;;  %389 = vmatprep.mubr.bf16.mxu0 (!%p174_p3), %v635_v2  ;;  %p212_p4 = scmp.lt.s32.totalorder (!%p174_p3), %s532_s18, 3  ;;  %357 = vmatprep.subr.bf16.mxu0 (!%p174_p3), %v586_v0  ;;  %v589_v3 = vld [vmem:[%s745_s1 + $0x14] ss:$8 sps:$4 sm:$0xff] (!%p174_p3)   ;;  %v591_v4 = vld [vmem:[%s745_s1 + $0x10] ss:$8 sps:$4 sm:$0xff] (!%p174_p3)  }
   0x8   : > { %358 = vmatpush1.bf16.msra.mxu0 (!%p174_p3), %v588_v1  ;;  %v592_v5 = vld [vmem:[%s745_s1 + $0x24] ss:$8 sps:$4 sm:$0xff] (!%p174_p3)   ;;  %v594_v6 = vld [vmem:[%s745_s1 + $0x20] ss:$8 sps:$4 sm:$0xff] (!%p174_p3)   ;;  %v595_v7 = vld [vmem:[%s745_s1 + $0x34] ss:$8 sps:$4 sm:$0xff] (!%p174_p3)  }
   0x9   : > { %359 = vmatprep.subr.bf16.mxu0 (!%p174_p3), %v589_v3  ;;  %v597_v8 = vld [vmem:[%s745_s1 + $0x30] ss:$8 sps:$4 sm:$0xff] (!%p174_p3)   ;;  %v598_v9 = vld [vmem:[%s745_s1 + $0x44] ss:$8 sps:$4 sm:$0xff] (!%p174_p3)   ;;  %v600_v10 = vld [vmem:[%s745_s1 + $0x40] ss:$8 sps:$4 sm:$0xff] (!%p174_p3)  }
   0xa   : > { %v601_v11 = vld [vmem:[%s745_s1 + $0x54] ss:$8 sps:$4 sm:$0xff] (!%p174_p3)   ;;  %v603_v12 = vld [vmem:[%s745_s1 + $0x50] ss:$8 sps:$4 sm:$0xff] (!%p174_p3)   ;;  %v604_v13 = vld [vmem:[%s745_s1 + $0x64] ss:$8 sps:$4 sm:$0xff] (!%p174_p3)  }
   0xb   : > { %v606_v14 = vld [vmem:[%s745_s1 + $0x60] ss:$8 sps:$4 sm:$0xff] (!%p174_p3)   ;;  %v607_v15 = vld [vmem:[%s745_s1 + $0x74] ss:$8 sps:$4 sm:$0xff] (!%p174_p3)   ;;  %v609_v16 = vld [vmem:[%s745_s1 + $0x70] ss:$8 sps:$4 sm:$0xff] (!%p174_p3)  }
   0xc   : > { %360 = vmatpush1.bf16.msra.mxu0 (!%p174_p3), %v591_v4  ;;  %v262_v19 = vshrl.u32 (!%p174_p3), %v261_v18, 7  ;;  %v259_v21 = vld [vmem:[%s746_s2] sm:$0x3] (!%p174_p3) }
   0xd   : > { %361 = vmatprep.subr.bf16.mxu0 (!%p174_p3), %v592_v5 }
   0xe   : > { %s753_s18 = smov (!%p212_p4, %s532_s18), 3  ;;  %v263_v20 = vsub.s32 0, %v262_v19  ;;  %v267_v22 = vsub.s32 1, %v262_v19 }
   0xf   : > { %s533_s27 = sshll.u32 %s753_s18, 2  ;;  %s558_s5 = sshll.u32 %s753_s18, 3 }
  0x10   : > { %s215_s7 = scalar_lea.vmem %s744_s0, %s533_s27  ;;  %362 = vmatpush1.bf16.msra.mxu0 %v594_v6  ;;  %v264_v23 = vrot.slane %v259_v21, %v263_v20  ;;  %v268_v24 = vrot.slane %v259_v21, %v267_v22  ;;  %s237_s8 = scalar_lea.vmem %s747_s3, %s558_s5 }
  0x11   : > { %363 = vmatprep.subr.bf16.mxu0 %v595_v7  ;;  %v610_v17 = vld [vmem:[%s215_s7] sm:$0xff]  }
  0x14   : > { %364 = vmatpush1.bf16.msra.mxu0 %v597_v8 }
  0x15   : > { %365 = vmatprep.subr.bf16.mxu0 %v598_v9 }
  0x18   : > { %366 = vmatpush1.bf16.msra.mxu0 %v600_v10 }
  0x19   : > { %367 = vmatprep.subr.bf16.mxu0 %v601_v11 }
  0x1c   : > { %368 = vmatpush1.bf16.msra.mxu0 %v603_v12 }
  0x1d   : > { %369 = vmatprep.subr.bf16.mxu0 %v604_v13 }
  0x20   : > { %370 = vmatpush1.bf16.msra.mxu0 %v606_v14 }
  0x21   : > { %371 = vmatprep.subr.bf16.mxu0 %v607_v15 }
  0x24   : > { %372 = vmatpush1.bf16.msra.mxu0 %v609_v16 }
  0x27   : > { %390 = vmatmul.mubr.bf16.vlgmr.msra.gmra.mrb[0].mxu0 %v610_v17 }
  0xfa   : > { %v391_v25 = vpop.f32.mrb[0].mxu0 }
  0xfb   : > { %v392_v26 = vadd.f32 %v391_v25, %v264_v23  ;;  %v393_v27 = vpop.f32.mrb[1].mxu0 }
  0xfc   : > { %v394_v28 = vadd.f32 %v393_v27, %v268_v24  ;;  %v395_v29 = vpop.f32.mrb[2].mxu0 }
  0xfd   : > { %v396_v30 = vadd.f32 %v395_v29, %v264_v23  ;;  %v397_v31 = vpop.f32.mrb[3].mxu0 }
  0xfe   : > { %v559_v32 = vpack.c.bf16 %v394_v28, %v392_v26  ;;  %v398_v33 = vadd.f32 %v397_v31, %v268_v24 }
 0x100   : > { %412 = vst [vmem:[%s237_s8] sm:$0xff] %v559_v32  ;;  %v560_v34 = vpack.c.bf16 %v398_v33, %v396_v30 }
 0x102   : > { %413 = vst [vmem:[%s237_s8 + $0x8] sm:$0xff] %v560_v34 }
 0x103 PF: > { %s13_s14 = sadd.s32 1, %s633_s14   ;;  %s748_s12 = smov %s629_s13 }
 0x104   : > { %p10_p5 = scmp.ge.s32.totalorder %s13_s14, 4   ;;  %s749_s13 = smov %s751_s15 }
 0x106   :  { %12 = sbr.rel (!%p10_p5) target bundleno = 2 (0x2), region = 68 }

// kernel: deeplabv3_fcn_forward.32
= control target key start
LH: loop header
LB: loop body
LE: loop exit
PB: predicated region body
PF: predicated region fallthrough
CT: control target
= control target key end

     0   :  { %s1566_s12 = smov 0   ;;  %s1568_s13 = smov 0   ;;  %s1836_s0 = inlined_call_operand.vmem [shape: bf16[32,1152], index: 0, kind: input, shape index: {}]   ;;  %s1837_s1 = inlined_call_operand.vmem [shape: bf16[1152,128], index: 1, kind: input, shape index: {}]   ;;  %s1838_s2 = inlined_call_operand.vmem [shape: f32[1,128], index: 2, kind: input, shape index: {}]   ;;  %s1839_s3 = inlined_call_operand.vmem [shape: bf16[32,128], index: 3, kind: output, shape index: {}]  }
   0x1   :  { %s1570_s14 = smov 0  }
   0x2 LB: > { %s25_s15 = sadd.s32 1, %s1538_s13  ;;  %p1193_p0 = scmp.ge.s32.totalorder %s1542_s14, 1  ;;  %s1542_s14 = sphi %s1570_s14, %s13_s14   ;;  %s1538_s13 = sphi %s1568_s13, %s1841_s13   ;;  %s1534_s12 = sphi %s1566_s12, %s1840_s12  }
   0x3   : > { %p27_p1 = scmp.ge.s32.totalorder %s25_s15, 2  ;;  %p170_p2 = scmp.lt.s32.totalorder %s1542_s14, 3 }
   0x5   : > { %s1843_s15 = smov (%p27_p1, %s25_s15), 0  ;;  %p171_p3 = pnand %p1193_p0, %p170_p2 }
   0x6   : > { %v1435_v0 = vld [vmem:[%s1837_s1 + $0x40] sm:$0xff] (!%p171_p3)   ;;  %v1439_v4 = vld [vmem:[%s1837_s1 + $0x48] sm:$0xff] (!%p171_p3)   ;;  %v1443_v8 = vld [vmem:[%s1837_s1 + $0x50] sm:$0xff] (!%p171_p3)   ;;  %s1194_s21 = sshll.u32 (!%p171_p3), %s1534_s12, 1  ;;  %vm1545_vm0 = vmmov (!%p171_p3), 0  }
   0x7   : > { %174 = sbr.rel (%p171_p3) target bundleno = 324 (0x144), region = 32  ;;  %v1436_v1 = vld [vmem:[%s1837_s1] sm:$0xff] (!%p171_p3)   ;;  %1291 = vmatprep.subr.bf16.mxu0 (!%p171_p3), %v1435_v0  ;;  %v1440_v5 = vld [vmem:[%s1837_s1 + $0x8] sm:$0xff] (!%p171_p3)   ;;  %v1444_v9 = vld [vmem:[%s1837_s1 + $0x10] sm:$0xff] (!%p171_p3)   ;;  %p206_p4 = scmp.lt.s32.totalorder (!%p171_p3), %s1194_s21, 3 }
   0x8   : > { %v1437_v2 = vld [vmem:[%s1837_s1 + $0xc0] sm:$0xff] (!%p171_p3)   ;;  %1292 = vmatpush3.bf16.msra.mxu0 (!%p171_p3), %v1436_v1  ;;  %v1441_v6 = vld [vmem:[%s1837_s1 + $0xc8] sm:$0xff] (!%p171_p3)   ;;  %v1445_v10 = vld [vmem:[%s1837_s1 + $0xd0] sm:$0xff] (!%p171_p3)  }
   0x9   : > { %v1438_v3 = vld [vmem:[%s1837_s1 + $0x80] sm:$0xff] (!%p171_p3)   ;;  %1313 = vmatprep.subr.bf16.mxu1 (!%p171_p3), %v1437_v2  ;;  %1293 = vmatprep.subr.bf16.mxu0 (!%p171_p3), %v1439_v4  ;;  %v1442_v7 = vld [vmem:[%s1837_s1 + $0x88] sm:$0xff] (!%p171_p3)   ;;  %v1446_v11 = vld [vmem:[%s1837_s1 + $0x90] sm:$0xff] (!%p171_p3)  }
   0xa   : > { %1314 = vmatpush3.bf16.msra.mxu1 (!%p171_p3), %v1438_v3  ;;  %v1447_v12 = vld [vmem:[%s1837_s1 + $0x58] sm:$0xff] (!%p171_p3)   ;;  %v1451_v16 = vld [vmem:[%s1837_s1 + $0x60] sm:$0xff] (!%p171_p3)   ;;  %v1455_v20 = vld [vmem:[%s1837_s1 + $0x68] sm:$0xff] (!%p171_p3)  }
   0xb   : > { %1315 = vmatprep.subr.bf16.mxu1 (!%p171_p3), %v1441_v6  ;;  %v1448_v13 = vld [vmem:[%s1837_s1 + $0x18] sm:$0xff] (!%p171_p3)   ;;  %v1452_v17 = vld [vmem:[%s1837_s1 + $0x20] sm:$0xff] (!%p171_p3)   ;;  %v1456_v21 = vld [vmem:[%s1837_s1 + $0x28] sm:$0xff] (!%p171_p3)   ;;  %v1544_v6 = vmov (!%p171_p3), 0.0  }
   0xc   : > { %1294 = vmatpush3.bf16.msra.mxu0 (!%p171_p3), %v1440_v5  ;;  %v1449_v14 = vld [vmem:[%s1837_s1 + $0xd8] sm:$0xff] (!%p171_p3)   ;;  %v1453_v18 = vld [vmem:[%s1837_s1 + $0xe0] sm:$0xff] (!%p171_p3)   ;;  %v1457_v22 = vld [vmem:[%s1837_s1 + $0xe8] sm:$0xff] (!%p171_p3)  }
   0xd   : > { %1295 = vmatprep.subr.bf16.mxu0 (!%p171_p3), %v1443_v8  ;;  %v1450_v15 = vld [vmem:[%s1837_s1 + $0x98] sm:$0xff] (!%p171_p3)   ;;  %v1454_v19 = vld [vmem:[%s1837_s1 + $0xa0] sm:$0xff] (!%p171_p3)   ;;  %v1458_v23 = vld [vmem:[%s1837_s1 + $0xa8] sm:$0xff] (!%p171_p3)  }
   0xe   : > { %1316 = vmatpush3.bf16.msra.mxu1 %v1442_v7  ;;  %s1845_s21 = smov (!%p206_p4, %s1194_s21), 3  ;;  %v1459_v24 = vld [vmem:[%s1837_s1 + $0x70] sm:$0xff]   ;;  %v1463_v28 = vld [vmem:[%s1837_s1 + $0x78] sm:$0xff]   ;;  %v1470_v34 = vld [vmem:[%s1837_s1 + $0x140] sm:$0xff]  }
   0xf   : > { %1317 = vmatprep.subr.bf16.mxu1 %v1445_v10  ;;  %s1408_s20 = smul.u32 36, %s1845_s21  ;;  %v1460_v25 = vld [vmem:[%s1837_s1 + $0x30] sm:$0xff]   ;;  %v1464_v29 = vld [vmem:[%s1837_s1 + $0x38] sm:$0xff]   ;;  %v1474_v37 = vld [vmem:[%s1837_s1 + $0x100] sm:$0xff]  }
  0x10   : > { %1296 = vmatpush3.bf16.msra.mxu0 %v1444_v9  ;;  %v1461_v26 = vld [vmem:[%s1837_s1 + $0xf0] sm:$0xff]   ;;  %v1465_v30 = vld [vmem:[%s1837_s1 + $0xf8] sm:$0xff]   ;;  %v1475_v38 = vld [vmem:[%s1837_s1 + $0x1c0] sm:$0xff]  }
  0x11   : > { %1297 = vmatprep.subr.bf16.mxu0 %v1447_v12  ;;  %v1462_v27 = vld [vmem:[%s1837_s1 + $0xb0] sm:$0xff]   ;;  %s1680_s4 = scalar_lea.vmem %s1836_s0, %s1408_s20  ;;  %v1469_v33 = vld [vmem:[%s1837_s1 + $0xb8] sm:$0xff]   ;;  %v1476_v39 = vld [vmem:[%s1837_s1 + $0x180] sm:$0xff]  }
  0x12   : > { %1318 = vmatpush3.bf16.msra.mxu1 %v1446_v11  ;;  %v1466_v31 = vld [vmem:[%s1680_s4] ss:$36 sps:$4 sm:$0xff]   ;;  %v1471_v35 = vld [vmem:[%s1680_s4 + $0x8] ss:$36 sps:$4 sm:$0xff]   ;;  %v1481_v44 = vld [vmem:[%s1837_s1 + $0x150] sm:$0xff]  }
  0x13   : > { %1319 = vmatprep.subr.bf16.mxu1 %v1449_v14  ;;  %v1468_v32 = vld [vmem:[%s1680_s4 + $0x4] ss:$36 sps:$4 sm:$0xff]   ;;  %v1473_v36 = vld [vmem:[%s1680_s4 + $0xc] ss:$36 sps:$4 sm:$0xff]   ;;  %v1485_v48 = vld [vmem:[%s1837_s1 + $0x158] sm:$0xff]  }
  0x14   : > { %1298 = vmatpush3.bf16.msra.mxu0 %v1448_v13  ;;  %900 = vmatprep.mubr.bf16.mxu0 %v1468_v32  ;;  %v1477_v40 = vld [vmem:[%s1837_s1 + $0x148] sm:$0xff]   ;;  %v1482_v45 = vld [vmem:[%s1837_s1 + $0x110] sm:$0xff]   ;;  %v1486_v49 = vld [vmem:[%s1837_s1 + $0x118] sm:$0xff]  }
  0x15   : > { %1299 = vmatprep.subr.bf16.mxu0 %v1451_v16  ;;  %941 = vmatprep.mubr.bf16.mxu1 %v1473_v36  ;;  %v1478_v41 = vld [vmem:[%s1837_s1 + $0x108] sm:$0xff]   ;;  %v1483_v46 = vld [vmem:[%s1837_s1 + $0x1d0] sm:$0xff]   ;;  %v1487_v50 = vld [vmem:[%s1837_s1 + $0x1d8] sm:$0xff]  }
  0x16   : > { %1320 = vmatpush3.bf16.msra.mxu1 %v1450_v15  ;;  %v1479_v42 = vld [vmem:[%s1837_s1 + $0x1c8] sm:$0xff]   ;;  %v1484_v47 = vld [vmem:[%s1837_s1 + $0x190] sm:$0xff]   ;;  %v1488_v51 = vld [vmem:[%s1837_s1 + $0x198] sm:$0xff]  }
  0x17   : > { %1321 = vmatprep.subr.bf16.mxu1 %v1453_v18  ;;  %v1480_v43 = vld [vmem:[%s1837_s1 + $0x188] sm:$0xff]   ;;  %v1489_v52 = vld [vmem:[%s1837_s1 + $0x160] sm:$0xff]   ;;  %v1497_v60 = vld [vmem:[%s1837_s1 + $0x170] sm:$0xff]  }
  0x18   : > { %1300 = vmatpush3.bf16.msra.mxu0 %v1452_v17  ;;  %v1490_v53 = vld [vmem:[%s1837_s1 + $0x120] sm:$0xff]   ;;  %v1493_v56 = vld [vmem:[%s1837_s1 + $0x168] sm:$0xff]   ;;  %v1498_v61 = vld [vmem:[%s1837_s1 + $0x130] sm:$0xff]  }
  0x19   : > { %1301 = vmatprep.subr.bf16.mxu0 %v1455_v20  ;;  %v1491_v54 = vld [vmem:[%s1837_s1 + $0x1e0] sm:$0xff]   ;;  %v1494_v57 = vld [vmem:[%s1837_s1 + $0x128] sm:$0xff]   ;;  %v1499_v62 = vld [vmem:[%s1837_s1 + $0x1f0] sm:$0xff]  }
  0x1a   : > { %1322 = vmatpush3.bf16.msra.mxu1 %v1454_v19  ;;  %v1492_v55 = vld [vmem:[%s1837_s1 + $0x1a0] sm:$0xff]   ;;  %v1495_v58 = vld [vmem:[%s1837_s1 + $0x1e8] sm:$0xff]   ;;  %v1500_v63 = vld [vmem:[%s1837_s1 + $0x1b0] sm:$0xff]  }
  0x1b   : > { %1323 = vmatprep.subr.bf16.mxu1 %v1457_v22  ;;  %v1496_v59 = vld [vmem:[%s1837_s1 + $0x1a8] sm:$0xff]   ;;  %v1501_v0 = vld [vmem:[%s1837_s1 + $0x178] sm:$0xff]   ;;  %v1504_v3 = vld [vmem:[%s1680_s4 + $0x10] ss:$36 sps:$4 sm:$0xff]  }
  0x1c   : > { %1302 = vmatpush3.bf16.msra.mxu0 %v1456_v21  ;;  %v1502_v1 = vld [vmem:[%s1837_s1 + $0x138] sm:$0xff]   ;;  %v1511_v9 = vld [vmem:[%s1837_s1 + $0x200] sm:$0xff]   ;;  %v1512_v10 = vld [vmem:[%s1837_s1 + $0x208] sm:$0xff]  }
  0x1d   : > { %1303 = vmatprep.subr.bf16.mxu0 %v1459_v24  ;;  %v1503_v2 = vld [vmem:[%s1837_s1 + $0x1f8] sm:$0xff]   ;;  %v1513_v11 = vld [vmem:[%s1837_s1 + $0x210] sm:$0xff]   ;;  %v1515_v13 = vld [vmem:[%s1837_s1 + $0x220] sm:$0xff]  }
  0x1e   : > { %1324 = vmatpush3.bf16.msra.mxu1 %v1458_v23  ;;  %v1506_v4 = vld [vmem:[%s1680_s4 + $0x14] ss:$36 sps:$4 sm:$0xff]   ;;  %v1510_v8 = vld [vmem:[%s1680_s4 + $0x1c] ss:$36 sps:$4 sm:$0xff]   ;;  %v1516_v14 = vld [vmem:[%s1837_s1 + $0x228] sm:$0xff]  }
  0x1f   : > { %1325 = vmatprep.subr.bf16.mxu1 %v1461_v26  ;;  %v1507_v5 = vld [vmem:[%s1837_s1 + $0x1b8] sm:$0xff]   ;;  %v1517_v15 = vld [vmem:[%s1837_s1 + $0x230] sm:$0xff]   ;;  %v1519_v17 = vld [vmem:[%s1680_s4 + $0x20] ss:$36 sps:$4 sm:$0xff]  }
  0x20   : > { %1304 = vmatpush3.bf16.msra.mxu0 %v1460_v25  ;;  %v1508_v7 = vld [vmem:[%s1680_s4 + $0x18] ss:$36 sps:$4 sm:$0xff]   ;;  %v1198_v19 = vld [vmem:[%s1838_s2] ss:$0 sm:$0xff]  ;;  %s1197_s4 = sshll.u32 %s1845_s21, 2 }
  0x21   : > { %1305 = vmatprep.subr.bf16.mxu0 %v1463_v28  ;;  %v1514_v12 = vld [vmem:[%s1837_s1 + $0x218] sm:$0xff]   ;;  %s226_s7 = scalar_lea.vmem %s1839_s3, %s1197_s4 }
  0x22   : > { %1326 = vmatpush3.bf16.msra.mxu1 %v1462_v27  ;;  %v1518_v16 = vld [vmem:[%s1837_s1 + $0x238] sm:$0xff]  }
  0x23   : > { %1327 = vmatprep.subr.bf16.mxu1 %v1465_v30 }
  0x24   : > { %1306 = vmatpush3.bf16.msra.mxu0 %v1464_v29 }
  0x25   : > { %1335 = vmatprep.subr.bf16.mxu0 %v1470_v34 }
  0x26   : > { %1328 = vmatpush3.bf16.msra.mxu1 %v1469_v33 }
  0x27   : > { %901 = vmatmul.mubr.bf16.vlgmr.msra.gmra.mrb[0].mxu0 %v1466_v31  ;;  %1357 = vmatprep.subr.bf16.mxu1 %v1475_v38 }
  0x28   : > { %1336 = vmatpush3.bf16.msra.mxu0 %v1474_v37  ;;  %982 = vmatprep.mubr.bf16.mxu0 %v1506_v4 }
  0x29   : > { %942 = vmatmul.mubr.bf16.vlgmr.msra.gmra.mrb[0].mxu1 %v1471_v35  ;;  %1337 = vmatprep.subr.bf16.mxu0 %v1477_v40 }
  0x2a   : > { %1358 = vmatpush3.bf16.msra.mxu1 %v1476_v39  ;;  %1023 = vmatprep.mubr.bf16.mxu1 %v1510_v8 }
  0x2b   : > { %1359 = vmatprep.subr.bf16.mxu1 %v1479_v42 }
  0x2c   : > { %1338 = vmatpush3.bf16.msra.mxu0 %v1478_v41 }
  0x2d   : > { %1339 = vmatprep.subr.bf16.mxu0 %v1481_v44 }
  0x2e   : > { %1360 = vmatpush3.bf16.msra.mxu1 %v1480_v43 }
  0x2f   : > { %1361 = vmatprep.subr.bf16.mxu1 %v1483_v46 }
  0x30   : > { %1340 = vmatpush3.bf16.msra.mxu0 %v1482_v45 }
  0x31   : > { %1341 = vmatprep.subr.bf16.mxu0 %v1485_v48 }
  0x32   : > { %1362 = vmatpush3.bf16.msra.mxu1 %v1484_v47 }
  0x33   : > { %1363 = vmatprep.subr.bf16.mxu1 %v1487_v50 }
  0x34   : > { %1342 = vmatpush3.bf16.msra.mxu0 %v1486_v49 }
  0x35   : > { %1343 = vmatprep.subr.bf16.mxu0 %v1489_v52 }
  0x36   : > { %1364 = vmatpush3.bf16.msra.mxu1 %v1488_v51 }
  0x37   : > { %1365 = vmatprep.subr.bf16.mxu1 %v1491_v54 }
  0x38   : > { %1344 = vmatpush3.bf16.msra.mxu0 %v1490_v53 }
  0x39   : > { %1345 = vmatprep.subr.bf16.mxu0 %v1493_v56 }
  0x3a   : > { %1366 = vmatpush3.bf16.msra.mxu1 %v1492_v55 }
  0x3b   : > { %1367 = vmatprep.subr.bf16.mxu1 %v1495_v58 }
  0x3c   : > { %1346 = vmatpush3.bf16.msra.mxu0 %v1494_v57 }
  0x3d   : > { %1347 = vmatprep.subr.bf16.mxu0 %v1497_v60 }
  0x3e   : > { %1368 = vmatpush3.bf16.msra.mxu1 %v1496_v59 }
  0x3f   : > { %1369 = vmatprep.subr.bf16.mxu1 %v1499_v62 }
  0x40   : > { %1348 = vmatpush3.bf16.msra.mxu0 %v1498_v61 }
  0x41   : > { %1349 = vmatprep.subr.bf16.mxu0 %v1501_v0 }
  0x42   : > { %1370 = vmatpush3.bf16.msra.mxu1 %v1500_v63 }
  0x43   : > { %1371 = vmatprep.subr.bf16.mxu1 %v1503_v2 }
  0x44   : > { %1350 = vmatpush3.bf16.msra.mxu0 %v1502_v1 }
  0x45   : > { %1388 = vmatprep.subr.bf16.mxu0 %v1544_v6 }
  0x46   : > { %1372 = vmatpush3.bf16.msra.mxu1 %v1507_v5 }
  0x47   : > { %983 = vmatmul.mubr.bf16.vlgmr.msra.gmra.mrb[4].mxu0 %v1504_v3 }
  0x48   : > { %1404 = vmatprep.mubr.msk.bf16.mxu0 %vm1545_vm0, %v1544_v6  ;;  %1389 = vmatpush3.bf16.msra.mxu0 %v1511_v9 }
  0x49   : > { %1024 = vmatmul.mubr.bf16.vlgmr.msra.gmra.mrb[4].mxu1 %v1508_v7  ;;  %1390 = vmatprep.subr.bf16.mxu0 %v1544_v6 }
  0x4c   : > { %1391 = vmatpush3.bf16.msra.mxu0 %v1512_v10 }
  0x4d   : > { %1392 = vmatprep.subr.bf16.mxu0 %v1544_v6 }
  0x50   : > { %1393 = vmatpush3.bf16.msra.mxu0 %v1513_v11 }
  0x51   : > { %1394 = vmatprep.subr.bf16.mxu0 %v1544_v6 }
  0x54   : > { %1395 = vmatpush3.bf16.msra.mxu0 %v1514_v12 }
  0x55   : > { %1396 = vmatprep.subr.bf16.mxu0 %v1544_v6 }
  0x58   : > { %1397 = vmatpush3.bf16.msra.mxu0 %v1515_v13 }
  0x59   : > { %1398 = vmatprep.subr.bf16.mxu0 %v1544_v6 }
  0x5c   : > { %1399 = vmatpush3.bf16.msra.mxu0 %v1516_v14 }
  0x5d   : > { %1400 = vmatprep.subr.bf16.mxu0 %v1544_v6 }
  0x60   : > { %1401 = vmatpush3.bf16.msra.mxu0 %v1517_v15 }
  0x61   : > { %1402 = vmatprep.subr.bf16.mxu0 %v1544_v6 }
  0x64   : > { %1403 = vmatpush3.bf16.msra.mxu0 %v1518_v16 }
  0x67   : > { %1405 = vmatmul.mubr.bf16.vlgmr.msra.gmra.mrb[8].mxu0 %v1519_v17 }
  0xfa   : > { %v1307_v18 = vpop.f32.mrb[0].mxu0 }
  0xfb   : > { %v1308_v20 = vpop.f32.mrb[1].mxu0 }
  0xfc   : > { %v1309_v21 = vadd.f32 %v1308_v20, %v1307_v18  ;;  %v1310_v22 = vpop.f32.mrb[2].mxu0  ;;  %v1329_v23 = vpop.f32.mrb[0].mxu1 }
  0xfd   : > { %v1311_v24 = vpop.f32.mrb[3].mxu0  ;;  %v1330_v27 = vpop.f32.mrb[1].mxu1 }
  0xfe   : > { %v903_v25 = vadd.f32 %v1309_v21, %v1198_v19  ;;  %v1312_v26 = vadd.f32 %v1311_v24, %v1310_v22  ;;  %v1331_v28 = vadd.f32 %v1330_v27, %v1329_v23  ;;  %v1332_v29 = vpop.f32.mrb[2].mxu1 }
  0xff   : > { %v1333_v31 = vpop.f32.mrb[3].mxu1 }
 0x100   : > { %v906_v30 = vadd.f32 %v1312_v26, %v1198_v19  ;;  %v944_v32 = vadd.f32 %v1331_v28, %v903_v25  ;;  %v1334_v33 = vadd.f32 %v1333_v31, %v1332_v29 }
 0x102   : > { %v947_v34 = vadd.f32 %v1334_v33, %v906_v30 }
 0x11a   : > { %v1351_v35 = vpop.f32.mrb[4].mxu0 }
 0x11b   : > { %v1352_v36 = vpop.f32.mrb[5].mxu0 }
 0x11c   : > { %v1353_v37 = vadd.f32 %v1352_v36, %v1351_v35  ;;  %v1354_v38 = vpop.f32.mrb[6].mxu0  ;;  %v1373_v39 = vpop.f32.mrb[4].mxu1 }
 0x11d   : > { %v1355_v40 = vpop.f32.mrb[7].mxu0  ;;  %v1374_v43 = vpop.f32.mrb[5].mxu1 }
 0x11e   : > { %v985_v41 = vadd.f32 %v1353_v37, %v944_v32  ;;  %v1356_v42 = vadd.f32 %v1355_v40, %v1354_v38  ;;  %v1375_v44 = vadd.f32 %v1374_v43, %v1373_v39  ;;  %v1376_v45 = vpop.f32.mrb[6].mxu1 }
 0x11f   : > { %v1377_v47 = vpop.f32.mrb[7].mxu1 }
 0x120   : > { %v988_v46 = vadd.f32 %v1356_v42, %v947_v34  ;;  %v1378_v48 = vadd.f32 %v1377_v47, %v1376_v45  ;;  %v1026_v49 = vadd.f32 %v1375_v44, %v985_v41 }
 0x122   : > { %v1029_v50 = vadd.f32 %v1378_v48, %v988_v46 }
 0x13a   : > { %v1066_v51 = vpop.f32.mrb[8].mxu0 }
 0x13b   : > { %v1067_v52 = vadd.f32 %v1066_v51, %v1026_v49  ;;  %v1406_v53 = vpop.f32.mrb[9].mxu0 }
 0x13c   : > { %v1069_v54 = vpop.f32.mrb[10].mxu0 }
 0x13d   : > { %v1070_v55 = vadd.f32 %v1069_v54, %v1029_v50  ;;  %v1407_v56 = vpop.f32.mrb[11].mxu0  ;;  %v1073_v57 = vmax.f32 %v1067_v52, 0.0 }
 0x13f   : > { %v1074_v58 = vmax.f32 %v1070_v55, 0.0 }
 0x141   : > { %v1289_v59 = vpack.c.bf16 %v1074_v58, %v1073_v57 }
 0x143   : > { %1290 = vst [vmem:[%s226_s7] sm:$0xff] %v1289_v59  }
 0x144 PF: > { %s13_s14 = sadd.s32 1, %s1542_s14   ;;  %s1840_s12 = smov %s1538_s13 }
 0x145   : > { %p10_p5 = scmp.ge.s32.totalorder %s13_s14, 4   ;;  %s1841_s13 = smov %s1843_s15 }
 0x147   :  { %12 = sbr.rel (!%p10_p5) target bundleno = 2 (0x2), region = 68 }

// kernel: deeplabv3_fcn_forward.37
= control target key start
LH: loop header
LB: loop body
LE: loop exit
PB: predicated region body
PF: predicated region fallthrough
CT: control target
= control target key end

     0   :  { %s837_s12 = smov 0   ;;  %s839_s13 = smov 0   ;;  %s982_s0 = inlined_call_operand.vmem [shape: bf16[32,128], index: 0, kind: input, shape index: {}]   ;;  %s983_s1 = inlined_call_operand.vmem [shape: bf16[128,384], index: 1, kind: input, shape index: {}]   ;;  %s984_s2 = inlined_call_operand.vmem [shape: f32[1,384], index: 2, kind: input, shape index: {}]   ;;  %s985_s3 = inlined_call_operand.vmem [shape: bf16[32,384], index: 3, kind: output, shape index: {}]  }
   0x1   :  { %s841_s14 = smov 0   ;;  %s843_s15 = smov 0  }
   0x2   :  { %s845_s16 = smov 0   ;;  %s847_s17 = smov 0  }
   0x3   :  { %s849_s18 = smov 0   ;;  %s851_s19 = smov 0  }
   0x4   :  { %s853_s20 = smov 0  }
   0x5 LB: > { %s594_s21 = sadd.s32 4294967295, %s813_s20   ;;  %s22_s22 = sadd.s32 1, %s805_s18  ;;  %s813_s20 = sphi %s853_s20, %s13_s20   ;;  %s809_s19 = sphi %s851_s19, %s994_s19   ;;  %s805_s18 = sphi %s849_s18, %s993_s18   ;;  %s801_s17 = sphi %s847_s17, %s992_s17   ;;  %s797_s16 = sphi %s845_s16, %s991_s16   ;;  %s793_s15 = sphi %s843_s15, %s990_s15   ;;  %s789_s14 = sphi %s841_s14, %s989_s14   ;;  %s785_s13 = sphi %s839_s13, %s988_s13   ;;  %s781_s12 = sphi %s837_s12, %s987_s12  }
   0x6   : > { %p23_p0 = scmp.ge.s32.totalorder %s22_s22, 3  ;;  %s25_s23 = sadd.s32 1, %s809_s19 }
   0x7   : > { %s58_s24 = sadd.s32 1, %s793_s15  ;;  %p65_p1 = scmp.ne.s32.totalorder %s793_s15, %s789_s14 }
   0x8   : > { %s996_s22 = smov (%p23_p0, %s22_s22), 0  ;;  %s998_s23 = smov (!%p23_p0, %s25_s23), %s809_s19 }
   0x9   : > { %s55_s25 = ssub.s32 %s805_s18, %s996_s22  ;;  %p66_p2 = scmp.eq.s32.totalorder %s813_s20, 0 }
   0xa   : > { %p27_p3 = scmp.ge.s32.totalorder %s998_s23, 2  ;;  %p56_p4 = scmp.eq.s32.totalorder %s55_s25, 0 }
   0xb   : > { %p67_p5 = por %p66_p2, %p65_p1  ;;  %s112_s26 = sadd.s32 1, %s785_s13 }
   0xc   : > { %s1000_s23 = smov (%p27_p3, %s998_s23), 0  ;;  %p122_p6 = scmp.ne.s32.totalorder %s785_s13, %s781_s12 }
   0xd   : > { %s898_s27 = scalar_select %p56_p4, %s793_s15, %s58_s24  }
   0xe   : > { %s107_s28 = ssub.s32 %s809_s19, %s1000_s23  ;;  %p123_p7 = scmp.eq.s32.totalorder %s594_s21, 5 }
   0xf   : > { %s109_s29 = sor.u32 %s107_s28, %s55_s25  ;;  %p597_p10 = scmp.ge.s32.totalorder %s813_s20, 6 }
  0x10   : > { %p110_p8 = scmp.eq.s32.totalorder %s109_s29, 0  ;;  %p904_p9 = por %p123_p7, %p122_p6 }
  0x11   : > { %145 = sbr.rel (%p597_p10) target bundleno = 38 (0x26), region = 16 }
  0x12   : > { %s909_s4 = scalar_select %p110_p8, %s785_s13, %s112_s26  }
  0x18   : > { %157 = sbr.rel (!%p67_p5) target bundleno = 38 (0x26), region = 24  ;;  %s159_s5 = sand.u32 (%p67_p5), 1, %s793_s15  }
  0x19   : > { %s599_s6 = sshll.u32 (%p67_p5), %s805_s18, 2  ;;  %s598_s7 = sshll.u32 (%p67_p5), %s159_s5, 6 }
  0x1a   : > { %s917_s10 = scalar_lea.vmem (%p67_p5), %s983_s1, %s599_s6  ;;  %s161_s11 = scalar_lea.vmem (%p67_p5), [#allocation2], %s598_s7 }
  0x1b   : > { %v179_v0 = vld [vmem:[%s917_s10] sm:$0xf] (%p67_p5)  ;;  %v181_v1 = vld [vmem:[%s917_s10 + $0xc] sm:$0xf] (%p67_p5)  ;;  %v183_v2 = vld [vmem:[%s917_s10 + $0x18] sm:$0xf] (%p67_p5) }
  0x1c   : > { %180 = vst [vmem:[%s161_s11] sm:$0xf] (%p67_p5), %v179_v0  ;;  %182 = vst [vmem:[%s161_s11 + $0x4] sm:$0xf] (%p67_p5), %v181_v1  ;;  %v185_v3 = vld [vmem:[%s917_s10 + $0x24] sm:$0xf] (%p67_p5) }
  0x1d   : > { %v187_v4 = vld [vmem:[%s917_s10 + $0x30] sm:$0xf] (%p67_p5)  ;;  %184 = vst [vmem:[%s161_s11 + $0x8] sm:$0xf] (%p67_p5), %v183_v2  ;;  %186 = vst [vmem:[%s161_s11 + $0xc] sm:$0xf] (%p67_p5), %v185_v3 }
  0x1e   : > { %188 = vst [vmem:[%s161_s11 + $0x10] sm:$0xf] (%p67_p5), %v187_v4  ;;  %v189_v5 = vld [vmem:[%s917_s10 + $0x3c] sm:$0xf] (%p67_p5)  ;;  %v191_v6 = vld [vmem:[%s917_s10 + $0x48] sm:$0xf] (%p67_p5) }
  0x1f   : > { %v193_v7 = vld [vmem:[%s917_s10 + $0x54] sm:$0xf]  ;;  %190 = vst [vmem:[%s161_s11 + $0x14] sm:$0xf] %v189_v5  ;;  %192 = vst [vmem:[%s161_s11 + $0x18] sm:$0xf] %v191_v6 }
  0x20   : > { %194 = vst [vmem:[%s161_s11 + $0x1c] sm:$0xf] %v193_v7  ;;  %v195_v8 = vld [vmem:[%s917_s10 + $0x60] sm:$0xf]  ;;  %v197_v9 = vld [vmem:[%s917_s10 + $0x6c] sm:$0xf] }
  0x21   : > { %v199_v10 = vld [vmem:[%s917_s10 + $0x78] sm:$0xf]  ;;  %196 = vst [vmem:[%s161_s11 + $0x20] sm:$0xf] %v195_v8  ;;  %198 = vst [vmem:[%s161_s11 + $0x24] sm:$0xf] %v197_v9 }
  0x22   : > { %200 = vst [vmem:[%s161_s11 + $0x28] sm:$0xf] %v199_v10  ;;  %v201_v11 = vld [vmem:[%s917_s10 + $0x84] sm:$0xf]  ;;  %v203_v12 = vld [vmem:[%s917_s10 + $0x90] sm:$0xf] }
  0x23   : > { %v205_v13 = vld [vmem:[%s917_s10 + $0x9c] sm:$0xf]  ;;  %202 = vst [vmem:[%s161_s11 + $0x2c] sm:$0xf] %v201_v11  ;;  %204 = vst [vmem:[%s161_s11 + $0x30] sm:$0xf] %v203_v12 }
  0x24   : > { %206 = vst [vmem:[%s161_s11 + $0x34] sm:$0xf] %v205_v13  ;;  %v207_v14 = vld [vmem:[%s917_s10 + $0xa8] sm:$0xf]  ;;  %v209_v15 = vld [vmem:[%s917_s10 + $0xb4] sm:$0xf] }
  0x25   : > { %208 = vst [vmem:[%s161_s11 + $0x38] sm:$0xf] %v207_v14  ;;  %210 = vst [vmem:[%s161_s11 + $0x3c] sm:$0xf] %v209_v15 }
  0x26 PF: > { %p600_p11 = scmp.ge.s32.totalorder %s813_s20, 1  ;;  %p270_p12 = scmp.lt.s32.totalorder %s813_s20, 7 }
  0x28   : > { %p271_p13 = pnand %p600_p11, %p270_p12 }
  0x29   : > { %s277_s21 = sand.u32 (!%p271_p13), 1, %s789_s14   ;;  %s603_s24 = sshll.u32 (!%p271_p13), %s801_s17, 1  ;;  %v815_v16 = vmov (!%p271_p13), 0.0   ;;  %vm816_vm0 = vmmov (!%p271_p13), 0  }
  0x2a   : > { %274 = sbr.rel (%p271_p13) target bundleno = 303 (0x12f), region = 69  ;;  %639 = vmatprep.subr.bf16.mxu0 (!%p271_p13), %v815_v16  ;;  %s601_s25 = sshll.u32 (!%p271_p13), %s277_s21, 6  ;;  %655 = vmatprep.mubr.msk.bf16.mxu0 (!%p271_p13), %vm816_vm0, %v815_v16 }
  0x2b   : > { %p308_p0 = scmp.lt.s32.totalorder (!%p271_p13), %s603_s24, 3  ;;  %s279_s26 = scalar_lea.vmem (!%p271_p13), [#allocation2], %s601_s25 }
  0x2c   : > { %v734_v17 = vld [vmem:[%s279_s26] sm:$0xff] (!%p271_p13)   ;;  %v735_v18 = vld [vmem:[%s279_s26 + $0x8] sm:$0xff] (!%p271_p13)   ;;  %v736_v19 = vld [vmem:[%s279_s26 + $0x10] sm:$0xff] (!%p271_p13)   ;;  %p313_p1 = scmp.lt.s32.totalorder (!%p271_p13), %s797_s16, 2  ;;  %s304_s10 = sand.u32 (!%p271_p13), 1, %s781_s12  }
  0x2d   : > { %640 = vmatpush3.bf16.msra.mxu0 (!%p271_p13), %v734_v17  ;;  %v737_v20 = vld [vmem:[%s279_s26 + $0x18] sm:$0xff] (!%p271_p13)   ;;  %v738_v21 = vld [vmem:[%s279_s26 + $0x20] sm:$0xff] (!%p271_p13)   ;;  %v739_v22 = vld [vmem:[%s279_s26 + $0x28] sm:$0xff] (!%p271_p13)   ;;  %s602_s11 = sshll.u32 (!%p271_p13), %s304_s10, 3 }
  0x2e   : > { %641 = vmatprep.subr.bf16.mxu0 (!%p271_p13), %v815_v16  ;;  %v740_v23 = vld [vmem:[%s279_s26 + $0x30] sm:$0xff] (!%p271_p13)   ;;  %v741_v24 = vld [vmem:[%s279_s26 + $0x38] sm:$0xff] (!%p271_p13)   ;;  %s306_s21 = scalar_lea.vmem (!%p271_p13), [#allocation3], %s602_s11 }
  0x31   : > { %s1002_s24 = smov (!%p308_p0, %s603_s24), 3  ;;  %642 = vmatpush3.bf16.msra.mxu0 %v735_v18 }
  0x32   : > { %s604_s28 = sshll.u32 %s1002_s24, 2  ;;  %643 = vmatprep.subr.bf16.mxu0 %v815_v16  ;;  %s659_s24 = smul.u32 (%p904_p9), 6, %s801_s17 }
  0x33   : > { %s311_s14 = scalar_lea.vmem %s982_s0, %s604_s28 }
  0x34   : > { %v742_v25 = vld [vmem:[%s311_s14] sm:$0xff]   ;;  %s314_s6 = scalar_select %p313_p1, %s797_s16, 2 }
  0x35   : > { %644 = vmatpush3.bf16.msra.mxu0 %v736_v19  ;;  %s457_s25 = sadd.s32 (%p904_p9), %s797_s16, %s659_s24 }
  0x36   : > { %645 = vmatprep.subr.bf16.mxu0 %v815_v16  ;;  %s315_s9 = scalar_lea.vmem %s984_s2, %s314_s6  ;;  %s620_s12 = sshll.u32 (%p904_p9), %s457_s25, 2 }
  0x37   : > { %v605_v26 = vld [vmem:[%s315_s9] ss:$0 sm:$0xff]  ;;  %s459_s29 = scalar_lea.vmem (%p904_p9), %s985_s3, %s620_s12 }
  0x39   : > { %646 = vmatpush3.bf16.msra.mxu0 %v737_v20 }
  0x3a   : > { %647 = vmatprep.subr.bf16.mxu0 %v815_v16 }
  0x3d   : > { %648 = vmatpush3.bf16.msra.mxu0 %v738_v21 }
  0x3e   : > { %649 = vmatprep.subr.bf16.mxu0 %v815_v16 }
  0x41   : > { %650 = vmatpush3.bf16.msra.mxu0 %v739_v22 }
  0x42   : > { %651 = vmatprep.subr.bf16.mxu0 %v815_v16 }
  0x45   : > { %652 = vmatpush3.bf16.msra.mxu0 %v740_v23 }
  0x46   : > { %653 = vmatprep.subr.bf16.mxu0 %v815_v16 }
  0x49   : > { %654 = vmatpush3.bf16.msra.mxu0 %v741_v24 }
  0x4c   : > { %656 = vmatmul.mubr.bf16.vlgmr.msra.gmra.mrb[0].mxu0 %v742_v25 }
 0x11f   : > { %v431_v27 = vpop.f32.mrb[0].mxu0 }
 0x120   : > { %v657_v28 = vpop.f32.mrb[1].mxu0  ;;  %v432_v30 = vadd.f32 %v605_v26, %v431_v27  ;;  %454 = sbr.rel (!%p904_p9) target bundleno = 303 (0x12f), region = 77 }
 0x121   : > { %v434_v29 = vpop.f32.mrb[2].mxu0 }
 0x122   : > { %v435_v31 = vadd.f32 %v605_v26, %v434_v29  ;;  %v658_v32 = vpop.f32.mrb[3].mxu0 }
 0x124   : > { %v628_v33 = vpack.c.bf16 %v435_v31, %v432_v30 }
 0x126   : > { %629 = vst [vmem:[%s306_s21] sm:$0xff] %v628_v33  }
 0x12d   : > { %v475_v34 = vld [vmem:[%s306_s21] sm:$0xf]  ;;  %v477_v35 = vld [vmem:[%s306_s21 + $0x4] sm:$0xf] }
 0x12e   : > { %476 = vst [vmem:[%s459_s29] sm:$0xf] %v475_v34  ;;  %478 = vst [vmem:[%s459_s29 + $0xc] sm:$0xf] %v477_v35 }
 0x12f PF: > { %s13_s20 = sadd.s32 1, %s813_s20   ;;  %s987_s12 = smov %s785_s13 }
 0x130   : > { %p10_p2 = scmp.ge.s32.totalorder %s13_s20, 8   ;;  %s988_s13 = smov %s909_s4 }
 0x131   : > { %s989_s14 = smov %s793_s15  ;;  %s990_s15 = smov %s898_s27 }
 0x132   : > { %s991_s16 = smov %s805_s18  ;;  %s992_s17 = smov %s809_s19 }
 0x133   : > { %s993_s18 = smov %s996_s22  ;;  %s994_s19 = smov %s1000_s23 }
 0x134   :  { %12 = sbr.rel (!%p10_p2) target bundleno = 5 (0x5), region = 155 }

// kernel: deeplabv3_fcn_forward.35
= control target key start
LH: loop header
LB: loop body
LE: loop exit
PB: predicated region body
PF: predicated region fallthrough
CT: control target
= control target key end

     0   :  { %s1565_s12 = smov 0   ;;  %s1567_s13 = smov 0   ;;  %s1846_s0 = inlined_call_operand.vmem [shape: bf16[32,1152], index: 0, kind: input, shape index: {}]   ;;  %s1847_s1 = inlined_call_operand.vmem [shape: bf16[1152,128], index: 1, kind: input, shape index: {}]   ;;  %s1848_s2 = inlined_call_operand.vmem [shape: f32[1,128], index: 2, kind: input, shape index: {}]   ;;  %s1849_s3 = inlined_call_operand.vmem [shape: bf16[32,128], index: 3, kind: output, shape index: {}]  }
   0x1   :  { %s1569_s14 = smov 0  }
   0x2 LB: > { %s25_s15 = sadd.s32 1, %s1536_s13  ;;  %p1203_p0 = scmp.ge.s32.totalorder %s1540_s14, 1  ;;  %s1540_s14 = sphi %s1569_s14, %s13_s14   ;;  %s1536_s13 = sphi %s1567_s13, %s1851_s13   ;;  %s1532_s12 = sphi %s1565_s12, %s1850_s12  }
   0x3   : > { %p27_p1 = scmp.ge.s32.totalorder %s25_s15, 2  ;;  %p170_p2 = scmp.lt.s32.totalorder %s1540_s14, 3 }
   0x5   : > { %s1853_s15 = smov (%p27_p1, %s25_s15), 0  ;;  %p171_p3 = pnand %p1203_p0, %p170_p2 }
   0x6   : > { %v1446_v0 = vld [vmem:[%s1847_s1 + $0x40] sm:$0xff] (!%p171_p3)   ;;  %v1450_v4 = vld [vmem:[%s1847_s1 + $0x48] sm:$0xff] (!%p171_p3)   ;;  %v1454_v8 = vld [vmem:[%s1847_s1 + $0x50] sm:$0xff] (!%p171_p3)   ;;  %s1204_s21 = sshll.u32 (!%p171_p3), %s1532_s12, 1  ;;  %v1542_v33 = vmov (!%p171_p3), 0   ;;  %vm1544_vm0 = vmmov (!%p171_p3), 0  }
   0x7   : > { %174 = sbr.rel (%p171_p3) target bundleno = 324 (0x144), region = 32  ;;  %v1447_v1 = vld [vmem:[%s1847_s1] sm:$0xff] (!%p171_p3)   ;;  %1301 = vmatprep.subr.bf16.mxu0 (!%p171_p3), %v1446_v0  ;;  %v1451_v5 = vld [vmem:[%s1847_s1 + $0x8] sm:$0xff] (!%p171_p3)   ;;  %v1455_v9 = vld [vmem:[%s1847_s1 + $0x10] sm:$0xff] (!%p171_p3)   ;;  %p206_p4 = scmp.lt.s32.totalorder (!%p171_p3), %s1204_s21, 3 }
   0x8   : > { %v1448_v2 = vld [vmem:[%s1847_s1 + $0xc0] sm:$0xff] (!%p171_p3)   ;;  %1302 = vmatpush3.bf16.msra.mxu0 (!%p171_p3), %v1447_v1  ;;  %v1452_v6 = vld [vmem:[%s1847_s1 + $0xc8] sm:$0xff] (!%p171_p3)   ;;  %v1456_v10 = vld [vmem:[%s1847_s1 + $0xd0] sm:$0xff] (!%p171_p3)  }
   0x9   : > { %v1449_v3 = vld [vmem:[%s1847_s1 + $0x80] sm:$0xff] (!%p171_p3)   ;;  %1323 = vmatprep.subr.bf16.mxu1 (!%p171_p3), %v1448_v2  ;;  %1303 = vmatprep.subr.bf16.mxu0 (!%p171_p3), %v1450_v4  ;;  %v1453_v7 = vld [vmem:[%s1847_s1 + $0x88] sm:$0xff] (!%p171_p3)   ;;  %v1457_v11 = vld [vmem:[%s1847_s1 + $0x90] sm:$0xff] (!%p171_p3)  }
   0xa   : > { %1324 = vmatpush3.bf16.msra.mxu1 (!%p171_p3), %v1449_v3  ;;  %v1458_v12 = vld [vmem:[%s1847_s1 + $0x58] sm:$0xff] (!%p171_p3)   ;;  %v1462_v16 = vld [vmem:[%s1847_s1 + $0x60] sm:$0xff] (!%p171_p3)   ;;  %v1466_v20 = vld [vmem:[%s1847_s1 + $0x68] sm:$0xff] (!%p171_p3)  }
   0xb   : > { %1325 = vmatprep.subr.bf16.mxu1 (!%p171_p3), %v1452_v6  ;;  %v1459_v13 = vld [vmem:[%s1847_s1 + $0x18] sm:$0xff] (!%p171_p3)   ;;  %v1463_v17 = vld [vmem:[%s1847_s1 + $0x20] sm:$0xff] (!%p171_p3)   ;;  %v1467_v21 = vld [vmem:[%s1847_s1 + $0x28] sm:$0xff] (!%p171_p3)  }
   0xc   : > { %1304 = vmatpush3.bf16.msra.mxu0 (!%p171_p3), %v1451_v5  ;;  %v1460_v14 = vld [vmem:[%s1847_s1 + $0xd8] sm:$0xff] (!%p171_p3)   ;;  %v1464_v18 = vld [vmem:[%s1847_s1 + $0xe0] sm:$0xff] (!%p171_p3)   ;;  %v1468_v22 = vld [vmem:[%s1847_s1 + $0xe8] sm:$0xff] (!%p171_p3)  }
   0xd   : > { %1305 = vmatprep.subr.bf16.mxu0 (!%p171_p3), %v1454_v8  ;;  %v1461_v15 = vld [vmem:[%s1847_s1 + $0x98] sm:$0xff] (!%p171_p3)   ;;  %v1465_v19 = vld [vmem:[%s1847_s1 + $0xa0] sm:$0xff] (!%p171_p3)   ;;  %v1469_v23 = vld [vmem:[%s1847_s1 + $0xa8] sm:$0xff] (!%p171_p3)  }
   0xe   : > { %1326 = vmatpush3.bf16.msra.mxu1 %v1453_v7  ;;  %s1855_s21 = smov (!%p206_p4, %s1204_s21), 3  ;;  %v1470_v24 = vld [vmem:[%s1847_s1 + $0x70] sm:$0xff]   ;;  %v1474_v28 = vld [vmem:[%s1847_s1 + $0x78] sm:$0xff]   ;;  %v1478_v37 = vld [vmem:[%s1847_s1 + $0x140] sm:$0xff]  }
   0xf   : > { %1327 = vmatprep.subr.bf16.mxu1 %v1456_v10  ;;  %s1418_s20 = smul.u32 36, %s1855_s21  ;;  %v1471_v25 = vld [vmem:[%s1847_s1 + $0x30] sm:$0xff]   ;;  %v1475_v29 = vld [vmem:[%s1847_s1 + $0x38] sm:$0xff]   ;;  %v1479_v44 = vld [vmem:[%s1847_s1 + $0x100] sm:$0xff]   ;;  %s1207_s30 = sshll.u32 %s1855_s21, 2 }
  0x10   : > { %1306 = vmatpush3.bf16.msra.mxu0 %v1455_v9  ;;  %v1472_v26 = vld [vmem:[%s1847_s1 + $0xf0] sm:$0xff]   ;;  %v1476_v30 = vld [vmem:[%s1847_s1 + $0xf8] sm:$0xff]   ;;  %v1480_v45 = vld [vmem:[%s1847_s1 + $0x1c0] sm:$0xff]   ;;  %s226_s7 = scalar_lea.vmem %s1849_s3, %s1207_s30 }
  0x11   : > { %1307 = vmatprep.subr.bf16.mxu0 %v1458_v12  ;;  %v1473_v27 = vld [vmem:[%s1847_s1 + $0xb0] sm:$0xff]   ;;  %s1679_s4 = scalar_lea.vmem %s1846_s0, %s1418_s20  ;;  %v1477_v36 = vld [vmem:[%s1847_s1 + $0xb8] sm:$0xff]   ;;  %v1481_v48 = vld [vmem:[%s1847_s1 + $0x180] sm:$0xff]  }
  0x12   : > { %1328 = vmatpush3.bf16.msra.mxu1 %v1457_v11  ;;  %v229_v31 = vld [vmem:[%s1679_s4] sm:$0xff]  ;;  %v230_v38 = vld [vmem:[%s1679_s4 + $0x8] sm:$0xff]  ;;  %v1486_v53 = vld [vmem:[%s1847_s1 + $0x150] sm:$0xff]  }
  0x13   : > { %1329 = vmatprep.subr.bf16.mxu1 %v1460_v14  ;;  %v234_v32 = vld [vmem:[%s1679_s4 + $0x24] sm:$0xff]  ;;  %v239_v34 = vmax.bf16 %v1542_v33, %v229_v31  ;;  %v235_v41 = vld [vmem:[%s1679_s4 + $0x2c] sm:$0xff]  ;;  %v240_v42 = vmax.bf16 %v1542_v33, %v230_v38  ;;  %v1490_v57 = vld [vmem:[%s1847_s1 + $0x158] sm:$0xff]  }
  0x14   : > { %1308 = vmatpush3.bf16.msra.mxu0 %v1459_v13  ;;  %v244_v35 = vmax.bf16 %v1542_v33, %v234_v32  ;;  %v245_v43 = vmax.bf16 %v1542_v33, %v235_v41  ;;  %v1482_v49 = vld [vmem:[%s1847_s1 + $0x148] sm:$0xff]   ;;  %v1487_v54 = vld [vmem:[%s1847_s1 + $0x110] sm:$0xff]   ;;  %v1491_v58 = vld [vmem:[%s1847_s1 + $0x118] sm:$0xff]  }
  0x15   : > { %1309 = vmatprep.subr.bf16.mxu0 %v1462_v16  ;;  %v1483_v50 = vld [vmem:[%s1847_s1 + $0x108] sm:$0xff]   ;;  %v1488_v55 = vld [vmem:[%s1847_s1 + $0x1d0] sm:$0xff]   ;;  %v1492_v59 = vld [vmem:[%s1847_s1 + $0x1d8] sm:$0xff]  }
  0x16   : > { %1330 = vmatpush3.bf16.msra.mxu1 %v1461_v15  ;;  %v1210_v39 = vcombine.high %v239_v34, %v244_v35  ;;  %v1209_v40 = vcombine.low %v239_v34, %v244_v35  ;;  %v1212_v46 = vcombine.high %v240_v42, %v245_v43  ;;  %v1211_v47 = vcombine.low %v240_v42, %v245_v43  ;;  %v1484_v51 = vld [vmem:[%s1847_s1 + $0x1c8] sm:$0xff]   ;;  %v1489_v56 = vld [vmem:[%s1847_s1 + $0x190] sm:$0xff]   ;;  %v1493_v60 = vld [vmem:[%s1847_s1 + $0x198] sm:$0xff]  }
  0x17   : > { %1331 = vmatprep.subr.bf16.mxu1 %v1464_v18  ;;  %v1485_v52 = vld [vmem:[%s1847_s1 + $0x188] sm:$0xff]   ;;  %v1494_v61 = vld [vmem:[%s1847_s1 + $0x160] sm:$0xff]   ;;  %v1502_v5 = vld [vmem:[%s1847_s1 + $0x170] sm:$0xff]  }
  0x18   : > { %1310 = vmatpush3.bf16.msra.mxu0 %v1463_v17  ;;  %910 = vmatprep.mubr.bf16.mxu0 %v1210_v39  ;;  %v1495_v62 = vld [vmem:[%s1847_s1 + $0x120] sm:$0xff]   ;;  %v1498_v1 = vld [vmem:[%s1847_s1 + $0x168] sm:$0xff]   ;;  %v1503_v6 = vld [vmem:[%s1847_s1 + $0x130] sm:$0xff]  }
  0x19   : > { %1311 = vmatprep.subr.bf16.mxu0 %v1466_v20  ;;  %951 = vmatprep.mubr.bf16.mxu1 %v1212_v46  ;;  %v1496_v63 = vld [vmem:[%s1847_s1 + $0x1e0] sm:$0xff]   ;;  %v1499_v2 = vld [vmem:[%s1847_s1 + $0x128] sm:$0xff]   ;;  %v1504_v7 = vld [vmem:[%s1847_s1 + $0x1f0] sm:$0xff]  }
  0x1a   : > { %1332 = vmatpush3.bf16.msra.mxu1 %v1465_v19  ;;  %v1497_v0 = vld [vmem:[%s1847_s1 + $0x1a0] sm:$0xff]   ;;  %v1500_v3 = vld [vmem:[%s1847_s1 + $0x1e8] sm:$0xff]   ;;  %v1505_v8 = vld [vmem:[%s1847_s1 + $0x1b0] sm:$0xff]  }
  0x1b   : > { %1333 = vmatprep.subr.bf16.mxu1 %v1468_v22  ;;  %v1501_v4 = vld [vmem:[%s1847_s1 + $0x1a8] sm:$0xff]   ;;  %v1506_v9 = vld [vmem:[%s1847_s1 + $0x178] sm:$0xff]   ;;  %v231_v12 = vld [vmem:[%s1679_s4 + $0x10] sm:$0xff] }
  0x1c   : > { %1312 = vmatpush3.bf16.msra.mxu0 %v1467_v21  ;;  %v1507_v10 = vld [vmem:[%s1847_s1 + $0x138] sm:$0xff]   ;;  %v241_v14 = vmax.bf16 %v1542_v33, %v231_v12  ;;  %v1543_v21 = vmov 0.0  }
  0x1d   : > { %1313 = vmatprep.subr.bf16.mxu0 %v1470_v24  ;;  %v1508_v11 = vld [vmem:[%s1847_s1 + $0x1f8] sm:$0xff]   ;;  %v1510_v24 = vld [vmem:[%s1847_s1 + $0x200] sm:$0xff]  }
  0x1e   : > { %1334 = vmatpush3.bf16.msra.mxu1 %v1469_v23  ;;  %v236_v13 = vld [vmem:[%s1679_s4 + $0x34] sm:$0xff]  ;;  %v237_v18 = vld [vmem:[%s1679_s4 + $0x3c] sm:$0xff] }
  0x1f   : > { %1335 = vmatprep.subr.bf16.mxu1 %v1472_v26  ;;  %v246_v15 = vmax.bf16 %v1542_v33, %v236_v13  ;;  %v1509_v16 = vld [vmem:[%s1847_s1 + $0x1b8] sm:$0xff]   ;;  %v247_v23 = vmax.bf16 %v1542_v33, %v237_v18 }
  0x20   : > { %1314 = vmatpush3.bf16.msra.mxu0 %v1471_v25  ;;  %v232_v17 = vld [vmem:[%s1679_s4 + $0x18] sm:$0xff] }
  0x21   : > { %1315 = vmatprep.subr.bf16.mxu0 %v1474_v28  ;;  %v1214_v19 = vcombine.high %v241_v14, %v246_v15  ;;  %v1213_v20 = vcombine.low %v241_v14, %v246_v15  ;;  %v242_v22 = vmax.bf16 %v1542_v33, %v232_v17  ;;  %v233_v28 = vld [vmem:[%s1679_s4 + $0x20] sm:$0xf]  ;;  %v1513_v35 = vld [vmem:[%s1847_s1 + $0x218] sm:$0xff]  }
  0x22   : > { %1336 = vmatpush3.bf16.msra.mxu1 %v1473_v27  ;;  %v1511_v27 = vld [vmem:[%s1847_s1 + $0x208] sm:$0xff]   ;;  %v243_v31 = vmax.bf16 %v1542_v33, %v233_v28  ;;  %v1517_v38 = vld [vmem:[%s1847_s1 + $0x238] sm:$0xff]  }
  0x23   : > { %1337 = vmatprep.subr.bf16.mxu1 %v1476_v30  ;;  %v1216_v25 = vcombine.high %v242_v22, %v247_v23  ;;  %v1215_v26 = vcombine.low %v242_v22, %v247_v23  ;;  %v238_v30 = vld [vmem:[%s1679_s4 + $0x44] sm:$0xf] }
  0x24   : > { %1316 = vmatpush3.bf16.msra.mxu0 %v1475_v29  ;;  %v1512_v29 = vld [vmem:[%s1847_s1 + $0x210] sm:$0xff]   ;;  %v248_v32 = vmax.bf16 %v1542_v33, %v238_v30 }
  0x25   : > { %1345 = vmatprep.subr.bf16.mxu0 %v1478_v37  ;;  %v1515_v37 = vld [vmem:[%s1847_s1 + $0x228] sm:$0xff]   ;;  %v1516_v33 = vld [vmem:[%s1847_s1 + $0x230] sm:$0xff]  }
  0x26   : > { %1338 = vmatpush3.bf16.msra.mxu1 %v1477_v36  ;;  %v1217_v34 = vcombine.low %v243_v31, %v248_v32  ;;  %v1514_v36 = vld [vmem:[%s1847_s1 + $0x220] sm:$0xff]  }
  0x27   : > { %911 = vmatmul.mubr.bf16.vlgmr.msra.gmra.mrb[0].mxu0 %v1209_v40  ;;  %1367 = vmatprep.subr.bf16.mxu1 %v1480_v45  ;;  %v1208_v40 = vld [vmem:[%s1848_s2] ss:$0 sm:$0xff] }
  0x28   : > { %1346 = vmatpush3.bf16.msra.mxu0 %v1479_v44  ;;  %992 = vmatprep.mubr.bf16.mxu0 %v1214_v19 }
  0x29   : > { %952 = vmatmul.mubr.bf16.vlgmr.msra.gmra.mrb[0].mxu1 %v1211_v47  ;;  %1347 = vmatprep.subr.bf16.mxu0 %v1482_v49 }
  0x2a   : > { %1368 = vmatpush3.bf16.msra.mxu1 %v1481_v48  ;;  %1033 = vmatprep.mubr.bf16.mxu1 %v1216_v25 }
  0x2b   : > { %1369 = vmatprep.subr.bf16.mxu1 %v1484_v51 }
  0x2c   : > { %1348 = vmatpush3.bf16.msra.mxu0 %v1483_v50 }
  0x2d   : > { %1349 = vmatprep.subr.bf16.mxu0 %v1486_v53 }
  0x2e   : > { %1370 = vmatpush3.bf16.msra.mxu1 %v1485_v52 }
  0x2f   : > { %1371 = vmatprep.subr.bf16.mxu1 %v1488_v55 }
  0x30   : > { %1350 = vmatpush3.bf16.msra.mxu0 %v1487_v54 }
  0x31   : > { %1351 = vmatprep.subr.bf16.mxu0 %v1490_v57 }
  0x32   : > { %1372 = vmatpush3.bf16.msra.mxu1 %v1489_v56 }
  0x33   : > { %1373 = vmatprep.subr.bf16.mxu1 %v1492_v59 }
  0x34   : > { %1352 = vmatpush3.bf16.msra.mxu0 %v1491_v58 }
  0x35   : > { %1353 = vmatprep.subr.bf16.mxu0 %v1494_v61 }
  0x36   : > { %1374 = vmatpush3.bf16.msra.mxu1 %v1493_v60 }
  0x37   : > { %1375 = vmatprep.subr.bf16.mxu1 %v1496_v63 }
  0x38   : > { %1354 = vmatpush3.bf16.msra.mxu0 %v1495_v62 }
  0x39   : > { %1355 = vmatprep.subr.bf16.mxu0 %v1498_v1 }
  0x3a   : > { %1376 = vmatpush3.bf16.msra.mxu1 %v1497_v0 }
  0x3b   : > { %1377 = vmatprep.subr.bf16.mxu1 %v1500_v3 }
  0x3c   : > { %1356 = vmatpush3.bf16.msra.mxu0 %v1499_v2 }
  0x3d   : > { %1357 = vmatprep.subr.bf16.mxu0 %v1502_v5 }
  0x3e   : > { %1378 = vmatpush3.bf16.msra.mxu1 %v1501_v4 }
  0x3f   : > { %1379 = vmatprep.subr.bf16.mxu1 %v1504_v7 }
  0x40   : > { %1358 = vmatpush3.bf16.msra.mxu0 %v1503_v6 }
  0x41   : > { %1359 = vmatprep.subr.bf16.mxu0 %v1506_v9 }
  0x42   : > { %1380 = vmatpush3.bf16.msra.mxu1 %v1505_v8 }
  0x43   : > { %1381 = vmatprep.subr.bf16.mxu1 %v1508_v11 }
  0x44   : > { %1360 = vmatpush3.bf16.msra.mxu0 %v1507_v10 }
  0x45   : > { %1398 = vmatprep.subr.bf16.mxu0 %v1543_v21 }
  0x46   : > { %1382 = vmatpush3.bf16.msra.mxu1 %v1509_v16 }
  0x47   : > { %993 = vmatmul.mubr.bf16.vlgmr.msra.gmra.mrb[4].mxu0 %v1213_v20 }
  0x48   : > { %1399 = vmatpush3.bf16.msra.mxu0 %v1510_v24  ;;  %1414 = vmatprep.mubr.msk.bf16.mxu0 %vm1544_vm0, %v1543_v21 }
  0x49   : > { %1034 = vmatmul.mubr.bf16.vlgmr.msra.gmra.mrb[4].mxu1 %v1215_v26  ;;  %1400 = vmatprep.subr.bf16.mxu0 %v1543_v21 }
  0x4c   : > { %1401 = vmatpush3.bf16.msra.mxu0 %v1511_v27 }
  0x4d   : > { %1402 = vmatprep.subr.bf16.mxu0 %v1543_v21 }
  0x50   : > { %1403 = vmatpush3.bf16.msra.mxu0 %v1512_v29 }
  0x51   : > { %1404 = vmatprep.subr.bf16.mxu0 %v1543_v21 }
  0x54   : > { %1405 = vmatpush3.bf16.msra.mxu0 %v1513_v35 }
  0x55   : > { %1406 = vmatprep.subr.bf16.mxu0 %v1543_v21 }
  0x58   : > { %1407 = vmatpush3.bf16.msra.mxu0 %v1514_v36 }
  0x59   : > { %1408 = vmatprep.subr.bf16.mxu0 %v1543_v21 }
  0x5c   : > { %1409 = vmatpush3.bf16.msra.mxu0 %v1515_v37 }
  0x5d   : > { %1410 = vmatprep.subr.bf16.mxu0 %v1543_v21 }
  0x60   : > { %1411 = vmatpush3.bf16.msra.mxu0 %v1516_v33 }
  0x61   : > { %1412 = vmatprep.subr.bf16.mxu0 %v1543_v21 }
  0x64   : > { %1413 = vmatpush3.bf16.msra.mxu0 %v1517_v38 }
  0x67   : > { %1415 = vmatmul.mubr.bf16.vlgmr.msra.gmra.mrb[8].mxu0 %v1217_v34 }
  0xfa   : > { %v1317_v39 = vpop.f32.mrb[0].mxu0 }
  0xfb   : > { %v1318_v41 = vpop.f32.mrb[1].mxu0 }
  0xfc   : > { %v1319_v42 = vadd.f32 %v1318_v41, %v1317_v39  ;;  %v1320_v43 = vpop.f32.mrb[2].mxu0  ;;  %v1339_v44 = vpop.f32.mrb[0].mxu1 }
  0xfd   : > { %v1321_v45 = vpop.f32.mrb[3].mxu0  ;;  %v1340_v48 = vpop.f32.mrb[1].mxu1 }
  0xfe   : > { %v913_v46 = vadd.f32 %v1319_v42, %v1208_v40  ;;  %v1322_v47 = vadd.f32 %v1321_v45, %v1320_v43  ;;  %v1341_v49 = vadd.f32 %v1340_v48, %v1339_v44  ;;  %v1342_v50 = vpop.f32.mrb[2].mxu1 }
  0xff   : > { %v1343_v52 = vpop.f32.mrb[3].mxu1 }
 0x100   : > { %v916_v51 = vadd.f32 %v1322_v47, %v1208_v40  ;;  %v954_v53 = vadd.f32 %v1341_v49, %v913_v46  ;;  %v1344_v54 = vadd.f32 %v1343_v52, %v1342_v50 }
 0x102   : > { %v957_v55 = vadd.f32 %v1344_v54, %v916_v51 }
 0x11a   : > { %v1361_v56 = vpop.f32.mrb[4].mxu0 }
 0x11b   : > { %v1362_v57 = vpop.f32.mrb[5].mxu0 }
 0x11c   : > { %v1363_v58 = vadd.f32 %v1362_v57, %v1361_v56  ;;  %v1364_v59 = vpop.f32.mrb[6].mxu0  ;;  %v1383_v60 = vpop.f32.mrb[4].mxu1 }
 0x11d   : > { %v1365_v61 = vpop.f32.mrb[7].mxu0  ;;  %v1384_v62 = vpop.f32.mrb[5].mxu1 }
 0x11e   : > { %v995_v63 = vadd.f32 %v1363_v58, %v954_v53  ;;  %v1366_v0 = vadd.f32 %v1365_v61, %v1364_v59  ;;  %v1385_v1 = vadd.f32 %v1384_v62, %v1383_v60  ;;  %v1386_v2 = vpop.f32.mrb[6].mxu1 }
 0x11f   : > { %v1387_v3 = vpop.f32.mrb[7].mxu1 }
 0x120   : > { %v998_v4 = vadd.f32 %v1366_v0, %v957_v55  ;;  %v1388_v5 = vadd.f32 %v1387_v3, %v1386_v2  ;;  %v1036_v6 = vadd.f32 %v1385_v1, %v995_v63 }
 0x122   : > { %v1039_v7 = vadd.f32 %v1388_v5, %v998_v4 }
 0x13a   : > { %v1076_v8 = vpop.f32.mrb[8].mxu0 }
 0x13b   : > { %v1077_v9 = vadd.f32 %v1076_v8, %v1036_v6  ;;  %v1416_v10 = vpop.f32.mrb[9].mxu0 }
 0x13c   : > { %v1079_v11 = vpop.f32.mrb[10].mxu0 }
 0x13d   : > { %v1080_v12 = vadd.f32 %v1079_v11, %v1039_v7  ;;  %v1417_v13 = vpop.f32.mrb[11].mxu0  ;;  %v1083_v14 = vmax.f32 %v1077_v9, 0.0 }
 0x13f   : > { %v1084_v15 = vmax.f32 %v1080_v12, 0.0 }
 0x141   : > { %v1299_v16 = vpack.c.bf16 %v1084_v15, %v1083_v14 }
 0x143   : > { %1300 = vst [vmem:[%s226_s7] sm:$0xff] %v1299_v16  }
 0x144 PF: > { %s13_s14 = sadd.s32 1, %s1540_s14   ;;  %s1850_s12 = smov %s1536_s13 }
 0x145   : > { %p10_p5 = scmp.ge.s32.totalorder %s13_s14, 4   ;;  %s1851_s13 = smov %s1853_s15 }
 0x147   :  { %12 = sbr.rel (!%p10_p5) target bundleno = 2 (0x2), region = 68 }

// kernel: deeplabv3_fcn_forward.41
= control target key start
LH: loop header
LB: loop body
LE: loop exit
PB: predicated region body
PF: predicated region fallthrough
CT: control target
= control target key end

     0   :  { %s261_s6 = smov 0   ;;  %s282_s0 = inlined_call_operand.vmem [shape: bf16[2,16,256], index: 0, kind: input, shape index: {}]   ;;  %s283_s1 = inlined_call_operand.vmem [shape: bf16[2,1,256], index: 1, kind: output, shape index: {}]  }
   0x1 LB: > { %s221_s7 = sadd.s32 4294967295, %s248_s6   ;;  %p225_p0 = scmp.ge.s32.totalorder %s248_s6, 1  ;;  %s248_s6 = sphi %s261_s6, %s11_s6  }
   0x2   : > { %p87_p1 = scmp.lt.s32.totalorder %s248_s6, 3 }
   0x4   : > { %p88_p2 = pnand %p225_p0, %p87_p1 }
   0x5   : > { %p106_p3 = scmp.lt.s32.totalorder (!%p88_p2), %s221_s7, 1  ;;  %v250_v14 = vmov (!%p88_p2), 1966171168   ;;  %v146_v16 = vlaneseq (!%p88_p2)  ;;  %vm158_vm0 = vcmask (!%p88_p2), 1040384   ;;  %vm159_vm1 = vsmask.f32 (!%p88_p2), 256 }
   0x6   : > { %91 = sbr.rel (%p88_p2) target bundleno = 43 (0x2b), region = 24  ;;  %v144_v15 = vunpack.c.l.s4 (!%p88_p2), %v250_v14  ;;  %vm161_vm2 = vcmask (!%p88_p2), 1041409   ;;  %vm162_vm3 = vsmask.f32 (!%p88_p2), 1280  ;;  %vm160_vm4 = vmand (!%p88_p2), %vm158_vm0, %vm159_vm1 }
   0x7   : > { %v147_v22 = vshrl.u32 (!%p88_p2), %v146_v16, 7  ;;  %vm163_vm5 = vmand (!%p88_p2), %vm161_vm2, %vm162_vm3 }
   0x8   : > { %v145_v21 = vunpack.c.0.s8 (!%p88_p2), %v144_v15  ;;  %vm164_vm6 = vmor (!%p88_p2), %vm163_vm5, %vm160_vm4 }
   0xa   : > { %v148_v27 = vsub.s32 (!%p88_p2), %v145_v21, %v147_v22 }
   0xd   : > { %s285_s7 = smov (!%p106_p3, %s221_s7), 1 }
   0xe   : > { %s232_s8 = sshll.u32 %s285_s7, 4  ;;  %s228_s12 = sshll.u32 %s285_s7, 1 }
   0xf   : > { %s110_s11 = scalar_lea.vmem %s282_s0, %s232_s8  ;;  %s114_s15 = scalar_lea.vmem %s283_s1, %s228_s12 }
  0x10   : > { %v115_v0 = vld [vmem:[%s110_s11] sm:$0xff]  ;;  %v116_v1 = vld [vmem:[%s110_s11 + $0x8] sm:$0xff] }
  0x11   : > { %v117_v2 = vunpack.c.l.bf16 %v115_v0  ;;  %v118_v3 = vunpack.c.h.bf16 %v115_v0  ;;  %v119_v4 = vunpack.c.l.bf16 %v116_v1  ;;  %v120_v5 = vunpack.c.h.bf16 %v116_v1  ;;  %v165_v30 = vld [vmem:[%s114_s15] sm:$0x3] }
  0x13   : > { %v121_v6 = vadd.f32 %v119_v4, %v117_v2  ;;  %v128_v7 = vadd.f32 %v120_v5, %v118_v3 }
  0x15   : > { %v122_v8 = vrot.slane %v121_v6, 4  ;;  %v129_v9 = vrot.slane %v128_v7, 4 }
  0x17   : > { %v123_v10 = vadd.f32 %v122_v8, %v121_v6  ;;  %v130_v11 = vadd.f32 %v129_v9, %v128_v7 }
  0x19   : > { %v124_v12 = vrot.slane %v123_v10, 2  ;;  %v131_v13 = vrot.slane %v130_v11, 2 }
  0x1b   : > { %v125_v17 = vadd.f32 %v124_v12, %v123_v10  ;;  %v132_v18 = vadd.f32 %v131_v13, %v130_v11 }
  0x1d   : > { %v126_v19 = vrot.slane %v125_v17, 1  ;;  %v133_v20 = vrot.slane %v132_v18, 1 }
  0x1f   : > { %v127_v23 = vadd.f32 %v126_v19, %v125_v17  ;;  %v134_v24 = vadd.f32 %v133_v20, %v132_v18 }
  0x21   : > { %v136_v25 = vmul.f32 0.0625, %v127_v23  ;;  %v137_v26 = vmul.f32 0.0625, %v134_v24 }
  0x23   : > { %v229_v28 = vpack.c.bf16 %v137_v26, %v136_v25 }
  0x25   : > { %v149_v29 = vrot.slane %v229_v28, %v148_v27 }
  0x27   : > { %v156_v31 = vrot.slane %v149_v29, %v148_v27 }
  0x29   : > { %v166_v32 = vsel %vm164_vm6, %v156_v31, %v165_v30 }
  0x2a   : > { %167 = vst [vmem:[%s114_s15] sm:$0x3] %v166_v32 }
  0x2b PF: > { %s11_s6 = sadd.s32 1, %s248_s6  }
  0x2c   : > { %p8_p4 = scmp.ge.s32.totalorder %s11_s6, 4  }
  0x2e   :  { %10 = sbr.rel (!%p8_p4) target bundleno = 1 (0x1), region = 54 }

// kernel: deeplabv3_fcn_forward.38
= control target key start
LH: loop header
LB: loop body
LE: loop exit
PB: predicated region body
PF: predicated region fallthrough
CT: control target
= control target key end

     0   :  { %s605_s12 = smov 0   ;;  %s607_s13 = smov 0   ;;  %s668_s0 = inlined_call_operand.vmem [shape: bf16[32,128], index: 0, kind: input, shape index: {}]   ;;  %s669_s1 = inlined_call_operand.vmem [shape: bf16[128,128], index: 1, kind: input, shape index: {}]   ;;  %s670_s2 = inlined_call_operand.vmem [shape: f32[1,128], index: 2, kind: input, shape index: {}]   ;;  %s671_s3 = inlined_call_operand.vmem [shape: bf16[32,128], index: 3, kind: output, shape index: {}]  }
   0x1   :  { %s609_s14 = smov 0  }
   0x2 LB: > { %s25_s15 = sadd.s32 1, %s576_s13  ;;  %p468_p0 = scmp.ge.s32.totalorder %s580_s14, 1  ;;  %s580_s14 = sphi %s609_s14, %s13_s14   ;;  %s576_s13 = sphi %s607_s13, %s673_s13   ;;  %s572_s12 = sphi %s605_s12, %s672_s12  }
   0x3   : > { %p27_p1 = scmp.ge.s32.totalorder %s25_s15, 2  ;;  %p169_p2 = scmp.lt.s32.totalorder %s580_s14, 3 }
   0x5   : > { %s675_s15 = smov (%p27_p1, %s25_s15), 0  ;;  %p170_p3 = pnand %p468_p0, %p169_p2 }
   0x6   : > { %v550_v0 = vld [vmem:[%s669_s1] sm:$0xff] (!%p170_p3)   ;;  %v582_v1 = vmov (!%p170_p3), 0.0   ;;  %v551_v2 = vld [vmem:[%s669_s1 + $0x8] sm:$0xff] (!%p170_p3)   ;;  %vm583_vm0 = vmmov (!%p170_p3), 0   ;;  %s469_s20 = sshll.u32 (!%p170_p3), %s572_s12, 1  ;;  %v552_v3 = vld [vmem:[%s669_s1 + $0x10] sm:$0xff] (!%p170_p3)  }
   0x7   : > { %173 = sbr.rel (%p170_p3) target bundleno = 260 (0x104), region = 32  ;;  %503 = vmatprep.subr.bf16.mxu0 (!%p170_p3), %v582_v1  ;;  %519 = vmatprep.mubr.msk.bf16.mxu0 (!%p170_p3), %vm583_vm0, %v582_v1  ;;  %p204_p4 = scmp.lt.s32.totalorder (!%p170_p3), %s469_s20, 3  ;;  %v553_v4 = vld [vmem:[%s669_s1 + $0x18] sm:$0xff] (!%p170_p3)   ;;  %v554_v5 = vld [vmem:[%s669_s1 + $0x20] sm:$0xff] (!%p170_p3)   ;;  %v555_v6 = vld [vmem:[%s669_s1 + $0x28] sm:$0xff] (!%p170_p3)   ;;  %v584_v10 = vmov (!%p170_p3), 0  }
   0x8   : > { %504 = vmatpush3.bf16.msra.mxu0 (!%p170_p3), %v550_v0  ;;  %v556_v7 = vld [vmem:[%s669_s1 + $0x30] sm:$0xff] (!%p170_p3)   ;;  %v557_v13 = vld [vmem:[%s669_s1 + $0x38] sm:$0xff] (!%p170_p3)   ;;  %v473_v15 = vld [vmem:[%s670_s2] ss:$0 sm:$0xff] (!%p170_p3) }
   0x9   : > { %505 = vmatprep.subr.bf16.mxu0 (!%p170_p3), %v582_v1 }
   0xc   : > { %506 = vmatpush3.bf16.msra.mxu0 (!%p170_p3), %v551_v2 }
   0xd   : > { %507 = vmatprep.subr.bf16.mxu0 (!%p170_p3), %v582_v1 }
   0xe   : > { %s677_s20 = smov (!%p204_p4, %s469_s20), 3 }
   0xf   : > { %s470_s27 = sshll.u32 %s677_s20, 2 }
  0x10   : > { %508 = vmatpush3.bf16.msra.mxu0 %v552_v3  ;;  %s207_s5 = scalar_lea.vmem %s668_s0, %s470_s27  ;;  %s223_s17 = scalar_lea.vmem %s671_s3, %s470_s27 }
  0x11   : > { %509 = vmatprep.subr.bf16.mxu0 %v582_v1  ;;  %v226_v8 = vld [vmem:[%s207_s5] sm:$0xf]  ;;  %v227_v9 = vld [vmem:[%s207_s5 + $0x4] sm:$0xf] }
  0x12   : > { %v228_v11 = vmax.bf16 %v584_v10, %v226_v8  ;;  %v229_v12 = vmax.bf16 %v584_v10, %v227_v9 }
  0x14   : > { %510 = vmatpush3.bf16.msra.mxu0 %v553_v4  ;;  %v474_v14 = vcombine.low %v228_v11, %v229_v12 }
  0x15   : > { %511 = vmatprep.subr.bf16.mxu0 %v582_v1 }
  0x18   : > { %512 = vmatpush3.bf16.msra.mxu0 %v554_v5 }
  0x19   : > { %513 = vmatprep.subr.bf16.mxu0 %v582_v1 }
  0x1c   : > { %514 = vmatpush3.bf16.msra.mxu0 %v555_v6 }
  0x1d   : > { %515 = vmatprep.subr.bf16.mxu0 %v582_v1 }
  0x20   : > { %516 = vmatpush3.bf16.msra.mxu0 %v556_v7 }
  0x21   : > { %517 = vmatprep.subr.bf16.mxu0 %v582_v1 }
  0x24   : > { %518 = vmatpush3.bf16.msra.mxu0 %v557_v13 }
  0x27   : > { %520 = vmatmul.mubr.bf16.vlgmr.msra.gmra.mrb[0].mxu0 %v474_v14 }
  0xfa   : > { %v341_v16 = vpop.f32.mrb[0].mxu0 }
  0xfb   : > { %v342_v17 = vadd.f32 %v473_v15, %v341_v16  ;;  %v521_v18 = vpop.f32.mrb[1].mxu0 }
  0xfc   : > { %v344_v19 = vpop.f32.mrb[2].mxu0 }
  0xfd   : > { %v345_v20 = vadd.f32 %v473_v15, %v344_v19  ;;  %v522_v21 = vpop.f32.mrb[3].mxu0  ;;  %v348_v22 = vmax.f32 %v342_v17, 0.0 }
  0xff   : > { %v349_v23 = vmax.f32 %v345_v20, 0.0 }
 0x101   : > { %v492_v24 = vpack.c.bf16 %v349_v23, %v348_v22 }
 0x103   : > { %493 = vst [vmem:[%s223_s17] sm:$0xff] %v492_v24  }
 0x104 PF: > { %s13_s14 = sadd.s32 1, %s580_s14   ;;  %s672_s12 = smov %s576_s13 }
 0x105   : > { %p10_p5 = scmp.ge.s32.totalorder %s13_s14, 4   ;;  %s673_s13 = smov %s675_s15 }
 0x107   :  { %12 = sbr.rel (!%p10_p5) target bundleno = 2 (0x2), region = 68 }

// kernel: deeplabv3_fcn_forward.39
= control target key start
LH: loop header
LB: loop body
LE: loop exit
PB: predicated region body
PF: predicated region fallthrough
CT: control target
= control target key end

     0   :  { %s765_s15 = smov 0   ;;  %s767_s16 = smov 0   ;;  %s856_s0 = inlined_call_operand.vmem [shape: bf16[32,128], index: 0, kind: input, shape index: {}]   ;;  %s857_s1 = inlined_call_operand.vmem [shape: bf16[128,256], index: 1, kind: input, shape index: {}]   ;;  %s858_s2 = inlined_call_operand.vmem [shape: f32[1,256], index: 2, kind: input, shape index: {}]   ;;  %s859_s3 = inlined_call_operand.vmem [shape: bf16[32,256], index: 3, kind: input, shape index: {}]   ;;  %s860_s4 = inlined_call_operand.vmem [shape: bf16[32,256], index: 4, kind: output, shape index: {}]  }
   0x1   :  { %s769_s17 = smov 0  }
   0x2 LB: > { %s26_s18 = sadd.s32 1, %s733_s16  ;;  %p631_p0 = scmp.ge.s32.totalorder %s737_s17, 1  ;;  %s737_s17 = sphi %s769_s17, %s14_s17   ;;  %s733_s16 = sphi %s767_s16, %s862_s16   ;;  %s729_s15 = sphi %s765_s15, %s861_s15  }
   0x3   : > { %p28_p1 = scmp.ge.s32.totalorder %s26_s18, 2  ;;  %p217_p2 = scmp.lt.s32.totalorder %s737_s17, 3 }
   0x5   : > { %s864_s18 = smov (%p28_p1, %s26_s18), 0  ;;  %p218_p3 = pnand %p631_p0, %p217_p2 }
   0x6   : > { %v690_v0 = vld [vmem:[%s857_s1 + $0x4] ss:$8 sps:$4 sm:$0xff] (!%p218_p3)   ;;  %s632_s21 = sshll.u32 (!%p218_p3), %s729_s15, 1  ;;  %v692_v1 = vld [vmem:[%s857_s1] ss:$8 sps:$4 sm:$0xff] (!%p218_p3)   ;;  %v739_v2 = vmov (!%p218_p3), 0   ;;  %v329_v18 = vlaneseq (!%p218_p3) }
   0x7   : > { %221 = sbr.rel (%p218_p3) target bundleno = 263 (0x107), region = 36  ;;  %457 = vmatprep.mubr.bf16.mxu0 (!%p218_p3), %v739_v2  ;;  %p268_p4 = scmp.lt.s32.totalorder (!%p218_p3), %s632_s21, 3  ;;  %425 = vmatprep.subr.bf16.mxu0 (!%p218_p3), %v690_v0  ;;  %v693_v3 = vld [vmem:[%s857_s1 + $0x14] ss:$8 sps:$4 sm:$0xff] (!%p218_p3)   ;;  %v695_v4 = vld [vmem:[%s857_s1 + $0x10] ss:$8 sps:$4 sm:$0xff] (!%p218_p3)  }
   0x8   : > { %426 = vmatpush1.bf16.msra.mxu0 (!%p218_p3), %v692_v1  ;;  %v696_v5 = vld [vmem:[%s857_s1 + $0x24] ss:$8 sps:$4 sm:$0xff] (!%p218_p3)   ;;  %v698_v6 = vld [vmem:[%s857_s1 + $0x20] ss:$8 sps:$4 sm:$0xff] (!%p218_p3)   ;;  %v699_v7 = vld [vmem:[%s857_s1 + $0x34] ss:$8 sps:$4 sm:$0xff] (!%p218_p3)  }
   0x9   : > { %427 = vmatprep.subr.bf16.mxu0 (!%p218_p3), %v693_v3  ;;  %v701_v8 = vld [vmem:[%s857_s1 + $0x30] ss:$8 sps:$4 sm:$0xff] (!%p218_p3)   ;;  %v702_v9 = vld [vmem:[%s857_s1 + $0x44] ss:$8 sps:$4 sm:$0xff] (!%p218_p3)   ;;  %v704_v10 = vld [vmem:[%s857_s1 + $0x40] ss:$8 sps:$4 sm:$0xff] (!%p218_p3)  }
   0xa   : > { %v705_v11 = vld [vmem:[%s857_s1 + $0x54] ss:$8 sps:$4 sm:$0xff] (!%p218_p3)   ;;  %v707_v12 = vld [vmem:[%s857_s1 + $0x50] ss:$8 sps:$4 sm:$0xff] (!%p218_p3)   ;;  %v708_v13 = vld [vmem:[%s857_s1 + $0x64] ss:$8 sps:$4 sm:$0xff] (!%p218_p3)  }
   0xb   : > { %v710_v14 = vld [vmem:[%s857_s1 + $0x60] ss:$8 sps:$4 sm:$0xff] (!%p218_p3)   ;;  %v711_v15 = vld [vmem:[%s857_s1 + $0x74] ss:$8 sps:$4 sm:$0xff] (!%p218_p3)   ;;  %v713_v16 = vld [vmem:[%s857_s1 + $0x70] ss:$8 sps:$4 sm:$0xff] (!%p218_p3)  }
   0xc   : > { %428 = vmatpush1.bf16.msra.mxu0 (!%p218_p3), %v695_v4  ;;  %v330_v19 = vshrl.u32 (!%p218_p3), %v329_v18, 7  ;;  %v327_v21 = vld [vmem:[%s858_s2] sm:$0x3] (!%p218_p3) }
   0xd   : > { %429 = vmatprep.subr.bf16.mxu0 (!%p218_p3), %v696_v5 }
   0xe   : > { %s866_s21 = smov (!%p268_p4, %s632_s21), 3  ;;  %v331_v20 = vsub.s32 0, %v330_v19  ;;  %v335_v22 = vsub.s32 1, %v330_v19 }
   0xf   : > { %s633_s30 = sshll.u32 %s866_s21, 2  ;;  %s661_s8 = sshll.u32 %s866_s21, 3 }
  0x10   : > { %s271_s11 = scalar_lea.vmem %s856_s0, %s633_s30  ;;  %430 = vmatpush1.bf16.msra.mxu0 %v698_v6  ;;  %s293_s12 = scalar_lea.vmem %s859_s3, %s661_s8  ;;  %v332_v24 = vrot.slane %v327_v21, %v331_v20  ;;  %v336_v25 = vrot.slane %v327_v21, %v335_v22 }
  0x11   : > { %431 = vmatprep.subr.bf16.mxu0 %v699_v7  ;;  %v714_v17 = vld [vmem:[%s271_s11] sm:$0xff]   ;;  %v469_v26 = vld [vmem:[%s293_s12 + $0x8] sm:$0xff]  ;;  %s305_s15 = scalar_lea.vmem %s860_s4, %s661_s8 }
  0x12   : > { %v468_v23 = vld [vmem:[%s293_s12] sm:$0xff]  ;;  %v472_v32 = vunpack.c.l.bf16 %v469_v26  ;;  %v473_v35 = vunpack.c.h.bf16 %v469_v26 }
  0x13   : > { %v470_v27 = vunpack.c.l.bf16 %v468_v23  ;;  %v471_v29 = vunpack.c.h.bf16 %v468_v23 }
  0x14   : > { %432 = vmatpush1.bf16.msra.mxu0 %v701_v8 }
  0x15   : > { %433 = vmatprep.subr.bf16.mxu0 %v702_v9 }
  0x18   : > { %434 = vmatpush1.bf16.msra.mxu0 %v704_v10 }
  0x19   : > { %435 = vmatprep.subr.bf16.mxu0 %v705_v11 }
  0x1c   : > { %436 = vmatpush1.bf16.msra.mxu0 %v707_v12 }
  0x1d   : > { %437 = vmatprep.subr.bf16.mxu0 %v708_v13 }
  0x20   : > { %438 = vmatpush1.bf16.msra.mxu0 %v710_v14 }
  0x21   : > { %439 = vmatprep.subr.bf16.mxu0 %v711_v15 }
  0x24   : > { %440 = vmatpush1.bf16.msra.mxu0 %v713_v16 }
  0x27   : > { %458 = vmatmul.mubr.bf16.vlgmr.msra.gmra.mrb[0].mxu0 %v714_v17 }
  0xfa   : > { %v459_v28 = vpop.f32.mrb[0].mxu0 }
  0xfb   : > { %v460_v30 = vadd.f32 %v459_v28, %v332_v24  ;;  %v461_v31 = vpop.f32.mrb[1].mxu0 }
  0xfc   : > { %v462_v33 = vadd.f32 %v461_v31, %v336_v25  ;;  %v463_v34 = vpop.f32.mrb[2].mxu0 }
  0xfd   : > { %v474_v36 = vadd.f32 %v470_v27, %v460_v30  ;;  %v464_v37 = vadd.f32 %v463_v34, %v332_v24  ;;  %v465_v38 = vpop.f32.mrb[3].mxu0 }
  0xfe   : > { %v475_v39 = vadd.f32 %v471_v29, %v462_v33  ;;  %v466_v40 = vadd.f32 %v465_v38, %v336_v25 }
  0xff   : > { %v478_v41 = vmax.f32 %v474_v36, 0.0  ;;  %v476_v42 = vadd.f32 %v472_v32, %v464_v37 }
 0x100   : > { %v479_v43 = vmax.f32 %v475_v39, 0.0  ;;  %v477_v44 = vadd.f32 %v473_v35, %v466_v40 }
 0x101   : > { %v480_v45 = vmax.f32 %v476_v42, 0.0 }
 0x102   : > { %v663_v46 = vpack.c.bf16 %v479_v43, %v478_v41  ;;  %v481_v47 = vmax.f32 %v477_v44, 0.0 }
 0x104   : > { %494 = vst [vmem:[%s305_s15] sm:$0xff] %v663_v46  ;;  %v664_v48 = vpack.c.bf16 %v481_v47, %v480_v45 }
 0x106   : > { %495 = vst [vmem:[%s305_s15 + $0x8] sm:$0xff] %v664_v48 }
 0x107 PF: > { %s14_s17 = sadd.s32 1, %s737_s17   ;;  %s861_s15 = smov %s733_s16 }
 0x108   : > { %p11_p5 = scmp.ge.s32.totalorder %s14_s17, 4   ;;  %s862_s16 = smov %s864_s18 }
 0x10a   :  { %13 = sbr.rel (!%p11_p5) target bundleno = 2 (0x2), region = 75 }

// kernel: deeplabv3_fcn_forward.40
= control target key start
LH: loop header
LB: loop body
LE: loop exit
PB: predicated region body
PF: predicated region fallthrough
CT: control target
= control target key end

     0   :  { %s683_s12 = smov 0   ;;  %s685_s13 = smov 0   ;;  %s771_s0 = inlined_call_operand.vmem [shape: bf16[32,256], index: 0, kind: input, shape index: {}]   ;;  %s772_s1 = inlined_call_operand.vmem [shape: bf16[256,128], index: 1, kind: input, shape index: {}]   ;;  %s773_s2 = inlined_call_operand.vmem [shape: f32[1,128], index: 2, kind: input, shape index: {}]   ;;  %s774_s3 = inlined_call_operand.vmem [shape: bf16[32,128], index: 3, kind: output, shape index: {}]  }
   0x1   :  { %s687_s14 = smov 0  }
   0x2 LB: > { %s25_s15 = sadd.s32 1, %s657_s13  ;;  %p537_p0 = scmp.ge.s32.totalorder %s661_s14, 1  ;;  %s661_s14 = sphi %s687_s14, %s13_s14   ;;  %s657_s13 = sphi %s685_s13, %s776_s13   ;;  %s653_s12 = sphi %s683_s12, %s775_s12  }
   0x3   : > { %p27_p1 = scmp.ge.s32.totalorder %s25_s15, 2  ;;  %p170_p2 = scmp.lt.s32.totalorder %s661_s14, 3 }
   0x5   : > { %s778_s15 = smov (%p27_p1, %s25_s15), 0  ;;  %p171_p3 = pnand %p537_p0, %p170_p2 }
   0x6   : > { %v620_v0 = vld [vmem:[%s772_s1 + $0x40] sm:$0xff] (!%p171_p3)   ;;  %s538_s18 = sshll.u32 (!%p171_p3), %s653_s12, 1  ;;  %v622_v2 = vld [vmem:[%s772_s1 + $0x48] sm:$0xff] (!%p171_p3)   ;;  %v624_v4 = vld [vmem:[%s772_s1 + $0x50] sm:$0xff] (!%p171_p3)  }
   0x7   : > { %174 = sbr.rel (%p171_p3) target bundleno = 263 (0x107), region = 32  ;;  %v621_v1 = vld [vmem:[%s772_s1] sm:$0xff] (!%p171_p3)   ;;  %574 = vmatprep.subr.bf16.mxu0 (!%p171_p3), %v620_v0  ;;  %v623_v3 = vld [vmem:[%s772_s1 + $0x8] sm:$0xff] (!%p171_p3)   ;;  %p206_p4 = scmp.lt.s32.totalorder (!%p171_p3), %s538_s18, 3  ;;  %v625_v5 = vld [vmem:[%s772_s1 + $0x10] sm:$0xff] (!%p171_p3)  }
   0x8   : > { %575 = vmatpush3.bf16.msra.mxu0 (!%p171_p3), %v621_v1  ;;  %v626_v6 = vld [vmem:[%s772_s1 + $0x58] sm:$0xff] (!%p171_p3)   ;;  %v628_v8 = vld [vmem:[%s772_s1 + $0x60] sm:$0xff] (!%p171_p3)   ;;  %v630_v10 = vld [vmem:[%s772_s1 + $0x68] sm:$0xff] (!%p171_p3)  }
   0x9   : > { %576 = vmatprep.subr.bf16.mxu0 (!%p171_p3), %v622_v2  ;;  %v627_v7 = vld [vmem:[%s772_s1 + $0x18] sm:$0xff] (!%p171_p3)   ;;  %v629_v9 = vld [vmem:[%s772_s1 + $0x20] sm:$0xff] (!%p171_p3)   ;;  %v631_v12 = vld [vmem:[%s772_s1 + $0x28] sm:$0xff] (!%p171_p3)  }
   0xa   : > { %v632_v13 = vld [vmem:[%s772_s1 + $0x70] sm:$0xff] (!%p171_p3)   ;;  %v634_v15 = vld [vmem:[%s772_s1 + $0x78] sm:$0xff] (!%p171_p3)   ;;  %v543_v19 = vld [vmem:[%s773_s2] ss:$0 sm:$0xff] (!%p171_p3) }
   0xb   : > { %v633_v14 = vld [vmem:[%s772_s1 + $0x30] sm:$0xff] (!%p171_p3)   ;;  %v635_v16 = vld [vmem:[%s772_s1 + $0x38] sm:$0xff] (!%p171_p3)  }
   0xc   : > { %577 = vmatpush3.bf16.msra.mxu0 (!%p171_p3), %v623_v3 }
   0xd   : > { %578 = vmatprep.subr.bf16.mxu0 (!%p171_p3), %v624_v4 }
   0xe   : > { %s780_s18 = smov (!%p206_p4, %s538_s18), 3 }
   0xf   : > { %s566_s6 = sshll.u32 %s780_s18, 3  ;;  %s542_s5 = sshll.u32 %s780_s18, 2 }
  0x10   : > { %579 = vmatpush3.bf16.msra.mxu0 %v625_v5  ;;  %s210_s11 = scalar_lea.vmem %s771_s0, %s566_s6  ;;  %s226_s8 = scalar_lea.vmem %s774_s3, %s542_s5 }
  0x11   : > { %580 = vmatprep.subr.bf16.mxu0 %v626_v6  ;;  %v638_v11 = vld [vmem:[%s210_s11 + $0x4] ss:$8 sps:$4 sm:$0xff]   ;;  %v636_v17 = vld [vmem:[%s210_s11] ss:$8 sps:$4 sm:$0xff]  }
  0x12   : > { %408 = vmatprep.mubr.bf16.mxu0 %v638_v11 }
  0x14   : > { %581 = vmatpush3.bf16.msra.mxu0 %v627_v7 }
  0x15   : > { %582 = vmatprep.subr.bf16.mxu0 %v628_v8 }
  0x18   : > { %583 = vmatpush3.bf16.msra.mxu0 %v629_v9 }
  0x19   : > { %584 = vmatprep.subr.bf16.mxu0 %v630_v10 }
  0x1c   : > { %585 = vmatpush3.bf16.msra.mxu0 %v631_v12 }
  0x1d   : > { %586 = vmatprep.subr.bf16.mxu0 %v632_v13 }
  0x20   : > { %587 = vmatpush3.bf16.msra.mxu0 %v633_v14 }
  0x21   : > { %588 = vmatprep.subr.bf16.mxu0 %v634_v15 }
  0x24   : > { %589 = vmatpush3.bf16.msra.mxu0 %v635_v16 }
  0x27   : > { %409 = vmatmul.mubr.bf16.vlgmr.msra.gmra.mrb[0].mxu0 %v636_v17 }
  0xfa   : > { %v590_v18 = vpop.f32.mrb[0].mxu0 }
  0xfb   : > { %v591_v20 = vpop.f32.mrb[1].mxu0 }
  0xfc   : > { %v592_v21 = vadd.f32 %v591_v20, %v590_v18  ;;  %v593_v22 = vpop.f32.mrb[2].mxu0 }
  0xfd   : > { %v594_v23 = vpop.f32.mrb[3].mxu0 }
  0xfe   : > { %v411_v24 = vadd.f32 %v592_v21, %v543_v19  ;;  %v595_v25 = vadd.f32 %v594_v23, %v593_v22 }
 0x100   : > { %v414_v26 = vadd.f32 %v595_v25, %v543_v19  ;;  %v417_v27 = vmax.f32 %v411_v24, 0.0 }
 0x102   : > { %v418_v28 = vmax.f32 %v414_v26, 0.0 }
 0x104   : > { %v572_v29 = vpack.c.bf16 %v418_v28, %v417_v27 }
 0x106   : > { %573 = vst [vmem:[%s226_s8] sm:$0xff] %v572_v29  }
 0x107 PF: > { %s13_s14 = sadd.s32 1, %s661_s14   ;;  %s775_s12 = smov %s657_s13 }
 0x108   : > { %p10_p5 = scmp.ge.s32.totalorder %s13_s14, 4   ;;  %s776_s13 = smov %s778_s15 }
 0x10a   :  { %12 = sbr.rel (!%p10_p5) target bundleno = 2 (0x2), region = 68 }

// kernel: deeplabv3_fcn_forward.42
= control target key start
LH: loop header
LB: loop body
LE: loop exit
PB: predicated region body
PF: predicated region fallthrough
CT: control target
= control target key end

     0   :  { %v280_v6 = vmov 1966171168   ;;  %v67_v8 = vlaneseq  ;;  %s358_s1 = inlined_call_operand.vmem [shape: bf16[256,128], index: 1, kind: input, shape index: {}]   ;;  %s359_s0 = inlined_call_operand.vmem [shape: bf16[2,256], index: 0, kind: input, shape index: {}]   ;;  %s360_s2 = inlined_call_operand.vmem [shape: f32[1,128], index: 2, kind: input, shape index: {}]   ;;  %s361_s3 = inlined_call_operand.vmem [shape: bf16[2,128], index: 3, kind: output, shape index: {}]  }
   0x1   :  { %v264_v0 = vld [vmem:[%s358_s1 + $0x40] sm:$0xff]   ;;  %v266_v2 = vld [vmem:[%s358_s1 + $0x48] sm:$0xff]   ;;  %v268_v4 = vld [vmem:[%s358_s1 + $0x50] sm:$0xff]   ;;  %v65_v7 = vunpack.c.l.s4 %v280_v6 }
   0x2   :  { %v265_v1 = vld [vmem:[%s358_s1] sm:$0xff]   ;;  %241 = vmatprep.subr.bf16.mxu0 %v264_v0  ;;  %v267_v3 = vld [vmem:[%s358_s1 + $0x8] sm:$0xff]   ;;  %v269_v5 = vld [vmem:[%s358_s1 + $0x10] sm:$0xff]   ;;  %v68_v12 = vshrl.u32 %v67_v8, 7 }
   0x3   :  { %242 = vmatpush3.bf16.msra.mxu0 %v265_v1  ;;  %v270_v9 = vld [vmem:[%s358_s1 + $0x58] sm:$0xff]   ;;  %v66_v11 = vunpack.c.0.s8 %v65_v7  ;;  %v272_v13 = vld [vmem:[%s358_s1 + $0x60] sm:$0xff]   ;;  %v274_v16 = vld [vmem:[%s358_s1 + $0x68] sm:$0xff]  }
   0x4   :  { %243 = vmatprep.subr.bf16.mxu0 %v266_v2  ;;  %v271_v10 = vld [vmem:[%s358_s1 + $0x18] sm:$0xff]   ;;  %v273_v14 = vld [vmem:[%s358_s1 + $0x20] sm:$0xff]   ;;  %v275_v19 = vld [vmem:[%s358_s1 + $0x28] sm:$0xff]  }
   0x5   :  { %v69_v15 = vsub.s32 %v66_v11, %v68_v12  ;;  %v224_v17 = vld.sshfl [vmem:[%s359_s0] sm:$0x11 pattern:$0x75316420]  ;;  %v276_v21 = vld [vmem:[%s358_s1 + $0x70] sm:$0xff]   ;;  %v278_v23 = vld [vmem:[%s358_s1 + $0x78] sm:$0xff]  }
   0x6   :  { %v63_v18 = vcombine.high %v224_v17, %v224_v17  ;;  %v277_v22 = vld [vmem:[%s358_s1 + $0x30] sm:$0xff]   ;;  %v279_v24 = vld [vmem:[%s358_s1 + $0x38] sm:$0xff]   ;;  %v223_v27 = vld [vmem:[%s360_s2] ss:$0 sm:$0xff] }
   0x7   :  { %244 = vmatpush3.bf16.msra.mxu0 %v267_v3  ;;  %v70_v25 = vrot.slane %v224_v17, %v69_v15 }
   0x8   :  { %245 = vmatprep.subr.bf16.mxu0 %v268_v4  ;;  %v77_v20 = vrot.slane %v63_v18, %v69_v15 }
   0xa   :  { %208 = vmatprep.mubr.bf16.mxu0 %v77_v20 }
   0xb   :  { %246 = vmatpush3.bf16.msra.mxu0 %v269_v5 }
   0xc   :  { %247 = vmatprep.subr.bf16.mxu0 %v270_v9 }
   0xf   :  { %248 = vmatpush3.bf16.msra.mxu0 %v271_v10 }
  0x10   :  { %249 = vmatprep.subr.bf16.mxu0 %v272_v13 }
  0x13   :  { %250 = vmatpush3.bf16.msra.mxu0 %v273_v14 }
  0x14   :  { %251 = vmatprep.subr.bf16.mxu0 %v274_v16 }
  0x17   :  { %252 = vmatpush3.bf16.msra.mxu0 %v275_v19 }
  0x18   :  { %253 = vmatprep.subr.bf16.mxu0 %v276_v21 }
  0x1b   :  { %254 = vmatpush3.bf16.msra.mxu0 %v277_v22 }
  0x1c   :  { %255 = vmatprep.subr.bf16.mxu0 %v278_v23 }
  0x1f   :  { %256 = vmatpush3.bf16.msra.mxu0 %v279_v24 }
  0x22   :  { %209 = vmatmul.mubr.bf16.vlgmr.msra.gmra.mrb[0].mxu0 %v70_v25 }
  0xf5   :  { %v257_v26 = vpop.f32.mrb[0].mxu0 }
  0xf6   :  { %v258_v28 = vpop.f32.mrb[1].mxu0 }
  0xf7   :  { %v259_v29 = vadd.f32 %v258_v28, %v257_v26  ;;  %v260_v30 = vpop.f32.mrb[2].mxu0 }
  0xf8   :  { %v261_v31 = vpop.f32.mrb[3].mxu0 }
  0xf9   :  { %v211_v32 = vadd.f32 %v259_v29, %v223_v27 }
  0xfb   :  { %v216_v33 = vmax.f32 %v211_v32, 0.0 }
  0xfd   :  { %v217_v34 = vpack.c.bf16 %v216_v33, %v216_v33 }
  0xff   :  { %218 = vst [vmem:[%s361_s3] sm:$0x1] %v217_v34 }

// kernel: deeplabv3_fcn_forward.48
= control target key start
LH: loop header
LB: loop body
LE: loop exit
PB: predicated region body
PF: predicated region fallthrough
CT: control target
= control target key end

     0   :  { %s383_s9 = smov 0   ;;  %s406_s0 = inlined_call_operand.vmem [shape: bf16[32,4], index: 0, kind: input, shape index: {}]   ;;  %s407_s1 = inlined_call_operand.vmem [shape: bf16[8,4,256], index: 1, kind: input, shape index: {}]   ;;  %s408_s2 = inlined_call_operand.vmem [shape: bf16[8,32,256], index: 2, kind: output, shape index: {}]  }
   0x1 LB: > { %s319_s10 = sadd.s32 4294967295, %s365_s9   ;;  %p323_p0 = scmp.ge.s32.totalorder %s365_s9, 1  ;;  %s365_s9 = sphi %s383_s9, %s12_s9  }
   0x2   : > { %p112_p1 = scmp.lt.s32.totalorder %s365_s9, 9 }
   0x4   : > { %p113_p2 = pnand %p323_p0, %p112_p1 }
   0x5   : > { %p134_p3 = scmp.lt.s32.totalorder (!%p113_p2), %s319_s10, 7  ;;  %v367_v0 = vmov (!%p113_p2), 0   ;;  %vm176_vm0 = vcmask (!%p113_p2), 1041408   ;;  %v357_v4 = vld [vmem:[%s406_s0] sm:$0xff] (!%p113_p2)   ;;  %v358_v5 = vld [vmem:[%s406_s0 + $0x8] sm:$0xff] (!%p113_p2)   ;;  %vm169_vm1 = vcmask (!%p113_p2), 31744  }
   0x6   : > { %116 = sbr.rel (%p113_p2) target bundleno = 241 (0xf1), region = 28  ;;  %215 = vmatprep.mubr.bf16.mxu0 (!%p113_p2), %v367_v0  ;;  %225 = vmatprep.mubr.bf16.mxu1 (!%p113_p2), %v367_v0 }
   0xd   : > { %s410_s10 = smov (!%p134_p3, %s319_s10), 7 }
   0xe   : > { %s340_s11 = sshll.u32 %s410_s10, 2  ;;  %s341_s19 = sshll.u32 %s410_s10, 5 }
   0xf   : > { %s138_s14 = scalar_lea.vmem %s407_s1, %s340_s11  ;;  %s143_s22 = scalar_lea.vmem %s408_s2, %s341_s19 }
  0x10   : > { %v330_v1 = vld.sshfl [vmem:[%s138_s14] sm:$0x33 pattern:$0x76325410] }
  0x11   : > { %v168_v2 = vcombine.high %v330_v1, %v330_v1  ;;  %v178_v3 = vsel %vm176_vm0, %v330_v1, 0 }
  0x13   : > { %331 = vmatprep.subr.msk.bf16.mxu0 %vm176_vm0, %v168_v2  ;;  %346 = vmatprep.subr.msk.bf16.mxu1 %vm176_vm0, %v168_v2 }
  0x14   : > { %184 = vmatpush1.bf16.msra.mxu0 %v178_v3  ;;  %347 = vmatpush1.bf16.msra.mxu1 %v178_v3 }
  0x17   : > { %332 = vmatmul.mubr.msk.bf16.vlgmr.msra.gmra.mrb[0].mxu0 %vm169_vm1, %v357_v4  ;;  %333 = vmatmul.mubr.msk.bf16.vlgmr.msra.gmra.mrb[0].mxu1 %vm169_vm1, %v358_v5 }
  0xea   : > { %v217_v6 = vpop.f32.mrb[0].mxu0  ;;  %v227_v7 = vpop.f32.mrb[0].mxu1 }
  0xeb   : > { %v219_v8 = vpop.f32.mrb[1].mxu0  ;;  %v229_v9 = vpop.f32.mrb[1].mxu1 }
  0xec   : > { %v342_v10 = vpack.c.bf16 %v219_v8, %v217_v6  ;;  %v344_v11 = vpack.c.bf16 %v229_v9, %v227_v7  ;;  %v221_v12 = vpop.f32.mrb[2].mxu0  ;;  %v231_v13 = vpop.f32.mrb[2].mxu1 }
  0xed   : > { %v223_v14 = vpop.f32.mrb[3].mxu0  ;;  %v233_v15 = vpop.f32.mrb[3].mxu1 }
  0xee   : > { %260 = vst [vmem:[%s143_s22] sm:$0xff] %v342_v10  ;;  %262 = vst [vmem:[%s143_s22 + $0x10] sm:$0xff] %v344_v11  ;;  %v343_v16 = vpack.c.bf16 %v223_v14, %v221_v12  ;;  %v345_v17 = vpack.c.bf16 %v233_v15, %v231_v13 }
  0xf0   : > { %261 = vst [vmem:[%s143_s22 + $0x8] sm:$0xff] %v343_v16  ;;  %263 = vst [vmem:[%s143_s22 + $0x18] sm:$0xff] %v345_v17 }
  0xf1 PF: > { %s12_s9 = sadd.s32 1, %s365_s9  }
  0xf2   : > { %p9_p4 = scmp.ge.s32.totalorder %s12_s9, 10  }
  0xf4   :  { %11 = sbr.rel (!%p9_p4) target bundleno = 1 (0x1), region = 58 }

// kernel: deeplabv3_fcn_forward.49
= control target key start
LH: loop header
LB: loop body
LE: loop exit
PB: predicated region body
PF: predicated region fallthrough
CT: control target
= control target key end

     0   :  { %s375_s9 = smov 0   ;;  %s402_s0 = inlined_call_operand.vmem [shape: bf16[32,4], index: 0, kind: input, shape index: {}]   ;;  %s403_s1 = inlined_call_operand.vmem [shape: bf16[2,4,64], index: 1, kind: input, shape index: {}]   ;;  %s404_s2 = inlined_call_operand.vmem [shape: f32[2,32,64], index: 2, kind: output, shape index: {}]  }
   0x1 LB: > { %s301_s10 = sadd.s32 4294967295, %s358_s9   ;;  %p305_p0 = scmp.ge.s32.totalorder %s358_s9, 1  ;;  %s358_s9 = sphi %s375_s9, %s12_s9  }
   0x2   : > { %p111_p1 = scmp.lt.s32.totalorder %s358_s9, 3 }
   0x4   : > { %p112_p2 = pnand %p305_p0, %p111_p1 }
   0x5   : > { %p132_p3 = scmp.lt.s32.totalorder (!%p112_p2), %s301_s10, 1  ;;  %v334_v0 = vld [vmem:[%s402_s0] sm:$0xff] (!%p112_p2)   ;;  %vm157_vm0 = vcmask (!%p112_p2), 31744   ;;  %vm164_vm1 = vcmask (!%p112_p2), 1041408   ;;  %v335_v3 = vld [vmem:[%s402_s0 + $0x8] sm:$0xff] (!%p112_p2)   ;;  %vm241_vm2 = vcmask (!%p112_p2), 523264  }
   0x6   : > { %115 = sbr.rel (%p112_p2) target bundleno = 265 (0x109), region = 28  ;;  %321 = vmatprep.mubr.msk.bf16.mxu0 (!%p112_p2), %vm157_vm0, %v334_v0 }
   0xd   : > { %s406_s10 = smov (!%p132_p3, %s301_s10), 1 }
   0xe   : > { %s306_s13 = sshll.u32 %s406_s10, 1  ;;  %s315_s19 = sshll.u32 %s406_s10, 5 }
   0xf   : > { %s135_s16 = scalar_lea.vmem %s403_s1, %s306_s13  ;;  %s140_s22 = scalar_lea.vmem %s404_s2, %s315_s19 }
  0x10   : > { %v146_v1 = vld [vmem:[%s135_s16] sm:$0x3] }
  0x11   : > { %325 = vmatprep.subr.msk.bf16.mxu0 %vm164_vm1, %v146_v1  ;;  %v166_v2 = vsel %vm164_vm1, %v146_v1, 0 }
  0x12   : > { %320 = vmatpush3.bf16.msra.mxu0 %v166_v2 }
  0x15   : > { %322 = vmatmul.mubr.msk.bf16.vlgmr.msra.gmra.mrb[0].mxu0 %vm157_vm0, %v335_v3 }
  0xe8   : > { %v323_v4 = vpop.f32.mrb[0].mxu0 }
  0xe9   : > { %v219_v5 = vsub.f32 0.0, %v323_v4  ;;  %v202_v6 = vpop.f32.mrb[1].mxu0 }
  0xea   : > { %v217_v7 = vsub.f32 0.0, %v202_v6  ;;  %v324_v8 = vpop.f32.mrb[2].mxu0 }
  0xeb   : > { %v225_v9 = vmul.f32 1.442695, %v219_v5  ;;  %v220_v10 = vsub.f32 0.0, %v324_v8  ;;  %v205_v11 = vpop.f32.mrb[3].mxu0 }
  0xec   : > { %v221_v12 = vmul.f32 1.442695, %v217_v7  ;;  %v218_v13 = vsub.f32 0.0, %v205_v11 }
  0xed   : > { %336 = vpow2.f32 %v225_v9  ;;  %v227_v14 = vmul.f32 1.442695, %v220_v10 }
  0xee   : > { %338 = vpow2.f32 %v221_v12  ;;  %v223_v15 = vmul.f32 1.442695, %v218_v13 }
  0xef   : > { %340 = vpow2.f32 %v227_v14 }
  0xf0   : > { %342 = vpow2.f32 %v223_v15 }
  0xf7   : > { %v337_v16 = vpop.eup %336 }
  0xf8   : > { %v339_v17 = vpop.eup %338  ;;  %v231_v18 = vadd.f32 1.0, %v337_v16 }
  0xf9   : > { %v341_v19 = vpop.eup %340  ;;  %v229_v20 = vadd.f32 1.0, %v339_v17 }
  0xfa   : > { %v343_v21 = vpop.eup %342  ;;  %344 = vrcp.f32 %v231_v18  ;;  %v232_v22 = vadd.f32 1.0, %v341_v19 }
  0xfb   : > { %346 = vrcp.f32 %v229_v20  ;;  %v230_v23 = vadd.f32 1.0, %v343_v21 }
  0xfc   : > { %348 = vrcp.f32 %v232_v22 }
  0xfd   : > { %350 = vrcp.f32 %v230_v23 }
 0x104   : > { %v345_v24 = vpop.eup %344 }
 0x105   : > { %v347_v25 = vpop.eup %346  ;;  %244 = vst.msk [vmem:[%s140_s22 + $0x10] sm:$0xff] %vm241_vm2, %v345_v24 }
 0x106   : > { %v349_v26 = vpop.eup %348  ;;  %242 = vst.msk [vmem:[%s140_s22] sm:$0xff] %vm241_vm2, %v347_v25 }
 0x107   : > { %v351_v27 = vpop.eup %350  ;;  %245 = vst.msk [vmem:[%s140_s22 + $0x18] sm:$0xff] %vm241_vm2, %v349_v26 }
 0x108   : > { %243 = vst.msk [vmem:[%s140_s22 + $0x8] sm:$0xff] %vm241_vm2, %v351_v27 }
 0x109 PF: > { %s12_s9 = sadd.s32 1, %s358_s9  }
 0x10a   : > { %p9_p4 = scmp.ge.s32.totalorder %s12_s9, 4  }
 0x10c   :  { %11 = sbr.rel (!%p9_p4) target bundleno = 1 (0x1), region = 58 }

</bundles_post_ra>
